<compile_context>
chip_gen: v5e
topology: v5e:2x2
jax: 0.10.0
libtpu: 0.0.40
codegen_flags: <defaults>
</compile_context>

<pallas_src>
import copy
import functools
import math

import numpy as np
import jax
import jax.numpy as jnp
from jax import lax
from jax.experimental import pallas as pl
from jax.experimental.pallas import tpu as pltpu


_TIME_ALIGN = 16                       # bf16 sublane packing


def _default_vmem_limit():
    # ~80% of physical VMEM: ~51 MiB on v7x (64 MiB), ~102 MiB on v5e/v6e (128 MiB).
    try:
        cap = pltpu.get_tpu_info().vmem_capacity_bytes
        return max(32 * 1024 * 1024, min(int(cap * 0.8), 112 * 1024 * 1024))
    except Exception:
        return 64 * 1024 * 1024


_VMEM_LIMIT = _default_vmem_limit()
_VSPEC = pl.BlockSpec(memory_space=pltpu.MemorySpace.VMEM)


# ----------------------------------------------------------------------------
# Small padding helpers
# ----------------------------------------------------------------------------

def _round_up(n, m):
    return ((n + m - 1) // m) * m


def _pad_dim_to(x, axis, target):
    pad = target - x.shape[axis]
    if pad <= 0:
        return x
    widths = [(0, 0)] * x.ndim
    widths[axis] = (0, pad)
    return jnp.pad(x, widths)


def _pad_axis_to(x, axis, mult):
    return _pad_dim_to(x, axis, _round_up(x.shape[axis], mult))


# ----------------------------------------------------------------------------
# Pallas kernels
# ----------------------------------------------------------------------------

def _bn_relu_write(acc, o_ref, t_true, pool):
    """One-pass BatchNorm(train, gamma=1, beta=0) + ReLU epilogue.

    acc: (B*t_pad, TC) f32 conv output (no bias — cancelled by batch-stat BN).
    Padded time rows (t >= t_true) are zeroed, excluded from the statistics
    (true B*t_true divisor) and forced to zero in the output.
    """
    bt, tc = acc.shape
    b = o_ref.shape[0]
    t_pad = bt // b
    n = float(b * t_true)

    valid = None
    if t_pad != t_true:
        rows = lax.broadcasted_iota(jnp.int32, (bt, 1), 0)
        valid = (rows % t_pad) < t_true
        acc = jnp.where(valid, acc, 0.0)

    mean = jnp.sum(acc, axis=0, keepdims=True) * (1.0 / n)
    var = jnp.sum(acc * acc, axis=0, keepdims=True) * (1.0 / n) - mean * mean
    y = (acc - mean) * lax.rsqrt(var + 1e-5)
    y = jnp.maximum(y, 0.0)
    if valid is not None:
        y = jnp.where(valid, y, 0.0)

    if pool:
        # Fused AdaptiveAvgPool1d(1): emit only the time mean of this tile.
        o_ref[...] = (jnp.sum(y.reshape(b, t_pad, tc), axis=1)
                      * (1.0 / t_true)).astype(o_ref.dtype)
    else:
        o_ref[...] = y.reshape(b, t_pad, tc).astype(o_ref.dtype)


def _conv_im2col_kernel(x_ref, w_ref, o_ref, *, t_true, pool):
    """Taps folded into the contraction dim: one dense MXU matmul per Cout tile.

    x_ref: (B, t_pad, K) bf16 im2col input (resident across the Cout grid)
    w_ref: (K, TC)       bf16 weight tile
    o_ref: (B, t_pad, TC) or, when pool=True, (B, TC)
    """
    b, t_pad, k = x_ref.shape
    acc = jnp.dot(x_ref[...].reshape(b * t_pad, k), w_ref[...],
                  preferred_element_type=jnp.float32)
    _bn_relu_write(acc, o_ref, t_true, pool)


def _conv_taps_kernel(taps_ref, x_ref, w_ref, o_ref, acc_ref, *, t_true, pool):
    """Per-tap matmuls with runtime skipping of masked-out taps.

    taps_ref: SMEM (2*ntiles,) int32, [lo, hi) active-tap range per Cout tile
    x_ref:    (B, Tx, K)  bf16 padded input (resident across the Cout grid)
    w_ref:    (L, K, TC)  bf16 weight tile, one (K, TC) matrix per tap
    acc_ref:  (B*t_pad, TC) f32 scratch accumulator
    """
    b = x_ref.shape[0]
    l, k_dim, _ = w_ref.shape
    bt = acc_ref.shape[0]
    t_pad = bt // b

    j = pl.program_id(0)
    lo = taps_ref[2 * j]
    hi = taps_ref[2 * j + 1]

    acc_ref[...] = jnp.zeros_like(acc_ref)
    for k in range(l):                                  # static unroll over taps
        @pl.when(jnp.logical_and(lo <= k, k < hi))      # skip masked taps at runtime
        def _():
            xs = x_ref[:, k:k + t_pad, :].reshape(bt, k_dim)
            acc_ref[...] += jnp.dot(xs, w_ref[k],
                                    preferred_element_type=jnp.float32)

    _bn_relu_write(acc_ref[...], o_ref, t_true, pool)


def _linear_kernel(x_ref, w_ref, b_ref, o_ref):
    """Tiny head: (B, C) @ (C, n_class) + bias (input already pooled)."""
    o_ref[...] = (jnp.dot(x_ref[...], w_ref[...],
                          preferred_element_type=jnp.float32) + b_ref[...])


# ----------------------------------------------------------------------------
# pallas_call wrappers
# ----------------------------------------------------------------------------

def _tile_tap_table(groups, cout, tc, ntiles, kernel_len):
    """Per-Cout-tile union of active taps, from the (static) mask structure."""
    taps = np.zeros((2 * ntiles,), np.int32)
    for j in range(ntiles):
        c0, c1 = j * tc, min((j + 1) * tc, cout)
        lo, hi = kernel_len, 0
        for (g0, g1, tl, th) in groups:
            if g1 > c0 and g0 < c1:
                lo, hi = min(lo, tl), max(hi, th)
        if hi <= lo:                                    # tile of pure padding (shouldn't happen)
            lo, hi = 0, kernel_len
        taps[2 * j], taps[2 * j + 1] = lo, hi
    return taps


def conv_bn_relu(x_btc, weight, groups, true_cin, true_t, *, pool=False,
                 out_dtype=jnp.bfloat16):
    """Fused masked conv1d (asymmetric same-pad) + BatchNorm1d(train) + ReLU.

    x_btc:  (B, T_lane, C_lane) activation; time rows >= true_t and channel
            lanes >= true_cin are zero (inert).
    weight: (Cout, true_cin, L) masked torch Conv1d layout.
    groups: list of (ch_start, ch_end, tap_lo, tap_hi) from the mask structure.
    pool:   if True, also fuse AdaptiveAvgPool1d(1) and emit (B, Cout_p) f32.

    The conv bias is intentionally NOT applied: with batch-statistic BN
    (gamma=1, beta=0) it is exactly cancelled by the mean subtraction.
    """
    B = x_btc.shape[0]
    Cout, Cin, L = weight.shape
    assert Cin == true_cin
    left, right = (L - 1) // 2, L // 2                  # ConstantPad1d semantics
    t_pad = _round_up(true_t, _TIME_ALIGN)

    Cout_p = _round_up(Cout, 128)
    TC = 256 if Cout_p % 256 == 0 else 128              # fill the 2x256x256 MXU when possible
    ntiles = Cout_p // TC

    cp = pltpu.CompilerParams(dimension_semantics=("parallel",),   # BN is per-channel
                              vmem_limit_bytes=_VMEM_LIMIT)

    if pool:
        out_shape = jax.ShapeDtypeStruct((B, Cout_p), jnp.float32)
        out_spec_plain = pl.BlockSpec((B, TC), lambda j: (0, j))
        out_spec_pref = pl.BlockSpec((B, TC), lambda j, t: (0, j))
    else:
        out_shape = jax.ShapeDtypeStruct((B, t_pad, Cout_p), out_dtype)
        out_spec_plain = pl.BlockSpec((B, t_pad, TC), lambda j: (0, 0, j))
        out_spec_pref = pl.BlockSpec((B, t_pad, TC), lambda j, t: (0, 0, j))

    out_bytes = int(np.prod(out_shape.shape)) * jnp.dtype(out_shape.dtype).itemsize

    if L * Cin <= 256:
        # --- im2col path: fold taps into the contraction dim (K <= 256). ---
        xr = x_btc[:, :true_t, :Cin]
        xp = jnp.pad(xr, ((0, 0), (left, right), (0, 0)))
        xc = jnp.concatenate([xp[:, k:k + true_t, :] for k in range(L)], axis=-1)
        xc = _pad_dim_to(xc, 1, t_pad)                                  # exact-zero pad rows
        x_in = _pad_axis_to(xc, 2, 128).astype(jnp.bfloat16)            # (B, t_pad, K)
        K = x_in.shape[2]
        w = jnp.transpose(weight, (2, 1, 0)).reshape(L * Cin, Cout)     # (L*Cin, Cout)
        w = _pad_dim_to(_pad_dim_to(w, 0, K), 1, Cout_p).astype(jnp.bfloat16)

        flops = 2 * B * t_pad * K * Cout_p
        ce = pl.CostEstimate(flops=int(flops), transcendentals=int(Cout_p),
                             bytes_accessed=int(x_in.size * 2 + w.size * 2 + out_bytes))
        kern = functools.partial(_conv_im2col_kernel, t_true=true_t, pool=pool)
        return pl.pallas_call(
            kern,
            out_shape=out_shape,
            grid=(ntiles,),
            in_specs=[pl.BlockSpec((B, t_pad, K), lambda j: (0, 0, 0)),  # resident input
                      pl.BlockSpec((K, TC), lambda j: (0, j))],
            out_specs=out_spec_plain,
            compiler_params=cp,
            cost_estimate=ce,
        )(x_in, w)

    # --- multi-tap path (large Cin): per-tap matmuls + runtime tap skipping. ---
    xr = x_btc[:, :true_t, :]
    xp = jnp.pad(xr, ((0, 0), (left, right), (0, 0)))                   # (B, true_t+L-1, C)
    xp = _pad_dim_to(xp, 1, _round_up(t_pad + L - 1, _TIME_ALIGN))      # room for all tap slices
    x_in = _pad_axis_to(xp, 2, 128).astype(jnp.bfloat16)                # (B, Tx, K)
    Tx, K = x_in.shape[1], x_in.shape[2]
    w = jnp.transpose(weight, (2, 1, 0))                                # (L, Cin, Cout)
    w = _pad_dim_to(_pad_dim_to(w, 1, K), 2, Cout_p).astype(jnp.bfloat16)

    taps = _tile_tap_table(groups, Cout, TC, ntiles, L)
    active = sum(int(taps[2 * j + 1] - taps[2 * j]) for j in range(ntiles))
    flops = 2 * B * t_pad * K * TC * active
    ce = pl.CostEstimate(flops=int(flops), transcendentals=int(Cout_p),
                         bytes_accessed=int(x_in.size * 2 + w.size * 2 + out_bytes))

    kern = functools.partial(_conv_taps_kernel, t_true=true_t, pool=pool)
    gs = pltpu.PrefetchScalarGridSpec(
        num_scalar_prefetch=1,
        grid=(ntiles,),
        in_specs=[pl.BlockSpec((B, Tx, K), lambda j, t: (0, 0, 0)),     # resident input
                  pl.BlockSpec((L, K, TC), lambda j, t: (0, 0, j))],
        out_specs=out_spec_pref,
        scratch_shapes=[pltpu.VMEM((B * t_pad, TC), jnp.float32)])
    return pl.pallas_call(
        kern,
        out_shape=out_shape,
        grid_spec=gs,
        compiler_params=cp,
        cost_estimate=ce,
    )(jnp.asarray(taps), x_in, w)


def linear(pooled, lin_w, lin_b):
    """pooled: (B, C_lane) f32 (padded lanes zero); lin_w: (n_class, C_true)."""
    B, C_lane = pooled.shape
    n_class = lin_w.shape[0]
    w = _pad_dim_to(jnp.transpose(lin_w).astype(jnp.float32), 0, C_lane)
    w = _pad_axis_to(w, 1, 128)
    b2 = _pad_axis_to(lin_b.astype(jnp.float32)[None, :], 1, 128)
    out = pl.pallas_call(
        _linear_kernel,
        out_shape=jax.ShapeDtypeStruct((B, w.shape[1]), jnp.float32),
        in_specs=[_VSPEC, _VSPEC, _VSPEC],
        out_specs=_VSPEC,
        compiler_params=pltpu.CompilerParams(vmem_limit_bytes=_VMEM_LIMIT),
    )(pooled, w, b2)
    return out[:, :n_class]


# ----------------------------------------------------------------------------
# OS-CNN structural helpers (pure python, mirrors the PyTorch module)
# ----------------------------------------------------------------------------

def calculate_mask_index(kernel_len, largest_kernel_len):
    right = math.ceil((largest_kernel_len - 1) / 2) - math.ceil((kernel_len - 1) / 2)
    left = largest_kernel_len - kernel_len - right
    return left, left + kernel_len


def get_prime_number_in_a_range(start, end):
    primes = []
    for val in range(start, end + 1):
        ok = True
        for n in range(2, val):
            if val % n == 0:
                ok = False
                break
        if ok:
            primes.append(val)
    return primes


def get_out_channel_number(param_layer, in_channel, prime_list):
    return int(param_layer / (in_channel * sum(prime_list)))


def generate_layer_parameter_list(start, end, param_number_list, in_channel=1):
    prime_list = get_prime_number_in_a_range(start, end)
    param_number_list = list(param_number_list)
    param_number_list[0] = param_number_list[0] * in_channel
    input_in_channel = in_channel
    layer_parameter_list = []
    for p in param_number_list:
        out_channel = get_out_channel_number(p, in_channel, prime_list)
        layer_parameter_list.append([(in_channel, out_channel, prime) for prime in prime_list])
        in_channel = len(prime_list) * out_channel
    first_out_channel = len(prime_list) * get_out_channel_number(
        param_number_list[0], input_in_channel, prime_list)
    layer_parameter_list.append([(in_channel, first_out_channel, start),
                                 (in_channel, first_out_channel, start + 1)])
    return layer_parameter_list


def check_channel_limit(lpl, n_input_channel, mid_channel_limit):
    out_channel_each = sum(c[1] for c in lpl[-1])
    total = n_input_channel * out_channel_each
    if total <= mid_channel_limit:
        return lpl
    temp = max(int(mid_channel_limit / (n_input_channel * len(lpl[-1]))), 1)
    lpl[-1] = [(c[0], temp, c[2]) for c in lpl[-1]]
    return lpl


def make_masked_conv_params(key, layer_params):
    """Deterministic init of a masked big-kernel conv (creak_layer_mask equivalent).

    Returns (masked_weight, bias, groups) where groups is the static
    per-output-channel-group active-tap structure used for tap skipping.
    The bias is kept for structural parity but is not used in the fused
    kernel (it is cancelled exactly by batch-statistic BatchNorm).
    """
    largest = layer_params[-1][2]
    in_c = layer_params[0][0]
    out_total = sum(p[1] for p in layer_params)
    kw, kb = jax.random.split(key)
    w = jax.random.normal(kw, (out_total, in_c, largest), jnp.float32)
    w = w * (1.0 / math.sqrt(in_c * largest))
    bias = jax.random.normal(kb, (out_total,), jnp.float32) * 0.01

    mask = np.zeros((out_total, in_c, largest), np.float32)
    groups = []
    row = 0
    for (_, oc, kl) in layer_params:
        l, r = calculate_mask_index(kl, largest)
        mask[row:row + oc, :, l:r] = 1.0
        groups.append((row, row + oc, l, r))
        row += oc
    return w * jnp.asarray(mask), bias, groups


def build_oscnn_params(key, layer_parameter_list, n_class, n_input_channel):
    mid_channel_limit = 1000
    os_block_lpl = copy.deepcopy(layer_parameter_list[:-1])
    os_block_lpl = check_channel_limit(os_block_lpl, n_input_channel, mid_channel_limit)

    keys = jax.random.split(key, n_input_channel + 2)
    blocks = []
    for i in range(n_input_channel):
        bkeys = jax.random.split(keys[i], len(os_block_lpl))
        blocks.append([make_masked_conv_params(bkeys[j], os_block_lpl[j])
                       for j in range(len(os_block_lpl))])

    rf_size = layer_parameter_list[0][-1][-1]
    in_channel_we_want = (len(layer_parameter_list[1])
                          * os_block_lpl[-1][-1][1] * n_input_channel)
    os_net_lpl = generate_layer_parameter_list(
        1, rf_size + 1, [8 * 128, (5 * 128 * 256 + 2 * 256 * 128) / 2],
        in_channel=in_channel_we_want)

    nkeys = jax.random.split(keys[n_input_channel], len(os_net_lpl))
    os_net_layers = [make_masked_conv_params(nkeys[j], os_net_lpl[j])
                     for j in range(len(os_net_lpl))]

    out_ch = sum(p[1] for p in os_net_lpl[-1])
    kw, kb = jax.random.split(keys[n_input_channel + 1])
    lin_w = jax.random.normal(kw, (n_class, out_ch), jnp.float32) / math.sqrt(out_ch)
    lin_b = jax.random.normal(kb, (n_class,), jnp.float32) * 0.01
    return dict(blocks=blocks, os_net=os_net_layers, lin_w=lin_w, lin_b=lin_b)


# ----------------------------------------------------------------------------
# Forward pass (mirrors OS_CNN.forward)
# ----------------------------------------------------------------------------

def oscnn_forward(x_ncl, params):
    # x_ncl: (B, n_input_channel, T)  -- PyTorch NCL layout at the boundary.
    T = x_ncl.shape[-1]
    block_outs = []
    for i, layers in enumerate(params["blocks"]):
        h = jnp.transpose(x_ncl[:, i:i + 1, :], (0, 2, 1))       # (B, T, 1)
        true_c = 1
        for (w, b, groups) in layers:                             # padded rep kept across layers
            h = conv_bn_relu(h, w, groups, true_c, T)
            true_c = w.shape[0]
        block_outs.append(h[:, :, :true_c])                       # real channels only at concat

    # F.relu(cat(...)) is redundant: block outputs are already ReLU'd (>= 0).
    res = jnp.concatenate(block_outs, axis=-1)                    # (B, T_pad, C_concat)

    h, true_c = res, res.shape[-1]
    os_layers = params["os_net"]
    for li, (w, b, groups) in enumerate(os_layers):
        last = li == len(os_layers) - 1
        # Last layer fuses AdaptiveAvgPool1d(1): no HBM round-trip of the
        # largest activation.
        h = conv_bn_relu(h, w, groups, true_c, T, pool=last)
        true_c = w.shape[0]

    return linear(h, params["lin_w"], params["lin_b"])            # (B, n_class)


# ----------------------------------------------------------------------------
# Demo
# ----------------------------------------------------------------------------

if __name__ == "__main__":
    B, n_input_channel, T, n_class = 2, 4, 16, 3

    # Small user-supplied layer_parameter_list (first layers take 1 input channel,
    # as OS_CNN feeds each input channel through its own OS block).
    layer_parameter_list = [
        [(1, 2, 1), (1, 2, 2), (1, 2, 3)],
        [(6, 2, 1), (6, 2, 2), (6, 2, 3)],
        [(6, 4, 1), (6, 4, 2)],
    ]

    root = jax.random.PRNGKey(0)
    kparam, kx = jax.random.split(root)
    params = build_oscnn_params(kparam, layer_parameter_list, n_class, n_input_channel)

    x = jax.random.normal(kx, (B, n_input_channel, T), jnp.float32)

    fwd = jax.jit(lambda xx: oscnn_forward(xx, params))
    out = jax.block_until_ready(fwd(x))

    assert out.shape == (B, n_class), out.shape
    assert bool(jnp.all(jnp.isfinite(out)))
    print("KERNEL_OK")
</pallas_src>

<mosaic_0001>
module attributes {stable_mosaic.version = 11 : i64} {
  func.func @_conv_im2col_kernel(%arg0: i32, %arg1: memref<2x16x128xbf16, #tpu.memory_space<vmem>>, %arg2: memref<128x128xbf16, #tpu.memory_space<vmem>>, %arg3: memref<2x16x128xbf16, #tpu.memory_space<vmem>>) attributes {dimension_semantics = [#tpu.dimension_semantics<parallel>], iteration_bounds = array<i64: 1>, scalar_prefetch = 0 : i64, scratch_operands = 0 : i64, tpu.core_type = #tpu.core_type<tc>, window_params = [{pipeline_mode = #tpu.pipeline_mode<synchronous>, transform_indices = @transform_0, window_bounds = array<i64: 2, 16, 128>}, {transform_indices = @transform_1, window_bounds = array<i64: 128, 128>}, {transform_indices = @transform_2, window_bounds = array<i64: 2, 16, 128>}]} {
    %c0 = arith.constant 0 : index
    %c0_0 = arith.constant 0 : index
    %c0_1 = arith.constant 0 : index
    %0 = vector.load %arg1[%c0, %c0_0, %c0_1] : memref<2x16x128xbf16, #tpu.memory_space<vmem>>, vector<2x16x128xbf16>
    %1 = vector.shape_cast %0 : vector<2x16x128xbf16> to vector<32x128xbf16>
    %c0_2 = arith.constant 0 : index
    %c0_3 = arith.constant 0 : index
    %2 = vector.load %arg2[%c0_2, %c0_3] : memref<128x128xbf16, #tpu.memory_space<vmem>>, vector<128x128xbf16>
    %cst = arith.constant dense<0.000000e+00> : vector<32x128xf32>
    %3 = tpu.matmul %1, %2, %cst {dimension_numbers = #tpu.dot_dimension_numbers<[1], [0], [0], [1], [0, 0, 1, 1], [], []>} : vector<32x128xbf16>, vector<128x128xbf16>, vector<32x128xf32> -> vector<32x128xf32>
    %cst_4 = arith.constant dense<0.000000e+00> : vector<128xf32>
    %4 = vector.multi_reduction <add>, %3, %cst_4 [0] : vector<32x128xf32> to vector<128xf32>
    %5 = vector.shape_cast %4 : vector<128xf32> to vector<1x128xf32>
    %cst_5 = arith.constant 3.125000e-02 : f32
    %6 = vector.broadcast %cst_5 : f32 to vector<1x128xf32>
    %7 = arith.mulf %5, %6 : vector<1x128xf32>
    %8 = arith.mulf %3, %3 : vector<32x128xf32>
    %cst_6 = arith.constant dense<0.000000e+00> : vector<128xf32>
    %9 = vector.multi_reduction <add>, %8, %cst_6 [0] : vector<32x128xf32> to vector<128xf32>
    %10 = vector.shape_cast %9 : vector<128xf32> to vector<1x128xf32>
    %cst_7 = arith.constant 3.125000e-02 : f32
    %11 = vector.broadcast %cst_7 : f32 to vector<1x128xf32>
    %12 = arith.mulf %10, %11 : vector<1x128xf32>
    %13 = arith.mulf %7, %7 : vector<1x128xf32>
    %14 = arith.subf %12, %13 : vector<1x128xf32>
    %15 = vector.broadcast %7 : vector<1x128xf32> to vector<32x128xf32>
    %16 = arith.subf %3, %15 : vector<32x128xf32>
    %cst_8 = arith.constant 9.99999974E-6 : f32
    %17 = vector.broadcast %cst_8 : f32 to vector<1x128xf32>
    %18 = arith.addf %14, %17 : vector<1x128xf32>
    %19 = math.rsqrt %18 : vector<1x128xf32>
    %20 = vector.broadcast %19 : vector<1x128xf32> to vector<32x128xf32>
    %21 = arith.mulf %16, %20 : vector<32x128xf32>
    %cst_9 = arith.constant 0.000000e+00 : f32
    %22 = vector.broadcast %cst_9 : f32 to vector<32x128xf32>
    %23 = arith.maximumf %21, %22 : vector<32x128xf32>
    %24 = vector.shape_cast %23 : vector<32x128xf32> to vector<2x16x128xf32>
    %25 = arith.truncf %24 : vector<2x16x128xf32> to vector<2x16x128xbf16>
    %c0_10 = arith.constant 0 : index
    %c0_11 = arith.constant 0 : index
    %c0_12 = arith.constant 0 : index
    %26 = vector.load %arg3[%c0_10, %c0_11, %c0_12] : memref<2x16x128xbf16, #tpu.memory_space<vmem>>, vector<2x16x128xbf16>
    tpu.vector_store %arg3[%c0_10, %c0_11, %c0_12], %25 {strides = array<i32>} : memref<2x16x128xbf16, #tpu.memory_space<vmem>>, vector<2x16x128xbf16>,
    return
  }
  func.func @transform_0(%arg0: i32) -> (i32, i32, i32) {
    %c0_i32 = arith.constant 0 : i32
    %c0_i32_0 = arith.constant 0 : i32
    %c0_i32_1 = arith.constant 0 : i32
    %c0_i32_2 = arith.constant 0 : i32
    return %c0_i32, %c0_i32_0, %c0_i32_1 : i32, i32, i32
  }
  func.func @transform_1(%arg0: i32) -> (i32, i32) {
    %c0_i32 = arith.constant 0 : i32
    %c0_i32_0 = arith.constant 0 : i32
    return %c0_i32, %arg0 : i32, i32
  }
  func.func @transform_2(%arg0: i32) -> (i32, i32, i32) {
    %c0_i32 = arith.constant 0 : i32
    %c0_i32_0 = arith.constant 0 : i32
    %c0_i32_1 = arith.constant 0 : i32
    return %c0_i32, %c0_i32_0, %arg0 : i32, i32, i32
  }
}

module attributes {stable_mosaic.version = 11 : i64} {
  func.func @_conv_taps_kernel(%arg0: i32, %arg1: memref<2xi32, #tpu.memory_space<smem>>, %arg2: memref<2x32x512xbf16, #tpu.memory_space<vmem>>, %arg3: memref<3x512x128xbf16, #tpu.memory_space<vmem>>, %arg4: memref<2x16x128xbf16, #tpu.memory_space<vmem>>, %arg5: memref<32x128xf32, #tpu.memory_space<vmem>>) attributes {dimension_semantics = [#tpu.dimension_semantics<parallel>], iteration_bounds = array<i64: 1>, scalar_prefetch = 1 : i64, scratch_operands = 1 : i64, tpu.core_type = #tpu.core_type<tc>, window_params = [{pipeline_mode = #tpu.pipeline_mode<synchronous>, transform_indices = @transform_0, window_bounds = array<i64: 2, 32, 512>}, {transform_indices = @transform_1, window_bounds = array<i64: 3, 512, 128>}, {transform_indices = @transform_2, window_bounds = array<i64: 2, 16, 128>}]} {
    %c2_i32 = arith.constant 2 : i32
    %0 = arith.muli %c2_i32, %arg0 : i32
    %1 = arith.index_cast %0 : i32 to index
    %2 = memref.load %arg1[%1] : memref<2xi32, #tpu.memory_space<smem>>
    %c2_i32_0 = arith.constant 2 : i32
    %3 = arith.muli %c2_i32_0, %arg0 : i32
    %c1_i32 = arith.constant 1 : i32
    %4 = arith.addi %3, %c1_i32 : i32
    %5 = arith.index_cast %4 : i32 to index
    %6 = memref.load %arg1[%5] : memref<2xi32, #tpu.memory_space<smem>>
    %cst = arith.constant 0.000000e+00 : f32
    %7 = vector.broadcast %cst : f32 to vector<32x128xf32>
    %c0 = arith.constant 0 : index
    %c0_1 = arith.constant 0 : index
    %8 = vector.load %arg5[%c0, %c0_1] : memref<32x128xf32, #tpu.memory_space<vmem>>, vector<32x128xf32>
    tpu.vector_store %arg5[%c0, %c0_1], %7 {strides = array<i32>} : memref<32x128xf32, #tpu.memory_space<vmem>>, vector<32x128xf32>,
    %c0_i32 = arith.constant 0 : i32
    %9 = arith.cmpi sle, %2, %c0_i32 : i32
    %c0_i32_2 = arith.constant 0 : i32
    %10 = arith.cmpi sgt, %6, %c0_i32_2 : i32
    %11 = arith.andi %9, %10 : i1
    %12 = arith.extui %11 : i1 to i32
    %c0_i32_3 = arith.constant 0 : i32
    %13 = arith.cmpi ne, %12, %c0_i32_3 : i32
    scf.if %13 {
      %c0_21 = arith.constant 0 : index
      %c0_22 = arith.constant 0 : index
      %c0_23 = arith.constant 0 : index
      %48 = vector.load %arg2[%c0_21, %c0_22, %c0_23] : memref<2x32x512xbf16, #tpu.memory_space<vmem>>, vector<2x16x512xbf16>
      %49 = vector.shape_cast %48 : vector<2x16x512xbf16> to vector<32x512xbf16>
      %c0_24 = arith.constant 0 : index
      %c0_25 = arith.constant 0 : index
      %50 = vector.load %arg5[%c0_24, %c0_25] : memref<32x128xf32, #tpu.memory_space<vmem>>, vector<32x128xf32>
      %c0_26 = arith.constant 0 : index
      %c0_27 = arith.constant 0 : index
      %c0_28 = arith.constant 0 : index
      %51 = vector.load %arg3[%c0_26, %c0_27, %c0_28] : memref<3x512x128xbf16, #tpu.memory_space<vmem>>, vector<1x512x128xbf16>
      %52 = vector.shape_cast %51 : vector<1x512x128xbf16> to vector<512x128xbf16>
      %cst_29 = arith.constant dense<0.000000e+00> : vector<32x128xf32>
      %53 = tpu.matmul %49, %52, %cst_29 {dimension_numbers = #tpu.dot_dimension_numbers<[1], [0], [0], [1], [0, 0, 1, 1], [], []>} : vector<32x512xbf16>, vector<512x128xbf16>, vector<32x128xf32> -> vector<32x128xf32>
      %54 = arith.addf %50, %53 : vector<32x128xf32>
      %c0_30 = arith.constant 0 : index
      %c0_31 = arith.constant 0 : index
      %55 = vector.load %arg5[%c0_30, %c0_31] : memref<32x128xf32, #tpu.memory_space<vmem>>, vector<32x128xf32>
      tpu.vector_store %arg5[%c0_30, %c0_31], %54 {strides = array<i32>} : memref<32x128xf32, #tpu.memory_space<vmem>>, vector<32x128xf32>,
    } else {
    }
    %c1_i32_4 = arith.constant 1 : i32
    %14 = arith.cmpi sle, %2, %c1_i32_4 : i32
    %c1_i32_5 = arith.constant 1 : i32
    %15 = arith.cmpi sgt, %6, %c1_i32_5 : i32
    %16 = arith.andi %14, %15 : i1
    %17 = arith.extui %16 : i1 to i32
    %c0_i32_6 = arith.constant 0 : i32
    %18 = arith.cmpi ne, %17, %c0_i32_6 : i32
    scf.if %18 {
      %c0_21 = arith.constant 0 : index
      %c1 = arith.constant 1 : index
      %c0_22 = arith.constant 0 : index
      %48 = vector.load %arg2[%c0_21, %c1, %c0_22] : memref<2x32x512xbf16, #tpu.memory_space<vmem>>, vector<2x16x512xbf16>
      %49 = vector.shape_cast %48 : vector<2x16x512xbf16> to vector<32x512xbf16>
      %c0_23 = arith.constant 0 : index
      %c0_24 = arith.constant 0 : index
      %50 = vector.load %arg5[%c0_23, %c0_24] : memref<32x128xf32, #tpu.memory_space<vmem>>, vector<32x128xf32>
      %c1_25 = arith.constant 1 : index
      %c0_26 = arith.constant 0 : index
      %c0_27 = arith.constant 0 : index
      %51 = vector.load %arg3[%c1_25, %c0_26, %c0_27] : memref<3x512x128xbf16, #tpu.memory_space<vmem>>, vector<1x512x128xbf16>
      %52 = vector.shape_cast %51 : vector<1x512x128xbf16> to vector<512x128xbf16>
      %cst_28 = arith.constant dense<0.000000e+00> : vector<32x128xf32>
      %53 = tpu.matmul %49, %52, %cst_28 {dimension_numbers = #tpu.dot_dimension_numbers<[1], [0], [0], [1], [0, 0, 1, 1], [], []>} : vector<32x512xbf16>, vector<512x128xbf16>, vector<32x128xf32> -> vector<32x128xf32>
      %54 = arith.addf %50, %53 : vector<32x128xf32>
      %c0_29 = arith.constant 0 : index
      %c0_30 = arith.constant 0 : index
      %55 = vector.load %arg5[%c0_29, %c0_30] : memref<32x128xf32, #tpu.memory_space<vmem>>, vector<32x128xf32>
      tpu.vector_store %arg5[%c0_29, %c0_30], %54 {strides = array<i32>} : memref<32x128xf32, #tpu.memory_space<vmem>>, vector<32x128xf32>,
    } else {
    }
    %c2_i32_7 = arith.constant 2 : i32
    %19 = arith.cmpi sle, %2, %c2_i32_7 : i32
    %c2_i32_8 = arith.constant 2 : i32
    %20 = arith.cmpi sgt, %6, %c2_i32_8 : i32
    %21 = arith.andi %19, %20 : i1
    %22 = arith.extui %21 : i1 to i32
    %c0_i32_9 = arith.constant 0 : i32
    %23 = arith.cmpi ne, %22, %c0_i32_9 : i32
    scf.if %23 {
      %c0_21 = arith.constant 0 : index
      %c2 = arith.constant 2 : index
      %c0_22 = arith.constant 0 : index
      %48 = vector.load %arg2[%c0_21, %c2, %c0_22] : memref<2x32x512xbf16, #tpu.memory_space<vmem>>, vector<2x16x512xbf16>
      %49 = vector.shape_cast %48 : vector<2x16x512xbf16> to vector<32x512xbf16>
      %c0_23 = arith.constant 0 : index
      %c0_24 = arith.constant 0 : index
      %50 = vector.load %arg5[%c0_23, %c0_24] : memref<32x128xf32, #tpu.memory_space<vmem>>, vector<32x128xf32>
      %c2_25 = arith.constant 2 : index
      %c0_26 = arith.constant 0 : index
      %c0_27 = arith.constant 0 : index
      %51 = vector.load %arg3[%c2_25, %c0_26, %c0_27] : memref<3x512x128xbf16, #tpu.memory_space<vmem>>, vector<1x512x128xbf16>
      %52 = vector.shape_cast %51 : vector<1x512x128xbf16> to vector<512x128xbf16>
      %cst_28 = arith.constant dense<0.000000e+00> : vector<32x128xf32>
      %53 = tpu.matmul %49, %52, %cst_28 {dimension_numbers = #tpu.dot_dimension_numbers<[1], [0], [0], [1], [0, 0, 1, 1], [], []>} : vector<32x512xbf16>, vector<512x128xbf16>, vector<32x128xf32> -> vector<32x128xf32>
      %54 = arith.addf %50, %53 : vector<32x128xf32>
      %c0_29 = arith.constant 0 : index
      %c0_30 = arith.constant 0 : index
      %55 = vector.load %arg5[%c0_29, %c0_30] : memref<32x128xf32, #tpu.memory_space<vmem>>, vector<32x128xf32>
      tpu.vector_store %arg5[%c0_29, %c0_30], %54 {strides = array<i32>} : memref<32x128xf32, #tpu.memory_space<vmem>>, vector<32x128xf32>,
    } else {
    }
    %c0_10 = arith.constant 0 : index
    %c0_11 = arith.constant 0 : index
    %24 = vector.load %arg5[%c0_10, %c0_11] : memref<32x128xf32, #tpu.memory_space<vmem>>, vector<32x128xf32>
    %cst_12 = arith.constant dense<0.000000e+00> : vector<128xf32>
    %25 = vector.multi_reduction <add>, %24, %cst_12 [0] : vector<32x128xf32> to vector<128xf32>
    %26 = vector.shape_cast %25 : vector<128xf32> to vector<1x128xf32>
    %cst_13 = arith.constant 3.125000e-02 : f32
    %27 = vector.broadcast %cst_13 : f32 to vector<1x128xf32>
    %28 = arith.mulf %26, %27 : vector<1x128xf32>
    %29 = arith.mulf %24, %24 : vector<32x128xf32>
    %cst_14 = arith.constant dense<0.000000e+00> : vector<128xf32>
    %30 = vector.multi_reduction <add>, %29, %cst_14 [0] : vector<32x128xf32> to vector<128xf32>
    %31 = vector.shape_cast %30 : vector<128xf32> to vector<1x128xf32>
    %cst_15 = arith.constant 3.125000e-02 : f32
    %32 = vector.broadcast %cst_15 : f32 to vector<1x128xf32>
    %33 = arith.mulf %31, %32 : vector<1x128xf32>
    %34 = arith.mulf %28, %28 : vector<1x128xf32>
    %35 = arith.subf %33, %34 : vector<1x128xf32>
    %36 = vector.broadcast %28 : vector<1x128xf32> to vector<32x128xf32>
    %37 = arith.subf %24, %36 : vector<32x128xf32>
    %cst_16 = arith.constant 9.99999974E-6 : f32
    %38 = vector.broadcast %cst_16 : f32 to vector<1x128xf32>
    %39 = arith.addf %35, %38 : vector<1x128xf32>
    %40 = math.rsqrt %39 : vector<1x128xf32>
    %41 = vector.broadcast %40 : vector<1x128xf32> to vector<32x128xf32>
    %42 = arith.mulf %37, %41 : vector<32x128xf32>
    %cst_17 = arith.constant 0.000000e+00 : f32
    %43 = vector.broadcast %cst_17 : f32 to vector<32x128xf32>
    %44 = arith.maximumf %42, %43 : vector<32x128xf32>
    %45 = vector.shape_cast %44 : vector<32x128xf32> to vector<2x16x128xf32>
    %46 = arith.truncf %45 : vector<2x16x128xf32> to vector<2x16x128xbf16>
    %c0_18 = arith.constant 0 : index
    %c0_19 = arith.constant 0 : index
    %c0_20 = arith.constant 0 : index
    %47 = vector.load %arg4[%c0_18, %c0_19, %c0_20] : memref<2x16x128xbf16, #tpu.memory_space<vmem>>, vector<2x16x128xbf16>
    tpu.vector_store %arg4[%c0_18, %c0_19, %c0_20], %46 {strides = array<i32>} : memref<2x16x128xbf16, #tpu.memory_space<vmem>>, vector<2x16x128xbf16>,
    return
  }
  func.func @transform_0(%arg0: i32, %arg1: memref<2xi32, #tpu.memory_space<smem>>) -> (i32, i32, i32) {
    %c0_i32 = arith.constant 0 : i32
    %c0_i32_0 = arith.constant 0 : i32
    %c0_i32_1 = arith.constant 0 : i32
    %c0_i32_2 = arith.constant 0 : i32
    return %c0_i32, %c0_i32_0, %c0_i32_1 : i32, i32, i32
  }
  func.func @transform_1(%arg0: i32, %arg1: memref<2xi32, #tpu.memory_space<smem>>) -> (i32, i32, i32) {
    %c0_i32 = arith.constant 0 : i32
    %c0_i32_0 = arith.constant 0 : i32
    %c0_i32_1 = arith.constant 0 : i32
    return %c0_i32, %c0_i32_0, %arg0 : i32, i32, i32
  }
  func.func @transform_2(%arg0: i32, %arg1: memref<2xi32, #tpu.memory_space<smem>>) -> (i32, i32, i32) {
    %c0_i32 = arith.constant 0 : i32
    %c0_i32_0 = arith.constant 0 : i32
    %c0_i32_1 = arith.constant 0 : i32
    return %c0_i32, %c0_i32_0, %arg0 : i32, i32, i32
  }
}

module attributes {stable_mosaic.version = 11 : i64} {
  func.func @_conv_im2col_kernel(%arg0: i32, %arg1: memref<2x16x128xbf16, #tpu.memory_space<vmem>>, %arg2: memref<128x256xbf16, #tpu.memory_space<vmem>>, %arg3: memref<2x16x256xbf16, #tpu.memory_space<vmem>>) attributes {dimension_semantics = [#tpu.dimension_semantics<parallel>], iteration_bounds = array<i64: 2>, scalar_prefetch = 0 : i64, scratch_operands = 0 : i64, tpu.core_type = #tpu.core_type<tc>, window_params = [{pipeline_mode = #tpu.pipeline_mode<synchronous>, transform_indices = @transform_0, window_bounds = array<i64: 2, 16, 128>}, {transform_indices = @transform_1, window_bounds = array<i64: 128, 256>}, {transform_indices = @transform_2, window_bounds = array<i64: 2, 16, 256>}]} {
    %c0 = arith.constant 0 : index
    %c0_0 = arith.constant 0 : index
    %c0_1 = arith.constant 0 : index
    %0 = vector.load %arg1[%c0, %c0_0, %c0_1] : memref<2x16x128xbf16, #tpu.memory_space<vmem>>, vector<2x16x128xbf16>
    %1 = vector.shape_cast %0 : vector<2x16x128xbf16> to vector<32x128xbf16>
    %c0_2 = arith.constant 0 : index
    %c0_3 = arith.constant 0 : index
    %2 = vector.load %arg2[%c0_2, %c0_3] : memref<128x256xbf16, #tpu.memory_space<vmem>>, vector<128x256xbf16>
    %cst = arith.constant dense<0.000000e+00> : vector<32x256xf32>
    %3 = tpu.matmul %1, %2, %cst {dimension_numbers = #tpu.dot_dimension_numbers<[1], [0], [0], [1], [0, 0, 1, 1], [], []>} : vector<32x128xbf16>, vector<128x256xbf16>, vector<32x256xf32> -> vector<32x256xf32>
    %cst_4 = arith.constant dense<0.000000e+00> : vector<256xf32>
    %4 = vector.multi_reduction <add>, %3, %cst_4 [0] : vector<32x256xf32> to vector<256xf32>
    %5 = vector.shape_cast %4 : vector<256xf32> to vector<1x256xf32>
    %cst_5 = arith.constant 3.125000e-02 : f32
    %6 = vector.broadcast %cst_5 : f32 to vector<1x256xf32>
    %7 = arith.mulf %5, %6 : vector<1x256xf32>
    %8 = arith.mulf %3, %3 : vector<32x256xf32>
    %cst_6 = arith.constant dense<0.000000e+00> : vector<256xf32>
    %9 = vector.multi_reduction <add>, %8, %cst_6 [0] : vector<32x256xf32> to vector<256xf32>
    %10 = vector.shape_cast %9 : vector<256xf32> to vector<1x256xf32>
    %cst_7 = arith.constant 3.125000e-02 : f32
    %11 = vector.broadcast %cst_7 : f32 to vector<1x256xf32>
    %12 = arith.mulf %10, %11 : vector<1x256xf32>
    %13 = arith.mulf %7, %7 : vector<1x256xf32>
    %14 = arith.subf %12, %13 : vector<1x256xf32>
    %15 = vector.broadcast %7 : vector<1x256xf32> to vector<32x256xf32>
    %16 = arith.subf %3, %15 : vector<32x256xf32>
    %cst_8 = arith.constant 9.99999974E-6 : f32
    %17 = vector.broadcast %cst_8 : f32 to vector<1x256xf32>
    %18 = arith.addf %14, %17 : vector<1x256xf32>
    %19 = math.rsqrt %18 : vector<1x256xf32>
    %20 = vector.broadcast %19 : vector<1x256xf32> to vector<32x256xf32>
    %21 = arith.mulf %16, %20 : vector<32x256xf32>
    %cst_9 = arith.constant 0.000000e+00 : f32
    %22 = vector.broadcast %cst_9 : f32 to vector<32x256xf32>
    %23 = arith.maximumf %21, %22 : vector<32x256xf32>
    %24 = vector.shape_cast %23 : vector<32x256xf32> to vector<2x16x256xf32>
    %25 = arith.truncf %24 : vector<2x16x256xf32> to vector<2x16x256xbf16>
    %c0_10 = arith.constant 0 : index
    %c0_11 = arith.constant 0 : index
    %c0_12 = arith.constant 0 : index
    %26 = vector.load %arg3[%c0_10, %c0_11, %c0_12] : memref<2x16x256xbf16, #tpu.memory_space<vmem>>, vector<2x16x256xbf16>
    tpu.vector_store %arg3[%c0_10, %c0_11, %c0_12], %25 {strides = array<i32>} : memref<2x16x256xbf16, #tpu.memory_space<vmem>>, vector<2x16x256xbf16>,
    return
  }
  func.func @transform_0(%arg0: i32) -> (i32, i32, i32) {
    %c0_i32 = arith.constant 0 : i32
    %c0_i32_0 = arith.constant 0 : i32
    %c0_i32_1 = arith.constant 0 : i32
    %c0_i32_2 = arith.constant 0 : i32
    return %c0_i32, %c0_i32_0, %c0_i32_1 : i32, i32, i32
  }
  func.func @transform_1(%arg0: i32) -> (i32, i32) {
    %c0_i32 = arith.constant 0 : i32
    %c0_i32_0 = arith.constant 0 : i32
    return %c0_i32, %arg0 : i32, i32
  }
  func.func @transform_2(%arg0: i32) -> (i32, i32, i32) {
    %c0_i32 = arith.constant 0 : i32
    %c0_i32_0 = arith.constant 0 : i32
    %c0_i32_1 = arith.constant 0 : i32
    return %c0_i32, %c0_i32_0, %arg0 : i32, i32, i32
  }
}

module attributes {stable_mosaic.version = 11 : i64} {
  func.func @_conv_im2col_kernel(%arg0: i32, %arg1: memref<2x16x256xbf16, #tpu.memory_space<vmem>>, %arg2: memref<256x256xbf16, #tpu.memory_space<vmem>>, %arg3: memref<2x256xf32, #tpu.memory_space<vmem>>) attributes {dimension_semantics = [#tpu.dimension_semantics<parallel>], iteration_bounds = array<i64: 4>, scalar_prefetch = 0 : i64, scratch_operands = 0 : i64, tpu.core_type = #tpu.core_type<tc>, window_params = [{pipeline_mode = #tpu.pipeline_mode<synchronous>, transform_indices = @transform_0, window_bounds = array<i64: 2, 16, 256>}, {transform_indices = @transform_1, window_bounds = array<i64: 256, 256>}, {transform_indices = @transform_2, window_bounds = array<i64: 2, 256>}]} {
    %c0 = arith.constant 0 : index
    %c0_0 = arith.constant 0 : index
    %c0_1 = arith.constant 0 : index
    %0 = vector.load %arg1[%c0, %c0_0, %c0_1] : memref<2x16x256xbf16, #tpu.memory_space<vmem>>, vector<2x16x256xbf16>
    %1 = vector.shape_cast %0 : vector<2x16x256xbf16> to vector<32x256xbf16>
    %c0_2 = arith.constant 0 : index
    %c0_3 = arith.constant 0 : index
    %2 = vector.load %arg2[%c0_2, %c0_3] : memref<256x256xbf16, #tpu.memory_space<vmem>>, vector<256x256xbf16>
    %cst = arith.constant dense<0.000000e+00> : vector<32x256xf32>
    %3 = tpu.matmul %1, %2, %cst {dimension_numbers = #tpu.dot_dimension_numbers<[1], [0], [0], [1], [0, 0, 1, 1], [], []>} : vector<32x256xbf16>, vector<256x256xbf16>, vector<32x256xf32> -> vector<32x256xf32>
    %cst_4 = arith.constant dense<0.000000e+00> : vector<256xf32>
    %4 = vector.multi_reduction <add>, %3, %cst_4 [0] : vector<32x256xf32> to vector<256xf32>
    %5 = vector.shape_cast %4 : vector<256xf32> to vector<1x256xf32>
    %cst_5 = arith.constant 3.125000e-02 : f32
    %6 = vector.broadcast %cst_5 : f32 to vector<1x256xf32>
    %7 = arith.mulf %5, %6 : vector<1x256xf32>
    %8 = arith.mulf %3, %3 : vector<32x256xf32>
    %cst_6 = arith.constant dense<0.000000e+00> : vector<256xf32>
    %9 = vector.multi_reduction <add>, %8, %cst_6 [0] : vector<32x256xf32> to vector<256xf32>
    %10 = vector.shape_cast %9 : vector<256xf32> to vector<1x256xf32>
    %cst_7 = arith.constant 3.125000e-02 : f32
    %11 = vector.broadcast %cst_7 : f32 to vector<1x256xf32>
    %12 = arith.mulf %10, %11 : vector<1x256xf32>
    %13 = arith.mulf %7, %7 : vector<1x256xf32>
    %14 = arith.subf %12, %13 : vector<1x256xf32>
    %15 = vector.broadcast %7 : vector<1x256xf32> to vector<32x256xf32>
    %16 = arith.subf %3, %15 : vector<32x256xf32>
    %cst_8 = arith.constant 9.99999974E-6 : f32
    %17 = vector.broadcast %cst_8 : f32 to vector<1x256xf32>
    %18 = arith.addf %14, %17 : vector<1x256xf32>
    %19 = math.rsqrt %18 : vector<1x256xf32>
    %20 = vector.broadcast %19 : vector<1x256xf32> to vector<32x256xf32>
    %21 = arith.mulf %16, %20 : vector<32x256xf32>
    %cst_9 = arith.constant 0.000000e+00 : f32
    %22 = vector.broadcast %cst_9 : f32 to vector<32x256xf32>
    %23 = arith.maximumf %21, %22 : vector<32x256xf32>
    %24 = vector.shape_cast %23 : vector<32x256xf32> to vector<2x16x256xf32>
    %cst_10 = arith.constant dense<0.000000e+00> : vector<2x256xf32>
    %25 = vector.multi_reduction <add>, %24, %cst_10 [1] : vector<2x16x256xf32> to vector<2x256xf32>
    %cst_11 = arith.constant 6.250000e-02 : f32
    %26 = vector.broadcast %cst_11 : f32 to vector<2x256xf32>
    %27 = arith.mulf %25, %26 : vector<2x256xf32>
    %c0_12 = arith.constant 0 : index
    %c0_13 = arith.constant 0 : index
    %28 = vector.load %arg3[%c0_12, %c0_13] : memref<2x256xf32, #tpu.memory_space<vmem>>, vector<2x256xf32>
    tpu.vector_store %arg3[%c0_12, %c0_13], %27 {strides = array<i32>} : memref<2x256xf32, #tpu.memory_space<vmem>>, vector<2x256xf32>,
    return
  }
  func.func @transform_0(%arg0: i32) -> (i32, i32, i32) {
    %c0_i32 = arith.constant 0 : i32
    %c0_i32_0 = arith.constant 0 : i32
    %c0_i32_1 = arith.constant 0 : i32
    %c0_i32_2 = arith.constant 0 : i32
    return %c0_i32, %c0_i32_0, %c0_i32_1 : i32, i32, i32
  }
  func.func @transform_1(%arg0: i32) -> (i32, i32) {
    %c0_i32 = arith.constant 0 : i32
    %c0_i32_0 = arith.constant 0 : i32
    return %c0_i32, %arg0 : i32, i32
  }
  func.func @transform_2(%arg0: i32) -> (i32, i32) {
    %c0_i32 = arith.constant 0 : i32
    %c0_i32_0 = arith.constant 0 : i32
    return %c0_i32, %arg0 : i32, i32
  }
}

module attributes {stable_mosaic.version = 11 : i64} {
  func.func @_linear_kernel(%arg0: memref<2x1024xf32, #tpu.memory_space<vmem>>, %arg1: memref<1024x128xf32, #tpu.memory_space<vmem>>, %arg2: memref<1x128xf32, #tpu.memory_space<vmem>>, %arg3: memref<2x128xf32, #tpu.memory_space<vmem>>) attributes {dimension_semantics = [], scalar_prefetch = 0 : i64, scratch_operands = 0 : i64, tpu.core_type = #tpu.core_type<tc>} {
    %c0 = arith.constant 0 : index
    %c0_0 = arith.constant 0 : index
    %0 = vector.load %arg0[%c0, %c0_0] : memref<2x1024xf32, #tpu.memory_space<vmem>>, vector<2x1024xf32>
    %c0_1 = arith.constant 0 : index
    %c0_2 = arith.constant 0 : index
    %1 = vector.load %arg1[%c0_1, %c0_2] : memref<1024x128xf32, #tpu.memory_space<vmem>>, vector<1024x128xf32>
    %cst = arith.constant dense<0.000000e+00> : vector<2x128xf32>
    %2 = tpu.matmul %0, %1, %cst {dimension_numbers = #tpu.dot_dimension_numbers<[1], [0], [0], [1], [0, 0, 1, 1], [], []>} : vector<2x1024xf32>, vector<1024x128xf32>, vector<2x128xf32> -> vector<2x128xf32>
    %c0_3 = arith.constant 0 : index
    %c0_4 = arith.constant 0 : index
    %3 = vector.load %arg2[%c0_3, %c0_4] : memref<1x128xf32, #tpu.memory_space<vmem>>, vector<1x128xf32>
    %4 = vector.broadcast %3 : vector<1x128xf32> to vector<2x128xf32>
    %5 = arith.addf %2, %4 : vector<2x128xf32>
    %c0_5 = arith.constant 0 : index
    %c0_6 = arith.constant 0 : index
    %6 = vector.load %arg3[%c0_5, %c0_6] : memref<2x128xf32, #tpu.memory_space<vmem>>, vector<2x128xf32>
    tpu.vector_store %arg3[%c0_5, %c0_6], %5 {strides = array<i32>} : memref<2x128xf32, #tpu.memory_space<vmem>>, vector<2x128xf32>,
    return
  }
}

</mosaic_0001>

<bundles_post_ra>
// kernel: _lambda_.12
= control target key start
LH: loop header
LB: loop body
LE: loop exit
PB: predicated region body
PF: predicated region fallthrough
CT: control target
= control target key end

     0   :  { %s293_s1 = inlined_call_operand.vmem [shape: bf16[128,128], index: 1, kind: input, shape index: {}]   ;;  %s294_s0 = inlined_call_operand.vmem [shape: bf16[2,16,128], index: 0, kind: input, shape index: {}]   ;;  %s295_s2 = inlined_call_operand.vmem [shape: bf16[2,16,128], index: 2, kind: output, shape index: {}]  }
   0x1   :  { %v220_v0 = vld [vmem:[%s293_s1 + $0x38] sm:$0xff]  ;;  %v219_v1 = vld [vmem:[%s293_s1 + $0x30] sm:$0xff]  ;;  %v218_v2 = vld [vmem:[%s293_s1 + $0x28] sm:$0xff] }
   0x2   :  { %91 = vmatpush.bf16.msra.mxu0 %v220_v0  ;;  %232 = vmatpush.bf16.msra.mxu1 %v220_v0  ;;  %v217_v3 = vld [vmem:[%s293_s1 + $0x20] sm:$0xff]  ;;  %v216_v4 = vld [vmem:[%s293_s1 + $0x18] sm:$0xff]  ;;  %v215_v5 = vld [vmem:[%s293_s1 + $0x10] sm:$0xff] }
   0x3   :  { %v214_v6 = vld [vmem:[%s293_s1 + $0x8] sm:$0xff]  ;;  %v213_v7 = vld [vmem:[%s293_s1] sm:$0xff] }
   0x4   :  { %v211_v8 = vld [vmem:[%s294_s0] sm:$0xff]  ;;  %v212_v9 = vld [vmem:[%s294_s0 + $0x8] sm:$0xff] }
   0x6   :  { %92 = vmatpush.bf16.msra.mxu0 %v219_v1  ;;  %233 = vmatpush.bf16.msra.mxu1 %v219_v1 }
   0xa   :  { %93 = vmatpush.bf16.msra.mxu0 %v218_v2  ;;  %234 = vmatpush.bf16.msra.mxu1 %v218_v2 }
   0xe   :  { %94 = vmatpush.bf16.msra.mxu0 %v217_v3  ;;  %235 = vmatpush.bf16.msra.mxu1 %v217_v3 }
  0x12   :  { %95 = vmatpush.bf16.msra.mxu0 %v216_v4  ;;  %236 = vmatpush.bf16.msra.mxu1 %v216_v4 }
  0x16   :  { %96 = vmatpush.bf16.msra.mxu0 %v215_v5  ;;  %237 = vmatpush.bf16.msra.mxu1 %v215_v5 }
  0x1a   :  { %97 = vmatpush.bf16.msra.mxu0 %v214_v6  ;;  %238 = vmatpush.bf16.msra.mxu1 %v214_v6 }
  0x1e   :  { %98 = vmatpush.bf16.msra.mxu0 %v213_v7  ;;  %239 = vmatpush.bf16.msra.mxu1 %v213_v7 }
  0x21   :  { %99 = vmatmul.bf16.vlgmr.msra.gmra.mxu0 %v211_v8  ;;  %104 = vmatmul.bf16.vlgmr.msra.gmra.mxu1 %v212_v9 }
  0x9e   :  { %v100_v10 = vpop.f32.mrf.mxu0  ;;  %v105_v11 = vpop.f32.mrf.mxu1 }
  0x9f   :  { %v120_v13 = vmul.f32 %v100_v10, %v100_v10  ;;  %v122_v17 = vmul.f32 %v105_v11, %v105_v11 }
  0xa6   :  { %v102_v12 = vpop.f32.mrf.mxu0  ;;  %v107_v16 = vpop.f32.mrf.mxu1 }
  0xa7   :  { %v110_v14 = vadd.f32 %v102_v12, %v100_v10  ;;  %v121_v15 = vmul.f32 %v102_v12, %v102_v12  ;;  %v123_v21 = vmul.f32 %v107_v16, %v107_v16 }
  0xa9   :  { %v124_v18 = vadd.f32 %v121_v15, %v120_v13  ;;  %v111_v19 = vadd.f32 %v110_v14, %v105_v11 }
  0xab   :  { %v112_v20 = vadd.f32 %v111_v19, %v107_v16  ;;  %v125_v22 = vadd.f32 %v124_v18, %v122_v17 }
  0xad   :  { %v113_v23 = vrot.slane %v112_v20, 4  ;;  %v126_v24 = vadd.f32 %v125_v22, %v123_v21 }
  0xaf   :  { %v114_v25 = vadd.f32 %v113_v23, %v112_v20  ;;  %v127_v26 = vrot.slane %v126_v24, 4 }
  0xb1   :  { %v115_v27 = vrot.slane %v114_v25, 2  ;;  %v128_v28 = vadd.f32 %v127_v26, %v126_v24 }
  0xb3   :  { %v116_v29 = vadd.f32 %v115_v27, %v114_v25  ;;  %v129_v30 = vrot.slane %v128_v28, 2 }
  0xb5   :  { %v117_v31 = vrot.slane %v116_v29, 1  ;;  %v130_v32 = vadd.f32 %v129_v30, %v128_v28 }
  0xb7   :  { %v118_v33 = vadd.f32 %v117_v31, %v116_v29  ;;  %v131_v34 = vrot.slane %v130_v32, 1 }
  0xb9   :  { %v119_v35 = vmul.f32 0.03125, %v118_v33  ;;  %v132_v36 = vadd.f32 %v131_v34, %v130_v32 }
  0xbb   :  { %v133_v37 = vmul.f32 0.03125, %v132_v36  ;;  %v134_v38 = vmul.f32 %v119_v35, %v119_v35  ;;  %v136_v47 = vsub.f32 %v100_v10, %v119_v35  ;;  %v137_v48 = vsub.f32 %v102_v12, %v119_v35 }
  0xbc   :  { %v138_v49 = vsub.f32 %v105_v11, %v119_v35  ;;  %v139_v50 = vsub.f32 %v107_v16, %v119_v35 }
  0xbd   :  { %v135_v39 = vsub.f32 %v133_v37, %v134_v38 }
  0xbf   :  { %v140_v40 = vadd.f32 1e-05, %v135_v39 }
  0xc1   :  { %240 = vrsqrt.f32 %v140_v40  ;;  %vm147_vm1 = vweird.f32 %v140_v40 }
  0xc7   :  { %v241_v41 = vpop.eup %240 }
  0xc8   :  { %v142_v42 = vmul.f32 %v241_v41, %v140_v40  ;;  %vm148_vm0 = vweird.f32 %v241_v41 }
  0xc9   :  { %vm149_vm2 = vmor %vm147_vm1, %vm148_vm0 }
  0xca   :  { %v143_v43 = vmul.f32 %v241_v41, %v142_v42 }
  0xcc   :  { %v144_v44 = vmul.f32 0.5, %v143_v43 }
  0xce   :  { %v145_v45 = vsub.f32 1.5, %v144_v44 }
  0xd0   :  { %v146_v46 = vmul.f32 %v241_v41, %v145_v45 }
  0xd2   :  { %v150_v51 = vsel %vm149_vm2, %v241_v41, %v146_v46 }
  0xd3   :  { %v151_v52 = vmul.f32 %v150_v51, %v136_v47  ;;  %v152_v53 = vmul.f32 %v150_v51, %v137_v48  ;;  %v153_v54 = vmul.f32 %v150_v51, %v138_v49  ;;  %v154_v55 = vmul.f32 %v150_v51, %v139_v50 }
  0xd5   :  { %v155_v56 = vmax.f32 %v151_v52, 0.0  ;;  %v156_v57 = vmax.f32 %v152_v53, 0.0  ;;  %v157_v58 = vmax.f32 %v153_v54, 0.0  ;;  %v158_v59 = vmax.f32 %v154_v55, 0.0 }
  0xd7   :  { %v224_v60 = vpack.c.bf16 %v156_v57, %v155_v56  ;;  %v229_v61 = vpack.c.bf16 %v158_v59, %v157_v58 }
  0xd9   :  { %225 = vst [vmem:[%s295_s2] sm:$0xff] %v224_v60  }
  0xda   :  { %231 = vst [vmem:[%s295_s2 + $0x8] sm:$0xff] %v229_v61  }

// kernel: _lambda_.20
= control target key start
LH: loop header
LB: loop body
LE: loop exit
PB: predicated region body
PF: predicated region fallthrough
CT: control target
= control target key end

     0   :  { %s793_s9 = smov 0   ;;  %s795_s10 = smov 0   ;;  %s963_s0 = inlined_call_operand.vmem [shape: bf16[2,16,128], index: 0, kind: input, shape index: {}]   ;;  %s964_s1 = inlined_call_operand.vmem [shape: bf16[128,512], index: 1, kind: input, shape index: {}]   ;;  %s965_s2 = inlined_call_operand.vmem [shape: bf16[2,16,512], index: 2, kind: output, shape index: {}]  }
   0x1   :  { %s797_s11 = smov 0  }
   0x2 LB: > { %s603_s12 = sadd.s32 4294967295, %s776_s11   ;;  %s810_s13 = sadd.s32 1, %s776_s11   ;;  %s776_s11 = sphi %s797_s11, %s969_s11   ;;  %s772_s10 = sphi %s795_s10, %s968_s10   ;;  %s768_s9 = sphi %s793_s9, %s967_s9  }
   0x3   : > { %s37_s14 = ssub.s32 %s776_s11, %s810_s13  ;;  %s40_s15 = sadd.s32 1, %s772_s10 }
   0x4   : > { %p38_p0 = scmp.eq.s32.totalorder %s37_s14, 0  ;;  %p47_p1 = scmp.ne.s32.totalorder %s772_s10, %s768_s9 }
   0x5   : > { %p48_p2 = scmp.eq.s32.totalorder %s776_s11, 0  ;;  %p77_p3 = scmp.eq.s32.totalorder %s603_s12, 1 }
   0x6   : > { %s821_s16 = scalar_select %p38_p0, %s772_s10, %s40_s15  }
   0x7   : > { %p49_p4 = por %p48_p2, %p47_p1  ;;  %p823_p5 = por %p77_p3, %p47_p1 }
   0x8   : > { %p606_p6 = scmp.ge.s32.totalorder %s776_s11, 2 }
   0xa   : > { %102 = sbr.rel (%p606_p6) target bundleno = 35 (0x23), region = 20 }
   0xf   : > { %105 = sbr.rel (!%p49_p4) target bundleno = 35 (0x23), region = 24  ;;  %s107_s18 = sand.u32 (%p49_p4), 1, %s772_s10  }
  0x10   : > { %s690_s19 = sshll.u32 (%p49_p4), %s776_s11, 3  ;;  %s607_s20 = sshll.u32 (%p49_p4), %s107_s18, 7 }
  0x11   : > { %s833_s23 = scalar_lea.vmem (%p49_p4), %s964_s1, %s690_s19  ;;  %s109_s24 = scalar_lea.vmem (%p49_p4), [#allocation2], %s607_s20 }
  0x12   : > { %v171_v0 = vld [vmem:[%s833_s23] sm:$0xff] (%p49_p4)  ;;  %v173_v1 = vld [vmem:[%s833_s23 + $0x10] sm:$0xff] (%p49_p4) }
  0x13   : > { %v175_v2 = vld [vmem:[%s833_s23 + $0x20] sm:$0xff] (%p49_p4)  ;;  %172 = vst [vmem:[%s109_s24] sm:$0xff] (%p49_p4), %v171_v0  ;;  %v177_v3 = vld [vmem:[%s833_s23 + $0x30] sm:$0xff] (%p49_p4) }
  0x14   : > { %174 = vst [vmem:[%s109_s24 + $0x8] sm:$0xff] %v173_v1  ;;  %v179_v4 = vld [vmem:[%s833_s23 + $0x40] sm:$0xff]  ;;  %v181_v5 = vld [vmem:[%s833_s23 + $0x50] sm:$0xff] }
  0x15   : > { %176 = vst [vmem:[%s109_s24 + $0x10] sm:$0xff] %v175_v2  ;;  %v183_v6 = vld [vmem:[%s833_s23 + $0x60] sm:$0xff]  ;;  %v185_v7 = vld [vmem:[%s833_s23 + $0x70] sm:$0xff] }
  0x16   : > { %178 = vst [vmem:[%s109_s24 + $0x18] sm:$0xff] %v177_v3  ;;  %v187_v8 = vld [vmem:[%s833_s23 + $0x80] sm:$0xff]  ;;  %v189_v9 = vld [vmem:[%s833_s23 + $0x90] sm:$0xff] }
  0x17   : > { %180 = vst [vmem:[%s109_s24 + $0x20] sm:$0xff] %v179_v4  ;;  %v191_v10 = vld [vmem:[%s833_s23 + $0xa0] sm:$0xff]  ;;  %v193_v11 = vld [vmem:[%s833_s23 + $0xb0] sm:$0xff] }
  0x18   : > { %182 = vst [vmem:[%s109_s24 + $0x28] sm:$0xff] %v181_v5  ;;  %v195_v12 = vld [vmem:[%s833_s23 + $0xc0] sm:$0xff]  ;;  %v197_v13 = vld [vmem:[%s833_s23 + $0xd0] sm:$0xff] }
  0x19   : > { %184 = vst [vmem:[%s109_s24 + $0x30] sm:$0xff] %v183_v6  ;;  %v199_v14 = vld [vmem:[%s833_s23 + $0xe0] sm:$0xff]  ;;  %v201_v15 = vld [vmem:[%s833_s23 + $0xf0] sm:$0xff] }
  0x1a   : > { %186 = vst [vmem:[%s109_s24 + $0x38] sm:$0xff] %v185_v7 }
  0x1b   : > { %188 = vst [vmem:[%s109_s24 + $0x40] sm:$0xff] %v187_v8 }
  0x1c   : > { %190 = vst [vmem:[%s109_s24 + $0x48] sm:$0xff] %v189_v9 }
  0x1d   : > { %192 = vst [vmem:[%s109_s24 + $0x50] sm:$0xff] %v191_v10 }
  0x1e   : > { %194 = vst [vmem:[%s109_s24 + $0x58] sm:$0xff] %v193_v11 }
  0x1f   : > { %196 = vst [vmem:[%s109_s24 + $0x60] sm:$0xff] %v195_v12 }
  0x20   : > { %198 = vst [vmem:[%s109_s24 + $0x68] sm:$0xff] %v197_v13 }
  0x21   : > { %200 = vst [vmem:[%s109_s24 + $0x70] sm:$0xff] %v199_v14 }
  0x22   : > { %202 = vst [vmem:[%s109_s24 + $0x78] sm:$0xff] %v201_v15 }
  0x23 PF: > { %p610_p7 = scmp.ge.s32.totalorder %s776_s11, 1  ;;  %p207_p8 = scmp.lt.s32.totalorder %s776_s11, 3 }
  0x25   : > { %p208_p9 = pnand %p610_p7, %p207_p8 }
  0x26   : > { %s214_s25 = sand.u32 (!%p208_p9), 1, %s768_s9  }
  0x27   : > { %211 = sbr.rel (%p208_p9) target bundleno = 278 (0x116), region = 62  ;;  %s611_s26 = sshll.u32 (!%p208_p9), %s214_s25, 7 }
  0x28   : > { %s856_s27 = scalar_lea.vmem (!%p208_p9), [#allocation2], %s611_s26  ;;  %s612_s4 = sshll.u32 (!%p208_p9), %s214_s25, 5 }
  0x29   : > { %s233_s5 = scalar_lea.vmem (!%p208_p9), [#allocation3], %s612_s4 }
  0x2c   : > { %v679_v16 = vld [vmem:[%s856_s27 + $0x70] sm:$0xf]  ;;  %v708_v17 = vld [vmem:[%s856_s27 + $0x74] sm:$0xf0]  ;;  %v707_v18 = vld [vmem:[%s856_s27 + $0x74] sm:$0xf] }
  0x2d   : > { %v680_v19 = vor.u32 %v708_v17, %v679_v16  ;;  %v681_v20 = vld [vmem:[%s856_s27 + $0x78] sm:$0xf0]  ;;  %v671_v21 = vld [vmem:[%s856_s27 + $0x60] sm:$0xf]  ;;  %v706_v22 = vld [vmem:[%s856_s27 + $0x64] sm:$0xf0] }
  0x2e   : > { %v684_v23 = vor.u32 %v707_v18, %v681_v20  ;;  %v705_v24 = vld [vmem:[%s856_s27 + $0x64] sm:$0xf]  ;;  %v673_v25 = vld [vmem:[%s856_s27 + $0x68] sm:$0xf0]  ;;  %v672_v26 = vor.u32 %v706_v22, %v671_v21  ;;  %v663_v28 = vld [vmem:[%s856_s27 + $0x50] sm:$0xf] }
  0x2f   : > { %348 = vmatpush.bf16.msra.mxu0 %v680_v19  ;;  %710 = vmatpush.bf16.msra.mxu2 %v680_v19  ;;  %v676_v27 = vor.u32 %v705_v24, %v673_v25  ;;  %v704_v29 = vld [vmem:[%s856_s27 + $0x54] sm:$0xf0]  ;;  %v703_v30 = vld [vmem:[%s856_s27 + $0x54] sm:$0xf]  ;;  %v665_v31 = vld [vmem:[%s856_s27 + $0x58] sm:$0xf0] }
  0x30   : > { %367 = vmatpush.bf16.msra.mxu1 %v684_v23  ;;  %718 = vmatpush.bf16.msra.mxu3 %v684_v23  ;;  %v664_v32 = vor.u32 %v704_v29, %v663_v28  ;;  %v668_v33 = vor.u32 %v703_v30, %v665_v31  ;;  %v655_v34 = vld [vmem:[%s856_s27 + $0x40] sm:$0xf]  ;;  %v702_v35 = vld [vmem:[%s856_s27 + $0x44] sm:$0xf0]  ;;  %v701_v36 = vld [vmem:[%s856_s27 + $0x44] sm:$0xf] }
  0x31   : > { %v657_v37 = vld [vmem:[%s856_s27 + $0x48] sm:$0xf0]  ;;  %v656_v38 = vor.u32 %v702_v35, %v655_v34  ;;  %v647_v40 = vld [vmem:[%s856_s27 + $0x30] sm:$0xf]  ;;  %v700_v41 = vld [vmem:[%s856_s27 + $0x34] sm:$0xf0] }
  0x32   : > { %v660_v39 = vor.u32 %v701_v36, %v657_v37  ;;  %v699_v42 = vld [vmem:[%s856_s27 + $0x34] sm:$0xf]  ;;  %v649_v43 = vld [vmem:[%s856_s27 + $0x38] sm:$0xf0]  ;;  %v648_v44 = vor.u32 %v700_v41, %v647_v40  ;;  %v639_v46 = vld [vmem:[%s856_s27 + $0x20] sm:$0xf] }
  0x33   : > { %349 = vmatpush.bf16.msra.mxu0 %v672_v26  ;;  %711 = vmatpush.bf16.msra.mxu2 %v672_v26  ;;  %v652_v45 = vor.u32 %v699_v42, %v649_v43  ;;  %v698_v47 = vld [vmem:[%s856_s27 + $0x24] sm:$0xf0]  ;;  %v697_v48 = vld [vmem:[%s856_s27 + $0x24] sm:$0xf]  ;;  %v641_v49 = vld [vmem:[%s856_s27 + $0x28] sm:$0xf0] }
  0x34   : > { %368 = vmatpush.bf16.msra.mxu1 %v676_v27  ;;  %719 = vmatpush.bf16.msra.mxu3 %v676_v27  ;;  %v640_v50 = vor.u32 %v698_v47, %v639_v46  ;;  %v644_v51 = vor.u32 %v697_v48, %v641_v49  ;;  %v631_v52 = vld [vmem:[%s856_s27 + $0x10] sm:$0xf]  ;;  %v696_v53 = vld [vmem:[%s856_s27 + $0x14] sm:$0xf0]  ;;  %v695_v54 = vld [vmem:[%s856_s27 + $0x14] sm:$0xf] }
  0x35   : > { %v633_v55 = vld [vmem:[%s856_s27 + $0x18] sm:$0xf0]  ;;  %v632_v56 = vor.u32 %v696_v53, %v631_v52  ;;  %v623_v58 = vld [vmem:[%s856_s27] sm:$0xf]  ;;  %v694_v59 = vld [vmem:[%s856_s27 + $0x4] sm:$0xf0] }
  0x36   : > { %v636_v57 = vor.u32 %v695_v54, %v633_v55  ;;  %v693_v60 = vld [vmem:[%s856_s27 + $0x4] sm:$0xf]  ;;  %v625_v61 = vld [vmem:[%s856_s27 + $0x8] sm:$0xf0]  ;;  %v624_v62 = vor.u32 %v694_v59, %v623_v58  ;;  %v692_v1 = vld [vmem:[%s963_s0 + $0x8] sm:$0xff]  ;;  %s709_s6 = sshll.u32 (%p823_p5), %s603_s12, 3 }
  0x37   : > { %350 = vmatpush.bf16.msra.mxu0 %v664_v32  ;;  %712 = vmatpush.bf16.msra.mxu2 %v664_v32  ;;  %v628_v63 = vor.u32 %v693_v60, %v625_v61  ;;  %v691_v0 = vld [vmem:[%s963_s0] sm:$0xff]  ;;  %s501_s9 = scalar_lea.vmem (%p823_p5), %s965_s2, %s709_s6 }
  0x38   : > { %369 = vmatpush.bf16.msra.mxu1 %v668_v33  ;;  %720 = vmatpush.bf16.msra.mxu3 %v668_v33 }
  0x3b   : > { %351 = vmatpush.bf16.msra.mxu0 %v656_v38  ;;  %713 = vmatpush.bf16.msra.mxu2 %v656_v38 }
  0x3c   : > { %370 = vmatpush.bf16.msra.mxu1 %v660_v39  ;;  %721 = vmatpush.bf16.msra.mxu3 %v660_v39 }
  0x3f   : > { %352 = vmatpush.bf16.msra.mxu0 %v648_v44  ;;  %714 = vmatpush.bf16.msra.mxu2 %v648_v44 }
  0x40   : > { %371 = vmatpush.bf16.msra.mxu1 %v652_v45  ;;  %722 = vmatpush.bf16.msra.mxu3 %v652_v45 }
  0x43   : > { %353 = vmatpush.bf16.msra.mxu0 %v640_v50  ;;  %715 = vmatpush.bf16.msra.mxu2 %v640_v50 }
  0x44   : > { %372 = vmatpush.bf16.msra.mxu1 %v644_v51  ;;  %723 = vmatpush.bf16.msra.mxu3 %v644_v51 }
  0x47   : > { %354 = vmatpush.bf16.msra.mxu0 %v632_v56  ;;  %716 = vmatpush.bf16.msra.mxu2 %v632_v56 }
  0x48   : > { %373 = vmatpush.bf16.msra.mxu1 %v636_v57  ;;  %724 = vmatpush.bf16.msra.mxu3 %v636_v57 }
  0x4b   : > { %355 = vmatpush.bf16.msra.mxu0 %v624_v62  ;;  %717 = vmatpush.bf16.msra.mxu2 %v624_v62 }
  0x4c   : > { %374 = vmatpush.bf16.msra.mxu1 %v628_v63  ;;  %725 = vmatpush.bf16.msra.mxu3 %v628_v63 }
  0x4e   : > { %356 = vmatmul.bf16.vlgmr.msra.gmra.mxu0 %v691_v0  ;;  %361 = vmatmul.bf16.vlgmr.msra.gmra.mxu2 %v692_v1 }
  0x4f   : > { %375 = vmatmul.bf16.vlgmr.msra.gmra.mxu1 %v691_v0  ;;  %380 = vmatmul.bf16.vlgmr.msra.gmra.mxu3 %v692_v1 }
  0xcb   : > { %v896_v2 = vpop.f32.mrf.mxu0 }
  0xcc   : > { %v898_v3 = vpop.f32.mrf.mxu1  ;;  %v406_v7 = vmul.f32 %v896_v2, %v896_v2 }
  0xcd   : > { %v407_v11 = vmul.f32 %v898_v3, %v898_v3 }
  0xd1   : > { %v900_v4 = vpop.f32.mrf.mxu2 }
  0xd2   : > { %v902_v5 = vpop.f32.mrf.mxu3  ;;  %v410_v16 = vmul.f32 %v900_v4, %v900_v4 }
  0xd3   : > { %v904_v6 = vpop.f32.mrf.mxu0  ;;  %v411_v18 = vmul.f32 %v902_v5, %v902_v5 }
  0xd4   : > { %v386_v8 = vadd.f32 %v904_v6, %v896_v2  ;;  %v408_v9 = vmul.f32 %v904_v6, %v904_v6  ;;  %v912_v10 = vpop.f32.mrf.mxu1 }
  0xd5   : > { %v395_v12 = vadd.f32 %v912_v10, %v898_v3  ;;  %v409_v13 = vmul.f32 %v912_v10, %v912_v10 }
  0xd6   : > { %v414_v14 = vadd.f32 %v408_v9, %v406_v7  ;;  %v387_v17 = vadd.f32 %v386_v8, %v900_v4 }
  0xd7   : > { %v423_v15 = vadd.f32 %v409_v13, %v407_v11  ;;  %v396_v20 = vadd.f32 %v395_v12, %v902_v5 }
  0xd8   : > { %v415_v23 = vadd.f32 %v414_v14, %v410_v16 }
  0xd9   : > { %v925_v19 = vpop.f32.mrf.mxu2  ;;  %v424_v27 = vadd.f32 %v423_v15, %v411_v18 }
  0xda   : > { %v388_v21 = vadd.f32 %v387_v17, %v925_v19  ;;  %v412_v22 = vmul.f32 %v925_v19, %v925_v19  ;;  %v931_v24 = vpop.f32.mrf.mxu3 }
  0xdb   : > { %v397_v25 = vadd.f32 %v396_v20, %v931_v24  ;;  %v413_v26 = vmul.f32 %v931_v24, %v931_v24 }
  0xdc   : > { %v389_v28 = vrot.slane %v388_v21, 4  ;;  %v416_v29 = vadd.f32 %v415_v23, %v412_v22 }
  0xdd   : > { %v398_v30 = vrot.slane %v397_v25, 4  ;;  %v425_v31 = vadd.f32 %v424_v27, %v413_v26 }
  0xde   : > { %v390_v32 = vadd.f32 %v389_v28, %v388_v21  ;;  %v417_v33 = vrot.slane %v416_v29, 4 }
  0xdf   : > { %v399_v34 = vadd.f32 %v398_v30, %v397_v25  ;;  %v426_v35 = vrot.slane %v425_v31, 4 }
  0xe0   : > { %v391_v36 = vrot.slane %v390_v32, 2  ;;  %v418_v37 = vadd.f32 %v417_v33, %v416_v29 }
  0xe1   : > { %v400_v38 = vrot.slane %v399_v34, 2  ;;  %v427_v39 = vadd.f32 %v426_v35, %v425_v31 }
  0xe2   : > { %v392_v40 = vadd.f32 %v391_v36, %v390_v32  ;;  %v419_v41 = vrot.slane %v418_v37, 2 }
  0xe3   : > { %v401_v42 = vadd.f32 %v400_v38, %v399_v34  ;;  %v428_v43 = vrot.slane %v427_v39, 2 }
  0xe4   : > { %v393_v44 = vrot.slane %v392_v40, 1  ;;  %v420_v45 = vadd.f32 %v419_v41, %v418_v37 }
  0xe5   : > { %v402_v46 = vrot.slane %v401_v42, 1  ;;  %v429_v47 = vadd.f32 %v428_v43, %v427_v39 }
  0xe6   : > { %v394_v48 = vadd.f32 %v393_v44, %v392_v40  ;;  %v421_v49 = vrot.slane %v420_v45, 1 }
  0xe7   : > { %v403_v50 = vadd.f32 %v402_v46, %v401_v42  ;;  %v430_v51 = vrot.slane %v429_v47, 1 }
  0xe8   : > { %v404_v52 = vmul.f32 0.03125, %v394_v48  ;;  %v422_v53 = vadd.f32 %v421_v49, %v420_v45 }
  0xe9   : > { %v405_v54 = vmul.f32 0.03125, %v403_v50  ;;  %v431_v55 = vadd.f32 %v430_v51, %v429_v47 }
  0xea   : > { %v432_v56 = vmul.f32 0.03125, %v422_v53  ;;  %v434_v57 = vmul.f32 %v404_v52, %v404_v52  ;;  %v438_v16 = vsub.f32 %v896_v2, %v404_v52  ;;  %v440_v18 = vsub.f32 %v904_v6, %v404_v52 }
  0xeb   : > { %v433_v58 = vmul.f32 0.03125, %v431_v55  ;;  %v435_v59 = vmul.f32 %v405_v54, %v405_v54  ;;  %v442_v20 = vsub.f32 %v900_v4, %v404_v52  ;;  %v444_v21 = vsub.f32 %v925_v19, %v404_v52 }
  0xec   : > { %v436_v60 = vsub.f32 %v432_v56, %v434_v57  ;;  %v439_v25 = vsub.f32 %v898_v3, %v405_v54  ;;  %v441_v29 = vsub.f32 %v912_v10, %v405_v54  ;;  %v443_v6 = vsub.f32 %v902_v5, %v405_v54 }
  0xed   : > { %v437_v61 = vsub.f32 %v433_v58, %v435_v59  ;;  %v445_v4 = vsub.f32 %v931_v24, %v405_v54 }
  0xee   : > { %v446_v62 = vadd.f32 1e-05, %v436_v60 }
  0xef   : > { %v447_v63 = vadd.f32 1e-05, %v437_v61 }
  0xf0   : > { %750 = vrsqrt.f32 %v446_v62  ;;  %vm454_vm1 = vweird.f32 %v446_v62 }
  0xf1   : > { %752 = vrsqrt.f32 %v447_v63  ;;  %vm464_vm4 = vweird.f32 %v447_v63 }
  0xf6   : > { %v751_v0 = vpop.eup %750 }
  0xf7   : > { %v753_v1 = vpop.eup %752  ;;  %v449_v7 = vmul.f32 %v751_v0, %v446_v62  ;;  %vm455_vm0 = vweird.f32 %v751_v0 }
  0xf8   : > { %v459_v8 = vmul.f32 %v753_v1, %v447_v63  ;;  %vm465_vm2 = vweird.f32 %v753_v1  ;;  %vm456_vm3 = vmor %vm454_vm1, %vm455_vm0 }
  0xf9   : > { %v450_v9 = vmul.f32 %v751_v0, %v449_v7  ;;  %vm466_vm5 = vmor %vm464_vm4, %vm465_vm2 }
  0xfa   : > { %v460_v11 = vmul.f32 %v753_v1, %v459_v8 }
  0xfb   : > { %v451_v12 = vmul.f32 0.5, %v450_v9 }
  0xfc   : > { %v461_v13 = vmul.f32 0.5, %v460_v11 }
  0xfd   : > { %v452_v14 = vsub.f32 1.5, %v451_v12 }
  0xfe   : > { %v462_v15 = vsub.f32 1.5, %v461_v13 }
  0xff   : > { %v453_v17 = vmul.f32 %v751_v0, %v452_v14 }
 0x100   : > { %v463_v22 = vmul.f32 %v753_v1, %v462_v15 }
 0x101   : > { %v457_v23 = vsel %vm456_vm3, %v751_v0, %v453_v17 }
 0x102   : > { %v468_v26 = vmul.f32 %v457_v23, %v438_v16  ;;  %v470_v27 = vmul.f32 %v457_v23, %v440_v18  ;;  %v472_v28 = vmul.f32 %v457_v23, %v442_v20  ;;  %v474_v2 = vmul.f32 %v457_v23, %v444_v21 }
 0x103   : > { %v467_v30 = vsel %vm466_vm5, %v753_v1, %v463_v22 }
 0x104   : > { %v476_v19 = vmax.f32 %v468_v26, 0.0  ;;  %v478_v31 = vmax.f32 %v470_v27, 0.0  ;;  %v480_v32 = vmax.f32 %v472_v28, 0.0  ;;  %v469_v33 = vmul.f32 %v467_v30, %v439_v25 }
 0x105   : > { %v471_v3 = vmul.f32 %v467_v30, %v441_v29  ;;  %v473_v34 = vmul.f32 %v467_v30, %v443_v6  ;;  %v475_v35 = vmul.f32 %v467_v30, %v445_v4  ;;  %v482_v36 = vmax.f32 %v474_v2, 0.0 }
 0x106   : > { %v477_v37 = vmax.f32 %v469_v33, 0.0 }
 0x107   : > { %v479_v38 = vmax.f32 %v471_v3, 0.0  ;;  %v481_v39 = vmax.f32 %v473_v34, 0.0  ;;  %v483_v40 = vmax.f32 %v475_v35, 0.0 }
 0x108   : > { %v484_v10 = vpack.c.bf16 %v477_v37, %v476_v19 }
 0x109   : > { %v485_v41 = vpack.c.bf16 %v479_v38, %v478_v31  ;;  %v486_v5 = vpack.c.bf16 %v481_v39, %v480_v32  ;;  %v487_v42 = vpack.c.bf16 %v483_v40, %v482_v36  ;;  %498 = sbr.rel (!%p823_p5) target bundleno = 278 (0x116), region = 70 }
 0x10a   : > { %488 = vst [vmem:[%s233_s5] sm:$0xff] %v484_v10 }
 0x10b   : > { %489 = vst [vmem:[%s233_s5 + $0x8] sm:$0xff] %v485_v41 }
 0x10c   : > { %490 = vst [vmem:[%s233_s5 + $0x10] sm:$0xff] %v486_v5 }
 0x10d   : > { %491 = vst [vmem:[%s233_s5 + $0x18] sm:$0xff] %v487_v42 }
 0x111   : > { %v536_v24 = vld [vmem:[%s233_s5] sm:$0xff] }
 0x112   : > { %v538_v43 = vld [vmem:[%s233_s5 + $0x8] sm:$0xff]  ;;  %537 = vst [vmem:[%s501_s9] sm:$0xff] %v536_v24 }
 0x113   : > { %v540_v44 = vld [vmem:[%s233_s5 + $0x10] sm:$0xff]  ;;  %539 = vst [vmem:[%s501_s9 + $0x10] sm:$0xff] %v538_v43 }
 0x114   : > { %v542_v45 = vld [vmem:[%s233_s5 + $0x18] sm:$0xff]  ;;  %541 = vst [vmem:[%s501_s9 + $0x20] sm:$0xff] %v540_v44 }
 0x115   : > { %543 = vst [vmem:[%s501_s9 + $0x30] sm:$0xff] %v542_v45 }
 0x116 PF: > { %p9_p10 = scmp.ge.s32.totalorder %s810_s13, 4   ;;  %s967_s9 = smov %s772_s10 }
 0x117   : > { %s968_s10 = smov %s821_s16  ;;  %s969_s11 = smov %s810_s13 }
 0x118   :  { %11 = sbr.rel (!%p9_p10) target bundleno = 2 (0x2), region = 139 }

// kernel: _lambda_.22
= control target key start
LH: loop header
LB: loop body
LE: loop exit
PB: predicated region body
PF: predicated region fallthrough
CT: control target
= control target key end

     0   :  { %s1075_s9 = smov 0   ;;  %s1077_s10 = smov 0   ;;  %s1333_s0 = inlined_call_operand.vmem [shape: bf16[2,16,256], index: 0, kind: input, shape index: {}]   ;;  %s1334_s1 = inlined_call_operand.vmem [shape: bf16[256,1024], index: 1, kind: input, shape index: {}]   ;;  %s1335_s2 = inlined_call_operand.vmem [shape: f32[2,1024], index: 2, kind: output, shape index: {}]  }
   0x1   :  { %s1079_s11 = smov 0  }
   0x2 LB: > { %s814_s12 = sadd.s32 4294967295, %s1058_s11   ;;  %s1092_s13 = sadd.s32 1, %s1058_s11   ;;  %s1058_s11 = sphi %s1079_s11, %s1338_s11   ;;  %s1054_s10 = sphi %s1077_s10, %s1337_s10   ;;  %s1050_s9 = sphi %s1075_s9, %s1336_s9  }
   0x3   : > { %s37_s14 = ssub.s32 %s1058_s11, %s1092_s13  ;;  %s40_s15 = sadd.s32 1, %s1054_s10 }
   0x4   : > { %p38_p0 = scmp.eq.s32.totalorder %s37_s14, 0  ;;  %p47_p1 = scmp.ne.s32.totalorder %s1054_s10, %s1050_s9 }
   0x5   : > { %p48_p2 = scmp.eq.s32.totalorder %s1058_s11, 0  ;;  %p817_p4 = scmp.ge.s32.totalorder %s1058_s11, 4 }
   0x6   : > { %s1101_s16 = scalar_select %p38_p0, %s1054_s10, %s40_s15  }
   0x7   : > { %p49_p3 = por %p48_p2, %p47_p1  ;;  %102 = sbr.rel (%p817_p4) target bundleno = 48 (0x30), region = 20 }
   0xc   : > { %105 = sbr.rel (!%p49_p3) target bundleno = 48 (0x30), region = 24  ;;  %s107_s17 = sand.u32 (%p49_p3), 1, %s1054_s10  }
   0xd   : > { %s971_s18 = sshll.u32 (%p49_p3), %s1058_s11, 3  ;;  %s818_s19 = sshll.u32 (%p49_p3), %s107_s17, 8 }
   0xe   : > { %s1109_s22 = scalar_lea.vmem (%p49_p3), %s1334_s1, %s971_s18  ;;  %s1114_s23 = scalar_lea.vmem (%p49_p3), [#allocation2], %s818_s19 }
   0xf   : > { %v203_v0 = vld [vmem:[%s1109_s22] sm:$0xff] (%p49_p3) }
  0x10   : > { %v205_v1 = vld [vmem:[%s1109_s22 + $0x20] sm:$0xff] (%p49_p3)  ;;  %204 = vst [vmem:[%s1114_s23] sm:$0xff] (%p49_p3), %v203_v0 }
  0x11   : > { %v207_v2 = vld [vmem:[%s1109_s22 + $0x40] sm:$0xff]  ;;  %206 = vst [vmem:[%s1114_s23 + $0x8] sm:$0xff] %v205_v1 }
  0x12   : > { %v209_v3 = vld [vmem:[%s1109_s22 + $0x60] sm:$0xff]  ;;  %208 = vst [vmem:[%s1114_s23 + $0x10] sm:$0xff] %v207_v2 }
  0x13   : > { %v211_v4 = vld [vmem:[%s1109_s22 + $0x80] sm:$0xff]  ;;  %210 = vst [vmem:[%s1114_s23 + $0x18] sm:$0xff] %v209_v3 }
  0x14   : > { %v213_v5 = vld [vmem:[%s1109_s22 + $0xa0] sm:$0xff]  ;;  %212 = vst [vmem:[%s1114_s23 + $0x20] sm:$0xff] %v211_v4 }
  0x15   : > { %v215_v6 = vld [vmem:[%s1109_s22 + $0xc0] sm:$0xff]  ;;  %214 = vst [vmem:[%s1114_s23 + $0x28] sm:$0xff] %v213_v5 }
  0x16   : > { %v217_v7 = vld [vmem:[%s1109_s22 + $0xe0] sm:$0xff]  ;;  %216 = vst [vmem:[%s1114_s23 + $0x30] sm:$0xff] %v215_v6 }
  0x17   : > { %v219_v8 = vld [vmem:[%s1109_s22 + $0x100] sm:$0xff]  ;;  %218 = vst [vmem:[%s1114_s23 + $0x38] sm:$0xff] %v217_v7 }
  0x18   : > { %v221_v9 = vld [vmem:[%s1109_s22 + $0x120] sm:$0xff]  ;;  %220 = vst [vmem:[%s1114_s23 + $0x40] sm:$0xff] %v219_v8 }
  0x19   : > { %v223_v10 = vld [vmem:[%s1109_s22 + $0x140] sm:$0xff]  ;;  %222 = vst [vmem:[%s1114_s23 + $0x48] sm:$0xff] %v221_v9 }
  0x1a   : > { %v225_v11 = vld [vmem:[%s1109_s22 + $0x160] sm:$0xff]  ;;  %224 = vst [vmem:[%s1114_s23 + $0x50] sm:$0xff] %v223_v10 }
  0x1b   : > { %v227_v12 = vld [vmem:[%s1109_s22 + $0x180] sm:$0xff]  ;;  %226 = vst [vmem:[%s1114_s23 + $0x58] sm:$0xff] %v225_v11 }
  0x1c   : > { %v229_v13 = vld [vmem:[%s1109_s22 + $0x1a0] sm:$0xff]  ;;  %228 = vst [vmem:[%s1114_s23 + $0x60] sm:$0xff] %v227_v12 }
  0x1d   : > { %v231_v14 = vld [vmem:[%s1109_s22 + $0x1c0] sm:$0xff]  ;;  %230 = vst [vmem:[%s1114_s23 + $0x68] sm:$0xff] %v229_v13 }
  0x1e   : > { %v233_v15 = vld [vmem:[%s1109_s22 + $0x1e0] sm:$0xff]  ;;  %232 = vst [vmem:[%s1114_s23 + $0x70] sm:$0xff] %v231_v14 }
  0x1f   : > { %v235_v16 = vld [vmem:[%s1109_s22 + $0x200] sm:$0xff]  ;;  %234 = vst [vmem:[%s1114_s23 + $0x78] sm:$0xff] %v233_v15 }
  0x20   : > { %v237_v17 = vld [vmem:[%s1109_s22 + $0x220] sm:$0xff]  ;;  %236 = vst [vmem:[%s1114_s23 + $0x80] sm:$0xff] %v235_v16 }
  0x21   : > { %v239_v18 = vld [vmem:[%s1109_s22 + $0x240] sm:$0xff]  ;;  %238 = vst [vmem:[%s1114_s23 + $0x88] sm:$0xff] %v237_v17 }
  0x22   : > { %v241_v19 = vld [vmem:[%s1109_s22 + $0x260] sm:$0xff]  ;;  %240 = vst [vmem:[%s1114_s23 + $0x90] sm:$0xff] %v239_v18 }
  0x23   : > { %v243_v20 = vld [vmem:[%s1109_s22 + $0x280] sm:$0xff]  ;;  %242 = vst [vmem:[%s1114_s23 + $0x98] sm:$0xff] %v241_v19 }
  0x24   : > { %v245_v21 = vld [vmem:[%s1109_s22 + $0x2a0] sm:$0xff]  ;;  %244 = vst [vmem:[%s1114_s23 + $0xa0] sm:$0xff] %v243_v20 }
  0x25   : > { %v247_v22 = vld [vmem:[%s1109_s22 + $0x2c0] sm:$0xff]  ;;  %246 = vst [vmem:[%s1114_s23 + $0xa8] sm:$0xff] %v245_v21 }
  0x26   : > { %v249_v23 = vld [vmem:[%s1109_s22 + $0x2e0] sm:$0xff]  ;;  %248 = vst [vmem:[%s1114_s23 + $0xb0] sm:$0xff] %v247_v22 }
  0x27   : > { %v251_v24 = vld [vmem:[%s1109_s22 + $0x300] sm:$0xff]  ;;  %250 = vst [vmem:[%s1114_s23 + $0xb8] sm:$0xff] %v249_v23 }
  0x28   : > { %v253_v25 = vld [vmem:[%s1109_s22 + $0x320] sm:$0xff]  ;;  %252 = vst [vmem:[%s1114_s23 + $0xc0] sm:$0xff] %v251_v24 }
  0x29   : > { %v255_v26 = vld [vmem:[%s1109_s22 + $0x340] sm:$0xff]  ;;  %254 = vst [vmem:[%s1114_s23 + $0xc8] sm:$0xff] %v253_v25 }
  0x2a   : > { %v257_v27 = vld [vmem:[%s1109_s22 + $0x360] sm:$0xff]  ;;  %256 = vst [vmem:[%s1114_s23 + $0xd0] sm:$0xff] %v255_v26 }
  0x2b   : > { %v259_v28 = vld [vmem:[%s1109_s22 + $0x380] sm:$0xff]  ;;  %258 = vst [vmem:[%s1114_s23 + $0xd8] sm:$0xff] %v257_v27 }
  0x2c   : > { %v261_v29 = vld [vmem:[%s1109_s22 + $0x3a0] sm:$0xff]  ;;  %260 = vst [vmem:[%s1114_s23 + $0xe0] sm:$0xff] %v259_v28 }
  0x2d   : > { %v263_v30 = vld [vmem:[%s1109_s22 + $0x3c0] sm:$0xff]  ;;  %262 = vst [vmem:[%s1114_s23 + $0xe8] sm:$0xff] %v261_v29 }
  0x2e   : > { %v265_v31 = vld [vmem:[%s1109_s22 + $0x3e0] sm:$0xff]  ;;  %264 = vst [vmem:[%s1114_s23 + $0xf0] sm:$0xff] %v263_v30 }
  0x2f   : > { %266 = vst [vmem:[%s1114_s23 + $0xf8] sm:$0xff] %v265_v31 }
  0x30 PF: > { %p821_p5 = scmp.ge.s32.totalorder %s1058_s11, 1  ;;  %p271_p6 = scmp.lt.s32.totalorder %s1058_s11, 5 }
  0x32   : > { %p272_p7 = pnand %p821_p5, %p271_p6 }
  0x33   : > { %s278_s24 = sand.u32 (!%p272_p7), 1, %s1050_s9   ;;  %s823_s20 = sshll.u32 (!%p272_p7), %s814_s12, 1 }
  0x34   : > { %275 = sbr.rel (%p272_p7) target bundleno = 323 (0x143), region = 62  ;;  %s822_s25 = sshll.u32 (!%p272_p7), %s278_s24, 8 }
  0x35   : > { %s1180_s26 = scalar_lea.vmem (!%p272_p7), [#allocation2], %s822_s25  ;;  %p301_p8 = scmp.lt.s32.totalorder (!%p272_p7), %s823_s20, 7 }
  0x39   : > { %v899_v32 = vld [vmem:[%s1180_s26 + $0x70] sm:$0xf]  ;;  %v991_v33 = vld [vmem:[%s1180_s26 + $0x74] sm:$0xf0]  ;;  %v990_v37 = vld [vmem:[%s1180_s26 + $0x74] sm:$0xf] }
  0x3a   : > { %v963_v34 = vld [vmem:[%s1180_s26 + $0xf0] sm:$0xf]  ;;  %v900_v35 = vor.u32 %v991_v33, %v899_v32  ;;  %v1007_v36 = vld [vmem:[%s1180_s26 + $0xf4] sm:$0xf0]  ;;  %v901_v38 = vld [vmem:[%s1180_s26 + $0x78] sm:$0xf0] }
  0x3b   : > { %v964_v39 = vor.u32 %v1007_v36, %v963_v34  ;;  %v904_v40 = vor.u32 %v990_v37, %v901_v38  ;;  %v1006_v41 = vld [vmem:[%s1180_s26 + $0xf4] sm:$0xf]  ;;  %v965_v42 = vld [vmem:[%s1180_s26 + $0xf8] sm:$0xf0]  ;;  %v891_v43 = vld [vmem:[%s1180_s26 + $0x60] sm:$0xf] }
  0x3c   : > { %522 = vmatpush.bf16.msra.mxu0 %v900_v35  ;;  %v968_v44 = vor.u32 %v1006_v41, %v965_v42  ;;  %v989_v45 = vld [vmem:[%s1180_s26 + $0x64] sm:$0xf0]  ;;  %v955_v46 = vld [vmem:[%s1180_s26 + $0xe0] sm:$0xf]  ;;  %v988_v50 = vld [vmem:[%s1180_s26 + $0x64] sm:$0xf] }
  0x3d   : > { %v1005_v47 = vld [vmem:[%s1180_s26 + $0xe4] sm:$0xf0]  ;;  %541 = vmatpush.bf16.msra.mxu1 %v964_v39  ;;  %560 = vmatpush.bf16.msra.mxu2 %v904_v40  ;;  %v892_v48 = vor.u32 %v989_v45, %v891_v43  ;;  %v893_v51 = vld [vmem:[%s1180_s26 + $0x68] sm:$0xf0]  ;;  %v1004_v52 = vld [vmem:[%s1180_s26 + $0xe4] sm:$0xf] }
  0x3e   : > { %v956_v49 = vor.u32 %v1005_v47, %v955_v46  ;;  %579 = vmatpush.bf16.msra.mxu3 %v968_v44  ;;  %v896_v53 = vor.u32 %v988_v50, %v893_v51  ;;  %v957_v54 = vld [vmem:[%s1180_s26 + $0xe8] sm:$0xf0]  ;;  %v883_v55 = vld [vmem:[%s1180_s26 + $0x50] sm:$0xf]  ;;  %v987_v56 = vld [vmem:[%s1180_s26 + $0x54] sm:$0xf0] }
  0x3f   : > { %v960_v57 = vor.u32 %v1004_v52, %v957_v54  ;;  %v947_v58 = vld [vmem:[%s1180_s26 + $0xd0] sm:$0xf]  ;;  %v1003_v59 = vld [vmem:[%s1180_s26 + $0xd4] sm:$0xf0]  ;;  %v986_v60 = vld [vmem:[%s1180_s26 + $0x54] sm:$0xf]  ;;  %v884_v61 = vor.u32 %v987_v56, %v883_v55 }
  0x40   : > { %523 = vmatpush.bf16.msra.mxu0 %v892_v48  ;;  %v885_v62 = vld [vmem:[%s1180_s26 + $0x58] sm:$0xf0]  ;;  %v1002_v63 = vld [vmem:[%s1180_s26 + $0xd4] sm:$0xf]  ;;  %v948_v1 = vor.u32 %v1003_v59, %v947_v58  ;;  %v875_v3 = vld [vmem:[%s1180_s26 + $0x40] sm:$0xf] }
  0x41   : > { %v949_v0 = vld [vmem:[%s1180_s26 + $0xd8] sm:$0xf0]  ;;  %542 = vmatpush.bf16.msra.mxu1 %v956_v49  ;;  %561 = vmatpush.bf16.msra.mxu2 %v896_v53  ;;  %v888_v2 = vor.u32 %v986_v60, %v885_v62  ;;  %v985_v4 = vld [vmem:[%s1180_s26 + $0x44] sm:$0xf0]  ;;  %v939_v5 = vld [vmem:[%s1180_s26 + $0xc0] sm:$0xf] }
  0x42   : > { %580 = vmatpush.bf16.msra.mxu3 %v960_v57  ;;  %v952_v6 = vor.u32 %v1002_v63, %v949_v0  ;;  %v1001_v7 = vld [vmem:[%s1180_s26 + $0xc4] sm:$0xf0]  ;;  %v984_v8 = vld [vmem:[%s1180_s26 + $0x44] sm:$0xf]  ;;  %v877_v9 = vld [vmem:[%s1180_s26 + $0x48] sm:$0xf0]  ;;  %v876_v12 = vor.u32 %v985_v4, %v875_v3 }
  0x43   : > { %v1000_v10 = vld [vmem:[%s1180_s26 + $0xc4] sm:$0xf]  ;;  %v941_v11 = vld [vmem:[%s1180_s26 + $0xc8] sm:$0xf0]  ;;  %v940_v13 = vor.u32 %v1001_v7, %v939_v5  ;;  %v880_v14 = vor.u32 %v984_v8, %v877_v9  ;;  %v867_v15 = vld [vmem:[%s1180_s26 + $0x30] sm:$0xf] }
  0x44   : > { %524 = vmatpush.bf16.msra.mxu0 %v884_v61  ;;  %v983_v16 = vld [vmem:[%s1180_s26 + $0x34] sm:$0xf0]  ;;  %v931_v17 = vld [vmem:[%s1180_s26 + $0xb0] sm:$0xf]  ;;  %v944_v18 = vor.u32 %v1000_v10, %v941_v11  ;;  %v982_v20 = vld [vmem:[%s1180_s26 + $0x34] sm:$0xf] }
  0x45   : > { %543 = vmatpush.bf16.msra.mxu1 %v948_v1  ;;  %562 = vmatpush.bf16.msra.mxu2 %v888_v2  ;;  %v999_v19 = vld [vmem:[%s1180_s26 + $0xb4] sm:$0xf0]  ;;  %v869_v21 = vld [vmem:[%s1180_s26 + $0x38] sm:$0xf0]  ;;  %v998_v22 = vld [vmem:[%s1180_s26 + $0xb4] sm:$0xf]  ;;  %v868_v24 = vor.u32 %v983_v16, %v867_v15 }
  0x46   : > { %581 = vmatpush.bf16.msra.mxu3 %v952_v6  ;;  %v933_v23 = vld [vmem:[%s1180_s26 + $0xb8] sm:$0xf0]  ;;  %v932_v25 = vor.u32 %v999_v19, %v931_v17  ;;  %v872_v26 = vor.u32 %v982_v20, %v869_v21  ;;  %v859_v27 = vld [vmem:[%s1180_s26 + $0x20] sm:$0xf]  ;;  %v981_v28 = vld [vmem:[%s1180_s26 + $0x24] sm:$0xf0] }
  0x47   : > { %v923_v29 = vld [vmem:[%s1180_s26 + $0xa0] sm:$0xf]  ;;  %v936_v30 = vor.u32 %v998_v22, %v933_v23  ;;  %v997_v31 = vld [vmem:[%s1180_s26 + $0xa4] sm:$0xf0]  ;;  %v980_v32 = vld [vmem:[%s1180_s26 + $0x24] sm:$0xf]  ;;  %v860_v36 = vor.u32 %v981_v28, %v859_v27 }
  0x48   : > { %525 = vmatpush.bf16.msra.mxu0 %v876_v12  ;;  %v861_v33 = vld [vmem:[%s1180_s26 + $0x28] sm:$0xf0]  ;;  %v996_v34 = vld [vmem:[%s1180_s26 + $0xa4] sm:$0xf]  ;;  %v924_v37 = vor.u32 %v997_v31, %v923_v29  ;;  %v851_v39 = vld [vmem:[%s1180_s26 + $0x10] sm:$0xf] }
  0x49   : > { %544 = vmatpush.bf16.msra.mxu1 %v940_v13  ;;  %563 = vmatpush.bf16.msra.mxu2 %v880_v14  ;;  %v925_v35 = vld [vmem:[%s1180_s26 + $0xa8] sm:$0xf0]  ;;  %v864_v38 = vor.u32 %v980_v32, %v861_v33  ;;  %v979_v40 = vld [vmem:[%s1180_s26 + $0x14] sm:$0xf0]  ;;  %v915_v41 = vld [vmem:[%s1180_s26 + $0x90] sm:$0xf] }
  0x4a   : > { %582 = vmatpush.bf16.msra.mxu3 %v944_v18  ;;  %v928_v42 = vor.u32 %v996_v34, %v925_v35  ;;  %v995_v43 = vld [vmem:[%s1180_s26 + $0x94] sm:$0xf0]  ;;  %v978_v44 = vld [vmem:[%s1180_s26 + $0x14] sm:$0xf]  ;;  %v853_v45 = vld [vmem:[%s1180_s26 + $0x18] sm:$0xf0]  ;;  %v852_v48 = vor.u32 %v979_v40, %v851_v39 }
  0x4b   : > { %v994_v46 = vld [vmem:[%s1180_s26 + $0x94] sm:$0xf]  ;;  %v917_v47 = vld [vmem:[%s1180_s26 + $0x98] sm:$0xf0]  ;;  %v916_v49 = vor.u32 %v995_v43, %v915_v41  ;;  %v856_v50 = vor.u32 %v978_v44, %v853_v45  ;;  %v843_v51 = vld [vmem:[%s1180_s26] sm:$0xf] }
  0x4c   : > { %526 = vmatpush.bf16.msra.mxu0 %v868_v24  ;;  %v977_v52 = vld [vmem:[%s1180_s26 + $0x4] sm:$0xf0]  ;;  %v907_v53 = vld [vmem:[%s1180_s26 + $0x80] sm:$0xf]  ;;  %v920_v54 = vor.u32 %v994_v46, %v917_v47  ;;  %v976_v56 = vld [vmem:[%s1180_s26 + $0x4] sm:$0xf] }
  0x4d   : > { %545 = vmatpush.bf16.msra.mxu1 %v932_v25  ;;  %564 = vmatpush.bf16.msra.mxu2 %v872_v26  ;;  %v993_v55 = vld [vmem:[%s1180_s26 + $0x84] sm:$0xf0]  ;;  %v845_v57 = vld [vmem:[%s1180_s26 + $0x8] sm:$0xf0]  ;;  %v992_v58 = vld [vmem:[%s1180_s26 + $0x84] sm:$0xf]  ;;  %v844_v60 = vor.u32 %v977_v52, %v843_v51 }
  0x4e   : > { %583 = vmatpush.bf16.msra.mxu3 %v936_v30  ;;  %v909_v59 = vld [vmem:[%s1180_s26 + $0x88] sm:$0xf0]  ;;  %v827_v61 = vld [vmem:[%s1333_s0] sm:$0xf]  ;;  %v973_v62 = vld [vmem:[%s1333_s0 + $0x4] sm:$0xf0]  ;;  %v908_v63 = vor.u32 %v993_v55, %v907_v53  ;;  %v848_v0 = vor.u32 %v976_v56, %v845_v57 }
  0x4f   : > { %v972_v1 = vld [vmem:[%s1333_s0 + $0x4] sm:$0xf]  ;;  %v829_v2 = vld [vmem:[%s1333_s0 + $0x8] sm:$0xf0]  ;;  %v912_v3 = vor.u32 %v992_v58, %v909_v59  ;;  %v828_v4 = vor.u32 %v973_v62, %v827_v61  ;;  %v835_v6 = vld [vmem:[%s1333_s0 + $0x10] sm:$0xf] }
  0x50   : > { %527 = vmatpush.bf16.msra.mxu0 %v860_v36  ;;  %v832_v5 = vor.u32 %v972_v1, %v829_v2  ;;  %v975_v7 = vld [vmem:[%s1333_s0 + $0x14] sm:$0xf0]  ;;  %v974_v8 = vld [vmem:[%s1333_s0 + $0x14] sm:$0xf]  ;;  %v837_v9 = vld [vmem:[%s1333_s0 + $0x18] sm:$0xf0] }
  0x51   : > { %546 = vmatpush.bf16.msra.mxu1 %v924_v37  ;;  %565 = vmatpush.bf16.msra.mxu2 %v864_v38  ;;  %v836_v10 = vor.u32 %v975_v7, %v835_v6  ;;  %v840_v11 = vor.u32 %v974_v8, %v837_v9  ;;  %s1340_s20 = smov (!%p301_p8, %s823_s20), 7  ;;  %vm734_vm6 = vcmask 1041408   ;;  %vm742_vm7 = vcmask 1041409  }
  0x52   : > { %584 = vmatpush.bf16.msra.mxu3 %v928_v42  ;;  %s824_s11 = sshll.u32 %s1340_s20, 1  ;;  %vm744_vm8 = vcmask 1043459   ;;  %vm746_vm9 = vcmask 1045509   ;;  %vm748_vm10 = vcmask 1047559  }
  0x53   : > { %s304_s22 = scalar_lea.vmem %s1335_s2, %s824_s11 }
  0x54   : > { %528 = vmatpush.bf16.msra.mxu0 %v852_v48 }
  0x55   : > { %547 = vmatpush.bf16.msra.mxu1 %v916_v49  ;;  %566 = vmatpush.bf16.msra.mxu2 %v856_v50 }
  0x56   : > { %585 = vmatpush.bf16.msra.mxu3 %v920_v54 }
  0x58   : > { %529 = vmatpush.bf16.msra.mxu0 %v844_v60 }
  0x59   : > { %548 = vmatpush.bf16.msra.mxu1 %v908_v63  ;;  %567 = vmatpush.bf16.msra.mxu2 %v848_v0 }
  0x5a   : > { %586 = vmatpush.bf16.msra.mxu3 %v912_v3 }
  0x5b   : > { %530 = vmatmul.bf16.vlgmr.msra.gmra.mxu0 %v828_v4 }
  0x5c   : > { %549 = vmatmul.bf16.vlgmr.msra.gmra.mxu1 %v832_v5  ;;  %568 = vmatmul.bf16.vlgmr.msra.gmra.mxu2 %v828_v4 }
  0x5d   : > { %587 = vmatmul.bf16.vlgmr.msra.gmra.mxu3 %v832_v5 }
  0x6b   : > { %535 = vmatmul.bf16.gmra.mxu0 %v836_v10 }
  0x6c   : > { %554 = vmatmul.bf16.gmra.mxu1 %v840_v11  ;;  %573 = vmatmul.bf16.gmra.mxu2 %v836_v10 }
  0x6d   : > { %592 = vmatmul.bf16.gmra.mxu3 %v840_v11 }
  0xd8   : > { %v531_v12 = vpop.f32.mrf.mxu0 }
  0xd9   : > { %v550_v13 = vpop.f32.mrf.mxu1 }
  0xda   : > { %v1270_v22 = vadd.f32 %v550_v13, %v531_v12 }
  0xdc   : > { %v618_v25 = vmul.f32 %v1270_v22, %v1270_v22 }
  0xdf   : > { %v569_v14 = vpop.f32.mrf.mxu2 }
  0xe0   : > { %v588_v15 = vpop.f32.mrf.mxu3  ;;  %v533_v16 = vpop.f32.mrf.mxu0 }
  0xe1   : > { %v552_v17 = vpop.f32.mrf.mxu1  ;;  %v1289_v37 = vadd.f32 %v588_v15, %v569_v14 }
  0xe2   : > { %v1272_v23 = vadd.f32 %v552_v17, %v533_v16 }
  0xe3   : > { %v619_v45 = vmul.f32 %v1289_v37, %v1289_v37 }
  0xe4   : > { %v620_v26 = vmul.f32 %v1272_v23, %v1272_v23  ;;  %v598_v28 = vadd.f32 %v1272_v23, %v1270_v22 }
  0xe6   : > { %v626_v34 = vadd.f32 %v620_v26, %v618_v25 }
  0xe7   : > { %v571_v18 = vpop.f32.mrf.mxu2 }
  0xe8   : > { %v590_v19 = vpop.f32.mrf.mxu3  ;;  %v536_v20 = vpop.f32.mrf.mxu0 }
  0xe9   : > { %v555_v21 = vpop.f32.mrf.mxu1  ;;  %v1284_v32 = vadd.f32 %v590_v19, %v571_v18 }
  0xea   : > { %v1274_v24 = vadd.f32 %v555_v21, %v536_v20 }
  0xeb   : > { %v621_v42 = vmul.f32 %v1284_v32, %v1284_v32  ;;  %v607_v46 = vadd.f32 %v1284_v32, %v1289_v37 }
  0xec   : > { %v622_v29 = vmul.f32 %v1274_v24, %v1274_v24  ;;  %v599_v35 = vadd.f32 %v598_v28, %v1274_v24 }
  0xed   : > { %v635_v52 = vadd.f32 %v621_v42, %v619_v45 }
  0xee   : > { %v627_v39 = vadd.f32 %v626_v34, %v622_v29 }
  0xef   : > { %v574_v27 = vpop.f32.mrf.mxu2 }
  0xf0   : > { %v593_v30 = vpop.f32.mrf.mxu3  ;;  %v538_v31 = vpop.f32.mrf.mxu0 }
  0xf1   : > { %v557_v33 = vpop.f32.mrf.mxu1  ;;  %v1291_v38 = vadd.f32 %v593_v30, %v574_v27 }
  0xf2   : > { %v1287_v36 = vadd.f32 %v557_v33, %v538_v31 }
  0xf3   : > { %v623_v47 = vmul.f32 %v1291_v38, %v1291_v38  ;;  %v608_v53 = vadd.f32 %v607_v46, %v1291_v38 }
  0xf4   : > { %v600_v40 = vadd.f32 %v599_v35, %v1287_v36  ;;  %v624_v41 = vmul.f32 %v1287_v36, %v1287_v36 }
  0xf5   : > { %v636_v57 = vadd.f32 %v635_v52, %v623_v47 }
  0xf6   : > { %v601_v43 = vrot.slane %v600_v40, 4  ;;  %v628_v44 = vadd.f32 %v627_v39, %v624_v41 }
  0xf7   : > { %v576_v48 = vpop.f32.mrf.mxu2 }
  0xf8   : > { %v602_v49 = vadd.f32 %v601_v43, %v600_v40  ;;  %v629_v50 = vrot.slane %v628_v44, 4  ;;  %v595_v51 = vpop.f32.mrf.mxu3 }
  0xf9   : > { %v1305_v54 = vadd.f32 %v595_v51, %v576_v48 }
  0xfa   : > { %v603_v55 = vrot.slane %v602_v49, 2  ;;  %v630_v56 = vadd.f32 %v629_v50, %v628_v44 }
  0xfb   : > { %v609_v58 = vadd.f32 %v608_v53, %v1305_v54  ;;  %v625_v59 = vmul.f32 %v1305_v54, %v1305_v54 }
  0xfc   : > { %v604_v60 = vadd.f32 %v603_v55, %v602_v49  ;;  %v631_v61 = vrot.slane %v630_v56, 2 }
  0xfd   : > { %v610_v62 = vrot.slane %v609_v58, 4  ;;  %v637_v63 = vadd.f32 %v636_v57, %v625_v59 }
  0xfe   : > { %v605_v0 = vrot.slane %v604_v60, 1  ;;  %v632_v1 = vadd.f32 %v631_v61, %v630_v56 }
  0xff   : > { %v611_v2 = vadd.f32 %v610_v62, %v609_v58  ;;  %v638_v3 = vrot.slane %v637_v63, 4 }
 0x100   : > { %v606_v4 = vadd.f32 %v605_v0, %v604_v60  ;;  %v633_v5 = vrot.slane %v632_v1, 1 }
 0x101   : > { %v612_v6 = vrot.slane %v611_v2, 2  ;;  %v639_v7 = vadd.f32 %v638_v3, %v637_v63 }
 0x102   : > { %v616_v8 = vmul.f32 0.03125, %v606_v4  ;;  %v634_v9 = vadd.f32 %v633_v5, %v632_v1 }
 0x103   : > { %v613_v10 = vadd.f32 %v612_v6, %v611_v2  ;;  %v640_v11 = vrot.slane %v639_v7, 2 }
 0x104   : > { %v644_v12 = vmul.f32 0.03125, %v634_v9  ;;  %v646_v13 = vmul.f32 %v616_v8, %v616_v8  ;;  %v650_v40 = vsub.f32 %v1270_v22, %v616_v8  ;;  %v652_v42 = vsub.f32 %v1272_v23, %v616_v8 }
 0x105   : > { %v614_v14 = vrot.slane %v613_v10, 1  ;;  %v641_v15 = vadd.f32 %v640_v11, %v639_v7  ;;  %v654_v43 = vsub.f32 %v1274_v24, %v616_v8  ;;  %v656_v44 = vsub.f32 %v1287_v36, %v616_v8 }
 0x106   : > { %v648_v16 = vsub.f32 %v644_v12, %v646_v13 }
 0x107   : > { %v615_v17 = vadd.f32 %v614_v14, %v613_v10  ;;  %v642_v18 = vrot.slane %v641_v15, 1 }
 0x108   : > { %v658_v19 = vadd.f32 1e-05, %v648_v16 }
 0x109   : > { %v617_v20 = vmul.f32 0.03125, %v615_v17  ;;  %v643_v21 = vadd.f32 %v642_v18, %v641_v15 }
 0x10a   : > { %1032 = vrsqrt.f32 %v658_v19  ;;  %vm666_vm1 = vweird.f32 %v658_v19 }
 0x10b   : > { %v645_v25 = vmul.f32 0.03125, %v643_v21  ;;  %v647_v26 = vmul.f32 %v617_v20, %v617_v20  ;;  %v651_v36 = vsub.f32 %v1289_v37, %v617_v20  ;;  %v653_v59 = vsub.f32 %v1284_v32, %v617_v20 }
 0x10c   : > { %v655_v61 = vsub.f32 %v1291_v38, %v617_v20  ;;  %v657_v62 = vsub.f32 %v1305_v54, %v617_v20 }
 0x10d   : > { %v649_v27 = vsub.f32 %v645_v25, %v647_v26 }
 0x10f   : > { %v659_v28 = vadd.f32 1e-05, %v649_v27 }
 0x110   : > { %v1033_v29 = vpop.eup %1032 }
 0x111   : > { %v661_v30 = vmul.f32 %v1033_v29, %v658_v19  ;;  %1034 = vrsqrt.f32 %v659_v28  ;;  %vm667_vm0 = vweird.f32 %v1033_v29  ;;  %vm676_vm4 = vweird.f32 %v659_v28 }
 0x112   : > { %vm668_vm2 = vmor %vm666_vm1, %vm667_vm0 }
 0x113   : > { %v662_v31 = vmul.f32 %v1033_v29, %v661_v30 }
 0x115   : > { %v663_v33 = vmul.f32 0.5, %v662_v31 }
 0x117   : > { %v1035_v34 = vpop.eup %1034  ;;  %v664_v35 = vsub.f32 1.5, %v663_v33 }
 0x118   : > { %v671_v39 = vmul.f32 %v1035_v34, %v659_v28  ;;  %vm677_vm3 = vweird.f32 %v1035_v34 }
 0x119   : > { %v665_v41 = vmul.f32 %v1033_v29, %v664_v35  ;;  %vm678_vm5 = vmor %vm676_vm4, %vm677_vm3 }
 0x11a   : > { %v672_v45 = vmul.f32 %v1035_v34, %v671_v39 }
 0x11b   : > { %v669_v46 = vsel %vm668_vm2, %v1033_v29, %v665_v41 }
 0x11c   : > { %v680_v47 = vmul.f32 %v669_v46, %v650_v40  ;;  %v682_v48 = vmul.f32 %v669_v46, %v652_v42  ;;  %v684_v49 = vmul.f32 %v669_v46, %v654_v43  ;;  %v686_v50 = vmul.f32 %v669_v46, %v656_v44 }
 0x11d   : > { %v673_v51 = vmul.f32 0.5, %v672_v45 }
 0x11e   : > { %v688_v52 = vmax.f32 %v680_v47, 0.0  ;;  %v690_v53 = vmax.f32 %v682_v48, 0.0  ;;  %v692_v55 = vmax.f32 %v684_v49, 0.0  ;;  %v694_v22 = vmax.f32 %v686_v50, 0.0 }
 0x11f   : > { %v674_v56 = vsub.f32 1.5, %v673_v51 }
 0x120   : > { %v696_v57 = vadd.f32 %v690_v53, %v688_v52  ;;  %v710_v23 = vadd.f32 %v694_v22, %v692_v55 }
 0x121   : > { %v675_v58 = vmul.f32 %v1035_v34, %v674_v56 }
 0x122   : > { %v711_v24 = vrot.slane %v710_v23, 4  ;;  %v697_v60 = vrot.slane %v696_v57, 4 }
 0x123   : > { %v679_v63 = vsel %vm678_vm5, %v1035_v34, %v675_v58 }
 0x124   : > { %v681_v0 = vmul.f32 %v679_v63, %v651_v36  ;;  %v683_v1 = vmul.f32 %v679_v63, %v653_v59  ;;  %v712_v2 = vadd.f32 %v711_v24, %v710_v23  ;;  %v685_v3 = vmul.f32 %v679_v63, %v655_v61 }
 0x125   : > { %v687_v4 = vmul.f32 %v679_v63, %v657_v62  ;;  %v698_v7 = vadd.f32 %v697_v60, %v696_v57 }
 0x126   : > { %v689_v5 = vmax.f32 %v681_v0, 0.0  ;;  %v691_v6 = vmax.f32 %v683_v1, 0.0  ;;  %v693_v8 = vmax.f32 %v685_v3, 0.0  ;;  %v713_v32 = vrot.slane %v712_v2, 2 }
 0x127   : > { %v695_v37 = vmax.f32 %v687_v4, 0.0  ;;  %v699_v12 = vrot.slane %v698_v7, 2 }
 0x128   : > { %v703_v9 = vadd.f32 %v691_v6, %v689_v5  ;;  %v714_v54 = vadd.f32 %v713_v32, %v712_v2 }
 0x129   : > { %v717_v10 = vadd.f32 %v695_v37, %v693_v8  ;;  %v700_v16 = vadd.f32 %v699_v12, %v698_v7 }
 0x12a   : > { %v704_v11 = vrot.slane %v703_v9, 4  ;;  %v715_v19 = vrot.slane %v714_v54, 1 }
 0x12b   : > { %v718_v38 = vrot.slane %v717_v10, 4  ;;  %v701_v25 = vrot.slane %v700_v16, 1 }
 0x12c   : > { %v705_v13 = vadd.f32 %v704_v11, %v703_v9  ;;  %v716_v28 = vadd.f32 %v715_v19, %v714_v54 }
 0x12d   : > { %v719_v14 = vadd.f32 %v718_v38, %v717_v10  ;;  %v702_v31 = vadd.f32 %v701_v25, %v700_v16 }
 0x12e   : > { %v706_v15 = vrot.slane %v705_v13, 2  ;;  %v726_v34 = vmul.f32 0.0625, %v716_v28 }
 0x12f   : > { %v720_v17 = vrot.slane %v719_v14, 2  ;;  %v724_v40 = vmul.f32 0.0625, %v702_v31 }
 0x130   : > { %v707_v18 = vadd.f32 %v706_v15, %v705_v13 }
 0x131   : > { %v721_v20 = vadd.f32 %v720_v17, %v719_v14 }
 0x132   : > { %v708_v21 = vrot.slane %v707_v18, 1 }
 0x133   : > { %v722_v26 = vrot.slane %v721_v20, 1 }
 0x134   : > { %v709_v27 = vadd.f32 %v708_v21, %v707_v18 }
 0x135   : > { %v723_v29 = vadd.f32 %v722_v26, %v721_v20 }
 0x136   : > { %v725_v30 = vmul.f32 0.0625, %v709_v27 }
 0x137   : > { %v727_v33 = vmul.f32 0.0625, %v723_v29 }
 0x138   : > { %v732_v35 = vrot.slane %v725_v30, 6 }
 0x139   : > { %v733_v39 = vrot.slane %v727_v33, 6 }
 0x13a   : > { %v735_v43 = vsel %vm734_vm6, %v724_v40, %v732_v35 }
 0x13b   : > { %v736_v41 = vsel %vm734_vm6, %v726_v34, %v733_v39 }
 0x13c   : > { %v741_v42 = vrot.slane %v736_v41, 7 }
 0x13e   : > { %v743_v44 = vsel %vm742_vm7, %v741_v42, %v735_v43 }
 0x13f   : > { %v745_v45 = vsel %vm744_vm8, %v741_v42, %v743_v44 }
 0x140   : > { %v747_v46 = vsel %vm746_vm9, %v741_v42, %v745_v45 }
 0x141   : > { %v749_v47 = vsel %vm748_vm10, %v741_v42, %v747_v46 }
 0x142   : > { %751 = vst [vmem:[%s304_s22] sm:$0xf] %v749_v47 }
 0x143 PF: > { %p9_p9 = scmp.ge.s32.totalorder %s1092_s13, 6   ;;  %s1336_s9 = smov %s1054_s10 }
 0x144   : > { %s1337_s10 = smov %s1101_s16  ;;  %s1338_s11 = smov %s1092_s13 }
 0x145   :  { %11 = sbr.rel (!%p9_p9) target bundleno = 2 (0x2), region = 101 }

// kernel: _lambda_.23
= control target key start
LH: loop header
LB: loop body
LE: loop exit
PB: predicated region body
PF: predicated region fallthrough
CT: control target
= control target key end

     0   :  { %s792_s0 = inlined_call_operand.vmem [shape: f32[2,1024], index: 0, kind: input, shape index: {}]   ;;  %s793_s1 = inlined_call_operand.vmem [shape: f32[1024,128], index: 1, kind: input, shape index: {}]   ;;  %s794_s2 = inlined_call_operand.vmem [shape: f32[1,128], index: 2, kind: input, shape index: {}]   ;;  %s795_s3 = inlined_call_operand.hbm [shape: f32[2,128], index: 3, kind: output, shape index: {}]  }
   0x1   :  { %v64_v0 = vld [vmem:[%s793_s1 + $0x178] sm:$0xff]  ;;  %v63_v2 = vld [vmem:[%s793_s1 + $0x170] sm:$0xff]  ;;  %v62_v6 = vld [vmem:[%s793_s1 + $0x168] sm:$0xff] }
   0x2   :  { %v32_v1 = vld [vmem:[%s793_s1 + $0x78] sm:$0xff]  ;;  %210 = vmatpush.msra.mxu2 %v64_v0  ;;  %v31_v4 = vld [vmem:[%s793_s1 + $0x70] sm:$0xff]  ;;  %v30_v8 = vld [vmem:[%s793_s1 + $0x68] sm:$0xff] }
   0x3   :  { %170 = vmatpush.msra.mxu0 %v32_v1  ;;  %v80_v3 = vld [vmem:[%s793_s1 + $0x1f8] sm:$0xff]  ;;  %v79_v7 = vld [vmem:[%s793_s1 + $0x1f0] sm:$0xff]  ;;  %v78_v10 = vld [vmem:[%s793_s1 + $0x1e8] sm:$0xff] }
   0x4   :  { %v48_v5 = vld [vmem:[%s793_s1 + $0xf8] sm:$0xff]  ;;  %230 = vmatpush.msra.mxu3 %v80_v3  ;;  %211 = vmatpush.msra.mxu2 %v63_v2  ;;  %v47_v9 = vld [vmem:[%s793_s1 + $0xf0] sm:$0xff]  ;;  %v61_v11 = vld [vmem:[%s793_s1 + $0x160] sm:$0xff] }
   0x5   :  { %190 = vmatpush.msra.mxu1 %v48_v5  ;;  %171 = vmatpush.msra.mxu0 %v31_v4  ;;  %v29_v12 = vld [vmem:[%s793_s1 + $0x60] sm:$0xff]  ;;  %v46_v13 = vld [vmem:[%s793_s1 + $0xe8] sm:$0xff]  ;;  %v60_v16 = vld [vmem:[%s793_s1 + $0x158] sm:$0xff] }
   0x6   :  { %231 = vmatpush.msra.mxu3 %v79_v7  ;;  %212 = vmatpush.msra.mxu2 %v62_v6  ;;  %v77_v14 = vld [vmem:[%s793_s1 + $0x1e0] sm:$0xff]  ;;  %v28_v17 = vld [vmem:[%s793_s1 + $0x58] sm:$0xff]  ;;  %v59_v20 = vld [vmem:[%s793_s1 + $0x150] sm:$0xff] }
   0x7   :  { %191 = vmatpush.msra.mxu1 %v47_v9  ;;  %172 = vmatpush.msra.mxu0 %v30_v8  ;;  %v45_v15 = vld [vmem:[%s793_s1 + $0xe0] sm:$0xff]  ;;  %v76_v18 = vld [vmem:[%s793_s1 + $0x1d8] sm:$0xff]  ;;  %v27_v21 = vld [vmem:[%s793_s1 + $0x50] sm:$0xff] }
   0x8   :  { %232 = vmatpush.msra.mxu3 %v78_v10  ;;  %213 = vmatpush.msra.mxu2 %v61_v11  ;;  %v44_v19 = vld [vmem:[%s793_s1 + $0xd8] sm:$0xff]  ;;  %v75_v22 = vld [vmem:[%s793_s1 + $0x1d0] sm:$0xff]  ;;  %v58_v24 = vld [vmem:[%s793_s1 + $0x148] sm:$0xff] }
   0x9   :  { %192 = vmatpush.msra.mxu1 %v46_v13  ;;  %173 = vmatpush.msra.mxu0 %v29_v12  ;;  %v43_v23 = vld [vmem:[%s793_s1 + $0xd0] sm:$0xff]  ;;  %v26_v25 = vld [vmem:[%s793_s1 + $0x48] sm:$0xff]  ;;  %v57_v28 = vld [vmem:[%s793_s1 + $0x140] sm:$0xff] }
   0xa   :  { %233 = vmatpush.msra.mxu3 %v77_v14  ;;  %214 = vmatpush.msra.mxu2 %v60_v16  ;;  %v74_v26 = vld [vmem:[%s793_s1 + $0x1c8] sm:$0xff]  ;;  %v25_v29 = vld [vmem:[%s793_s1 + $0x40] sm:$0xff]  ;;  %v56_v32 = vld [vmem:[%s793_s1 + $0x138] sm:$0xff] }
   0xb   :  { %193 = vmatpush.msra.mxu1 %v45_v15  ;;  %174 = vmatpush.msra.mxu0 %v28_v17  ;;  %v42_v27 = vld [vmem:[%s793_s1 + $0xc8] sm:$0xff]  ;;  %v73_v30 = vld [vmem:[%s793_s1 + $0x1c0] sm:$0xff]  ;;  %v24_v33 = vld [vmem:[%s793_s1 + $0x38] sm:$0xff] }
   0xc   :  { %234 = vmatpush.msra.mxu3 %v76_v18  ;;  %215 = vmatpush.msra.mxu2 %v59_v20  ;;  %v41_v31 = vld [vmem:[%s793_s1 + $0xc0] sm:$0xff]  ;;  %v72_v34 = vld [vmem:[%s793_s1 + $0x1b8] sm:$0xff]  ;;  %v55_v36 = vld [vmem:[%s793_s1 + $0x130] sm:$0xff] }
   0xd   :  { %194 = vmatpush.msra.mxu1 %v44_v19  ;;  %175 = vmatpush.msra.mxu0 %v27_v21  ;;  %v40_v35 = vld [vmem:[%s793_s1 + $0xb8] sm:$0xff]  ;;  %v23_v37 = vld [vmem:[%s793_s1 + $0x30] sm:$0xff]  ;;  %v54_v40 = vld [vmem:[%s793_s1 + $0x128] sm:$0xff] }
   0xe   :  { %235 = vmatpush.msra.mxu3 %v75_v22  ;;  %216 = vmatpush.msra.mxu2 %v58_v24  ;;  %v71_v38 = vld [vmem:[%s793_s1 + $0x1b0] sm:$0xff]  ;;  %v22_v41 = vld [vmem:[%s793_s1 + $0x28] sm:$0xff]  ;;  %v53_v44 = vld [vmem:[%s793_s1 + $0x120] sm:$0xff] }
   0xf   :  { %195 = vmatpush.msra.mxu1 %v43_v23  ;;  %176 = vmatpush.msra.mxu0 %v26_v25  ;;  %v39_v39 = vld [vmem:[%s793_s1 + $0xb0] sm:$0xff]  ;;  %v70_v42 = vld [vmem:[%s793_s1 + $0x1a8] sm:$0xff]  ;;  %v21_v45 = vld [vmem:[%s793_s1 + $0x20] sm:$0xff] }
  0x10   :  { %236 = vmatpush.msra.mxu3 %v74_v26  ;;  %217 = vmatpush.msra.mxu2 %v57_v28  ;;  %v38_v43 = vld [vmem:[%s793_s1 + $0xa8] sm:$0xff]  ;;  %v69_v46 = vld [vmem:[%s793_s1 + $0x1a0] sm:$0xff]  ;;  %v52_v48 = vld [vmem:[%s793_s1 + $0x118] sm:$0xff] }
  0x11   :  { %196 = vmatpush.msra.mxu1 %v42_v27  ;;  %177 = vmatpush.msra.mxu0 %v25_v29  ;;  %v37_v47 = vld [vmem:[%s793_s1 + $0xa0] sm:$0xff]  ;;  %v20_v49 = vld [vmem:[%s793_s1 + $0x18] sm:$0xff]  ;;  %v51_v52 = vld [vmem:[%s793_s1 + $0x110] sm:$0xff] }
  0x12   :  { %237 = vmatpush.msra.mxu3 %v73_v30  ;;  %218 = vmatpush.msra.mxu2 %v56_v32  ;;  %v68_v50 = vld [vmem:[%s793_s1 + $0x198] sm:$0xff]  ;;  %v19_v53 = vld [vmem:[%s793_s1 + $0x10] sm:$0xff]  ;;  %v50_v56 = vld [vmem:[%s793_s1 + $0x108] sm:$0xff] }
  0x13   :  { %197 = vmatpush.msra.mxu1 %v41_v31  ;;  %178 = vmatpush.msra.mxu0 %v24_v33  ;;  %v36_v51 = vld [vmem:[%s793_s1 + $0x98] sm:$0xff]  ;;  %v67_v54 = vld [vmem:[%s793_s1 + $0x190] sm:$0xff]  ;;  %v18_v57 = vld [vmem:[%s793_s1 + $0x8] sm:$0xff] }
  0x14   :  { %238 = vmatpush.msra.mxu3 %v72_v34  ;;  %219 = vmatpush.msra.mxu2 %v55_v36  ;;  %v35_v55 = vld [vmem:[%s793_s1 + $0x90] sm:$0xff]  ;;  %v66_v58 = vld [vmem:[%s793_s1 + $0x188] sm:$0xff]  ;;  %v49_v60 = vld [vmem:[%s793_s1 + $0x100] sm:$0xff] }
  0x15   :  { %198 = vmatpush.msra.mxu1 %v40_v35  ;;  %179 = vmatpush.msra.mxu0 %v23_v37  ;;  %v34_v59 = vld [vmem:[%s793_s1 + $0x88] sm:$0xff]  ;;  %v17_v61 = vld [vmem:[%s793_s1] sm:$0xff]  ;;  %v128_v62 = vld [vmem:[%s793_s1 + $0x378] sm:$0xff] }
  0x16   :  { %239 = vmatpush.msra.mxu3 %v71_v38  ;;  %220 = vmatpush.msra.mxu2 %v54_v40  ;;  %v65_v63 = vld [vmem:[%s793_s1 + $0x180] sm:$0xff]  ;;  %v96_v0 = vld [vmem:[%s793_s1 + $0x278] sm:$0xff]  ;;  %v127_v2 = vld [vmem:[%s793_s1 + $0x370] sm:$0xff] }
  0x17   :  { %199 = vmatpush.msra.mxu1 %v39_v39  ;;  %180 = vmatpush.msra.mxu0 %v22_v41  ;;  %v144_v1 = vld [vmem:[%s793_s1 + $0x3f8] sm:$0xff]  ;;  %v33_v3 = vld [vmem:[%s793_s1 + $0x80] sm:$0xff]  ;;  %v95_v4 = vld [vmem:[%s793_s1 + $0x270] sm:$0xff] }
  0x18   :  { %240 = vmatpush.msra.mxu3 %v70_v42  ;;  %221 = vmatpush.msra.mxu2 %v53_v44  ;;  %v112_v5 = vld [vmem:[%s793_s1 + $0x2f8] sm:$0xff]  ;;  %v126_v6 = vld [vmem:[%s793_s1 + $0x368] sm:$0xff]  ;;  %v143_v7 = vld [vmem:[%s793_s1 + $0x3f0] sm:$0xff] }
  0x19   :  { %200 = vmatpush.msra.mxu1 %v38_v43  ;;  %181 = vmatpush.msra.mxu0 %v21_v45  ;;  %v94_v8 = vld [vmem:[%s793_s1 + $0x268] sm:$0xff]  ;;  %v111_v9 = vld [vmem:[%s793_s1 + $0x2f0] sm:$0xff]  ;;  %v125_v10 = vld [vmem:[%s793_s1 + $0x360] sm:$0xff] }
  0x1a   :  { %241 = vmatpush.msra.mxu3 %v69_v46  ;;  %222 = vmatpush.msra.mxu2 %v52_v48  ;;  %v142_v11 = vld [vmem:[%s793_s1 + $0x3e8] sm:$0xff]  ;;  %v93_v12 = vld [vmem:[%s793_s1 + $0x260] sm:$0xff]  ;;  %v124_v15 = vld [vmem:[%s793_s1 + $0x358] sm:$0xff] }
  0x1b   :  { %201 = vmatpush.msra.mxu1 %v37_v47  ;;  %182 = vmatpush.msra.mxu0 %v20_v49  ;;  %v110_v13 = vld [vmem:[%s793_s1 + $0x2e8] sm:$0xff]  ;;  %v15_v14 = vld [vmem:[%s792_s0] sm:$0xff]  ;;  %v92_v17 = vld [vmem:[%s793_s1 + $0x258] sm:$0xff] }
  0x1c   :  { %242 = vmatpush.msra.mxu3 %v68_v50  ;;  %223 = vmatpush.msra.mxu2 %v51_v52  ;;  %v141_v16 = vld [vmem:[%s793_s1 + $0x3e0] sm:$0xff]  ;;  %151 = vst [vmem:[#allocation1] ss:$4 sm:$0xff] %v15_v14  ;;  %v123_v19 = vld [vmem:[%s793_s1 + $0x350] sm:$0xff]  ;;  %v140_v20 = vld [vmem:[%s793_s1 + $0x3d8] sm:$0xff] }
  0x1d   :  { %202 = vmatpush.msra.mxu1 %v36_v51  ;;  %183 = vmatpush.msra.mxu0 %v19_v53  ;;  %v109_v18 = vld [vmem:[%s793_s1 + $0x2e0] sm:$0xff]  ;;  %v91_v21 = vld [vmem:[%s793_s1 + $0x250] sm:$0xff]  ;;  %v108_v22 = vld [vmem:[%s793_s1 + $0x2d8] sm:$0xff] }
  0x1e   :  { %243 = vmatpush.msra.mxu3 %v67_v54  ;;  %224 = vmatpush.msra.mxu2 %v50_v56  ;;  %v122_v23 = vld [vmem:[%s793_s1 + $0x348] sm:$0xff]  ;;  %v139_v24 = vld [vmem:[%s793_s1 + $0x3d0] sm:$0xff]  ;;  %v121_v28 = vld [vmem:[%s793_s1 + $0x340] sm:$0xff] }
  0x1f   :  { %203 = vmatpush.msra.mxu1 %v35_v55  ;;  %184 = vmatpush.msra.mxu0 %v18_v57  ;;  %v16_v25 = vld [vmem:[%s792_s0 + $0x8] sm:$0xff]  ;;  %v107_v27 = vld [vmem:[%s793_s1 + $0x2d0] sm:$0xff]  ;;  %v89_v30 = vld [vmem:[%s793_s1 + $0x240] sm:$0xff] }
  0x20   :  { %244 = vmatpush.msra.mxu3 %v66_v58  ;;  %225 = vmatpush.msra.mxu2 %v49_v60  ;;  %v90_v26 = vld [vmem:[%s793_s1 + $0x248] sm:$0xff]  ;;  %153 = vst [vmem:[#allocation1 + $0x20] ss:$4 sm:$0xff] %v16_v25  ;;  %v120_v32 = vld [vmem:[%s793_s1 + $0x338] sm:$0xff]  ;;  %v137_v33 = vld [vmem:[%s793_s1 + $0x3c0] sm:$0xff] }
  0x21   :  { %204 = vmatpush.msra.mxu1 %v34_v59  ;;  %185 = vmatpush.msra.mxu0 %v17_v61  ;;  %v138_v29 = vld [vmem:[%s793_s1 + $0x3c8] sm:$0xff]  ;;  %v88_v34 = vld [vmem:[%s793_s1 + $0x238] sm:$0xff]  ;;  %v105_v35 = vld [vmem:[%s793_s1 + $0x2c0] sm:$0xff] }
  0x22   :  { %290 = vmatpush.msrb.mxu2 %v128_v62  ;;  %245 = vmatpush.msra.mxu3 %v65_v63  ;;  %v106_v31 = vld [vmem:[%s793_s1 + $0x2c8] sm:$0xff] }
  0x23   :  { %250 = vmatpush.msrb.mxu0 %v96_v0  ;;  %205 = vmatpush.msra.mxu1 %v33_v3 }
  0x24   :  { %310 = vmatpush.msrb.mxu3 %v144_v1  ;;  %291 = vmatpush.msrb.mxu2 %v127_v2 }
  0x25   :  { %251 = vmatpush.msrb.mxu0 %v95_v4  ;;  %270 = vmatpush.msrb.mxu1 %v112_v5 }
  0x26   :  { %292 = vmatpush.msrb.mxu2 %v126_v6  ;;  %311 = vmatpush.msrb.mxu3 %v143_v7 }
  0x27   :  { %252 = vmatpush.msrb.mxu0 %v94_v8  ;;  %271 = vmatpush.msrb.mxu1 %v111_v9 }
  0x28   :  { %293 = vmatpush.msrb.mxu2 %v125_v10  ;;  %312 = vmatpush.msrb.mxu3 %v142_v11 }
  0x29   :  { %253 = vmatpush.msrb.mxu0 %v93_v12  ;;  %272 = vmatpush.msrb.mxu1 %v110_v13 }
  0x2a   :  { %294 = vmatpush.msrb.mxu2 %v124_v15  ;;  %313 = vmatpush.msrb.mxu3 %v141_v16 }
  0x2b   :  { %254 = vmatpush.msrb.mxu0 %v92_v17  ;;  %273 = vmatpush.msrb.mxu1 %v109_v18 }
  0x2c   :  { %295 = vmatpush.msrb.mxu2 %v123_v19  ;;  %314 = vmatpush.msrb.mxu3 %v140_v20 }
  0x2d   :  { %255 = vmatpush.msrb.mxu0 %v91_v21  ;;  %274 = vmatpush.msrb.mxu1 %v108_v22 }
  0x2e   :  { %296 = vmatpush.msrb.mxu2 %v122_v23  ;;  %315 = vmatpush.msrb.mxu3 %v139_v24 }
  0x2f   :  { %256 = vmatpush.msrb.mxu0 %v90_v26  ;;  %275 = vmatpush.msrb.mxu1 %v107_v27 }
  0x30   :  { %297 = vmatpush.msrb.mxu2 %v121_v28  ;;  %316 = vmatpush.msrb.mxu3 %v138_v29 }
  0x31   :  { %8 = vsyncpa [#allocation3], 0  ;;  %257 = vmatpush.msrb.mxu0 %v89_v30  ;;  %276 = vmatpush.msrb.mxu1 %v106_v31  ;;  %v119_v36 = vld [vmem:[%s793_s1 + $0x330] sm:$0xff]  ;;  %v136_v37 = vld [vmem:[%s793_s1 + $0x3b8] sm:$0xff]  ;;  %s338_s4 = sshll.u32 %s795_s3, 4  ;;  %s339_s4 = int_to_ptr.hbm [resolvable:$true] %s338_s4 }
  0x32   :  { %298 = vmatpush.msrb.mxu2 %v120_v32  ;;  %317 = vmatpush.msrb.mxu3 %v137_v33  ;;  %v87_v38 = vld [vmem:[%s793_s1 + $0x230] sm:$0xff]  ;;  %v104_v39 = vld [vmem:[%s793_s1 + $0x2b8] sm:$0xff]  ;;  %v118_v40 = vld [vmem:[%s793_s1 + $0x328] sm:$0xff] }
  0x33   :  { %258 = vmatpush.msrb.mxu0 %v88_v34  ;;  %277 = vmatpush.msrb.mxu1 %v105_v35  ;;  %v135_v41 = vld [vmem:[%s793_s1 + $0x3b0] sm:$0xff]  ;;  %v86_v42 = vld [vmem:[%s793_s1 + $0x228] sm:$0xff]  ;;  %v117_v44 = vld [vmem:[%s793_s1 + $0x320] sm:$0xff] }
  0x34   :  { %299 = vmatpush.msrb.mxu2 %v119_v36  ;;  %318 = vmatpush.msrb.mxu3 %v136_v37  ;;  %v103_v43 = vld [vmem:[%s793_s1 + $0x2b0] sm:$0xff]  ;;  %v134_v45 = vld [vmem:[%s793_s1 + $0x3a8] sm:$0xff]  ;;  %v85_v47 = vld [vmem:[%s793_s1 + $0x220] sm:$0xff] }
  0x35   :  { %259 = vmatpush.msrb.mxu0 %v87_v38  ;;  %278 = vmatpush.msrb.mxu1 %v104_v39  ;;  %v156_v46 = vld.sshfl [vmem:[#allocation1 + $0x10] sm:$0xff pattern:$0x73625140]  ;;  %v116_v49 = vld [vmem:[%s793_s1 + $0x318] sm:$0xff]  ;;  %v133_v50 = vld [vmem:[%s793_s1 + $0x3a0] sm:$0xff] }
  0x36   :  { %300 = vmatpush.msrb.mxu2 %v118_v40  ;;  %319 = vmatpush.msrb.mxu3 %v135_v41  ;;  %v102_v48 = vld [vmem:[%s793_s1 + $0x2a8] sm:$0xff]  ;;  %v154_v51 = vld.sshfl [vmem:[#allocation1] sm:$0xff pattern:$0x73625140]  ;;  %v101_v54 = vld [vmem:[%s793_s1 + $0x2a0] sm:$0xff] }
  0x37   :  { %260 = vmatpush.msrb.mxu0 %v86_v42  ;;  %279 = vmatpush.msrb.mxu1 %v103_v43  ;;  %v157_v52 = vld.sshfl [vmem:[#allocation1 + $0x18] sm:$0xff pattern:$0x73625140]  ;;  %v84_v53 = vld [vmem:[%s793_s1 + $0x218] sm:$0xff]  ;;  %v114_v60 = vld [vmem:[%s793_s1 + $0x308] sm:$0xff] }
  0x38   :  { %301 = vmatpush.msrb.mxu2 %v117_v44  ;;  %320 = vmatpush.msrb.mxu3 %v134_v45  ;;  %v115_v55 = vld [vmem:[%s793_s1 + $0x310] sm:$0xff]  ;;  %v132_v56 = vld [vmem:[%s793_s1 + $0x398] sm:$0xff]  ;;  %v155_v57 = vld.sshfl [vmem:[#allocation1 + $0x8] sm:$0xff pattern:$0x73625140] }
  0x39   :  { %226 = vmatmul.f32.vlgmr.msra.gmra.mxu2 %v156_v46  ;;  %261 = vmatpush.msrb.mxu0 %v85_v47  ;;  %v83_v58 = vld [vmem:[%s793_s1 + $0x210] sm:$0xff]  ;;  %v100_v59 = vld [vmem:[%s793_s1 + $0x298] sm:$0xff]  ;;  %v82_v62 = vld [vmem:[%s793_s1 + $0x208] sm:$0xff] }
  0x3a   :  { %280 = vmatpush.msrb.mxu1 %v102_v48  ;;  %302 = vmatpush.msrb.mxu2 %v116_v49  ;;  %v131_v61 = vld [vmem:[%s793_s1 + $0x390] sm:$0xff]  ;;  %v113_v0 = vld [vmem:[%s793_s1 + $0x300] sm:$0xff]  ;;  %v130_v1 = vld [vmem:[%s793_s1 + $0x388] sm:$0xff] }
  0x3b   :  { %321 = vmatpush.msrb.mxu3 %v133_v50  ;;  %186 = vmatmul.f32.vlgmr.msra.gmra.mxu0 %v154_v51  ;;  %v99_v63 = vld [vmem:[%s793_s1 + $0x290] sm:$0xff]  ;;  %v160_v2 = vld.sshfl [vmem:[#allocation1 + $0x30] sm:$0xff pattern:$0x73625140]  ;;  %v81_v3 = vld [vmem:[%s793_s1 + $0x200] sm:$0xff] }
  0x3c   :  { %246 = vmatmul.f32.vlgmr.msra.gmra.mxu3 %v157_v52  ;;  %262 = vmatpush.msrb.mxu0 %v84_v53  ;;  %v98_v4 = vld [vmem:[%s793_s1 + $0x288] sm:$0xff]  ;;  %v129_v5 = vld [vmem:[%s793_s1 + $0x380] sm:$0xff]  ;;  %v158_v6 = vld.sshfl [vmem:[#allocation1 + $0x20] sm:$0xff pattern:$0x73625140] }
  0x3d   :  { %281 = vmatpush.msrb.mxu1 %v101_v54  ;;  %303 = vmatpush.msrb.mxu2 %v115_v55  ;;  %v161_v7 = vld.sshfl [vmem:[#allocation1 + $0x38] sm:$0xff pattern:$0x73625140]  ;;  %v97_v8 = vld [vmem:[%s793_s1 + $0x280] sm:$0xff]  ;;  %s375_s1 = smov [#allocation2]  }
  0x3e   :  { %322 = vmatpush.msrb.mxu3 %v132_v56  ;;  %206 = vmatmul.f32.vlgmr.msra.gmra.mxu1 %v155_v57  ;;  %v159_v9 = vld.sshfl [vmem:[#allocation1 + $0x28] sm:$0xff pattern:$0x73625140]  ;;  %s336_s28 = sshll.u32 %s375_s1, 4  ;;  %s337_s28 = int_to_ptr.vmem [resolvable:$true] %s336_s28 }
  0x3f   :  { %263 = vmatpush.msrb.mxu0 %v83_v58  ;;  %282 = vmatpush.msrb.mxu1 %v100_v59  ;;  %v348_v10 = vld [vmem:[%s794_s2] ss:$0 sm:$0xff] }
  0x40   :  { %304 = vmatpush.msrb.mxu2 %v114_v60  ;;  %323 = vmatpush.msrb.mxu3 %v131_v61 }
  0x41   :  { %264 = vmatpush.msrb.mxu0 %v82_v62  ;;  %283 = vmatpush.msrb.mxu1 %v99_v63 }
  0x42   :  { %305 = vmatpush.msrb.mxu2 %v113_v0  ;;  %324 = vmatpush.msrb.mxu3 %v130_v1 }
  0x43   :  { %306 = vmatmul.f32.vlgmr.msrb.gmra.mxu2 %v160_v2  ;;  %265 = vmatpush.msrb.mxu0 %v81_v3 }
  0x44   :  { %284 = vmatpush.msrb.mxu1 %v98_v4  ;;  %325 = vmatpush.msrb.mxu3 %v129_v5 }
  0x45   :  { %266 = vmatmul.f32.vlgmr.msrb.gmra.mxu0 %v158_v6  ;;  %326 = vmatmul.f32.vlgmr.msrb.gmra.mxu3 %v161_v7 }
  0x46   :  { %285 = vmatpush.msrb.mxu1 %v97_v8 }
  0x47   :  { %286 = vmatmul.f32.vlgmr.msrb.gmra.mxu1 %v159_v9 }
  0xb8   :  { %v187_v11 = vpop.f32.mrf.mxu0 }
  0xb9   :  { %v188_v12 = vadd.f32 %v348_v10, %v187_v11 }
  0xbb   :  { %v207_v13 = vpop.f32.mrf.mxu1 }
  0xbc   :  { %v208_v14 = vadd.f32 %v207_v13, %v188_v12  ;;  %v227_v15 = vpop.f32.mrf.mxu2 }
  0xbe   :  { %v228_v16 = vadd.f32 %v227_v15, %v208_v14 }
  0xbf   :  { %v247_v17 = vpop.f32.mrf.mxu3 }
  0xc0   :  { %v248_v18 = vadd.f32 %v247_v17, %v228_v16 }
  0xc2   :  { %v267_v19 = vpop.f32.mrf.mxu0 }
  0xc3   :  { %v268_v20 = vadd.f32 %v267_v19, %v248_v18 }
  0xc4   :  { %v287_v21 = vpop.f32.mrf.mxu1 }
  0xc5   :  { %v288_v22 = vadd.f32 %v287_v21, %v268_v20 }
  0xc6   :  { %v307_v23 = vpop.f32.mrf.mxu2 }
  0xc7   :  { %v308_v24 = vadd.f32 %v307_v23, %v288_v22 }
  0xc8   :  { %v327_v25 = vpop.f32.mrf.mxu3 }
  0xc9   :  { %v328_v26 = vadd.f32 %v327_v25, %v308_v24 }
  0xcb   :  { %330 = vst [vmem:[#allocation2] sm:$0x3] %v328_v26 }
  0xcc   :  { %341 = dma.vmem_to_hbm [thread:$0]  %s337_s28, 32, %s339_s4, [#allocation3]  }
  0xcd   :  { %373 = dma.done.wait [#allocation3], 32  }
  0xce   :  { %374 = vsyncadd [#allocation3], 4294967264 }
  0xcf   :  { %346 = vsyncpa [#allocation3], 1 }

// kernel: _lambda_.21
= control target key start
LH: loop header
LB: loop body
LE: loop exit
PB: predicated region body
PF: predicated region fallthrough
CT: control target
= control target key end

     0   :  { %s2105_s15 = smov [#allocation4]   ;;  %s2597_s0 = inlined_call_operand.vmem [shape: s32[2], index: 0, kind: input, shape index: {}]   ;;  %s2598_s1 = inlined_call_operand.vmem [shape: bf16[2,32,512], index: 1, kind: input, shape index: {}]   ;;  %s2599_s2 = inlined_call_operand.vmem [shape: bf16[3,512,128], index: 2, kind: input, shape index: {}]   ;;  %s2600_s3 = inlined_call_operand.vmem [shape: bf16[2,16,128], index: 3, kind: output, shape index: {}]  }
   0x1   :  { %s9_s14 = sshll.u32 %s2597_s0, 4  ;;  %s10_s14 = int_to_ptr.vmem [resolvable:$true] %s9_s14 }
   0x2   :  { %12 = dma.vmem_to_smem %s10_s14, 16, %s2105_s15, [#allocation3] }
   0x3   :  { %2103 = dma.done.wait [#allocation3], 16 }
   0x4   :  { %2104 = vsyncadd [#allocation3], 4294967280 }
   0x5   :  { %15 = sfence }
   0x6   :  { %s2130_s16 = sld [smem:[#allocation4]]  ;;  %v2106_v0 = vmov 0.0  }
   0x7   :  { %s2132_s17 = sld [smem:[#allocation4 + $0x1]]  ;;  %24 = vst [vmem:[#allocation2 + $0x10] sm:$0xff] %v2106_v0 }
   0x8   :  { %25 = vst [vmem:[#allocation2] sm:$0xff] %v2106_v0 }
   0x9   :  { %26 = vst [vmem:[#allocation2 + $0x18] sm:$0xff] %v2106_v0 }
   0xa   :  { %27 = vst [vmem:[#allocation2 + $0x8] sm:$0xff] %v2106_v0 }
   0xc   :  { %p28_p0 = scmp.le.s32.totalorder %s2130_s16, 0 }
   0xd   :  { %p29_p1 = scmp.gt.s32.totalorder %s2132_s17, 0 }
   0xf   :  { %p30_p2 = pnand %p29_p1, %p28_p0 }
  0x11   :  { %33 = sbr.rel (%p30_p2) target bundleno = 219 (0xdb), region = 13 }
  0x16   :  { %v1987_v1 = vld [vmem:[%s2599_s2 + $0x38] sm:$0xff]  ;;  %v1986_v5 = vld [vmem:[%s2599_s2 + $0x30] sm:$0xff]  ;;  %v1985_v9 = vld [vmem:[%s2599_s2 + $0x28] sm:$0xff] }
  0x17   :  { %v1995_v2 = vld [vmem:[%s2599_s2 + $0x78] sm:$0xff]  ;;  %342 = vmatpush.bf16.msra.mxu0 %v1987_v1  ;;  %v1994_v6 = vld [vmem:[%s2599_s2 + $0x70] sm:$0xff]  ;;  %v1993_v10 = vld [vmem:[%s2599_s2 + $0x68] sm:$0xff] }
  0x18   :  { %v2003_v3 = vld [vmem:[%s2599_s2 + $0xb8] sm:$0xff]  ;;  %361 = vmatpush.bf16.msra.mxu1 %v1995_v2  ;;  %v2002_v7 = vld [vmem:[%s2599_s2 + $0xb0] sm:$0xff]  ;;  %v2001_v11 = vld [vmem:[%s2599_s2 + $0xa8] sm:$0xff] }
  0x19   :  { %v2011_v4 = vld [vmem:[%s2599_s2 + $0xf8] sm:$0xff]  ;;  %380 = vmatpush.bf16.msra.mxu2 %v2003_v3  ;;  %v2010_v8 = vld [vmem:[%s2599_s2 + $0xf0] sm:$0xff]  ;;  %v2009_v12 = vld [vmem:[%s2599_s2 + $0xe8] sm:$0xff] }
  0x1a   :  { %399 = vmatpush.bf16.msra.mxu3 %v2011_v4  ;;  %v1984_v13 = vld [vmem:[%s2599_s2 + $0x20] sm:$0xff]  ;;  %v1983_v17 = vld [vmem:[%s2599_s2 + $0x18] sm:$0xff]  ;;  %v1982_v21 = vld [vmem:[%s2599_s2 + $0x10] sm:$0xff] }
  0x1b   :  { %343 = vmatpush.bf16.msra.mxu0 %v1986_v5  ;;  %v1992_v14 = vld [vmem:[%s2599_s2 + $0x60] sm:$0xff]  ;;  %v1991_v18 = vld [vmem:[%s2599_s2 + $0x58] sm:$0xff]  ;;  %v1990_v22 = vld [vmem:[%s2599_s2 + $0x50] sm:$0xff] }
  0x1c   :  { %362 = vmatpush.bf16.msra.mxu1 %v1994_v6  ;;  %v2000_v15 = vld [vmem:[%s2599_s2 + $0xa0] sm:$0xff]  ;;  %v1999_v19 = vld [vmem:[%s2599_s2 + $0x98] sm:$0xff]  ;;  %v1998_v23 = vld [vmem:[%s2599_s2 + $0x90] sm:$0xff] }
  0x1d   :  { %381 = vmatpush.bf16.msra.mxu2 %v2002_v7  ;;  %v2008_v16 = vld [vmem:[%s2599_s2 + $0xe0] sm:$0xff]  ;;  %v2007_v20 = vld [vmem:[%s2599_s2 + $0xd8] sm:$0xff]  ;;  %v2006_v24 = vld [vmem:[%s2599_s2 + $0xd0] sm:$0xff] }
  0x1e   :  { %400 = vmatpush.bf16.msra.mxu3 %v2010_v8  ;;  %v1981_v25 = vld [vmem:[%s2599_s2 + $0x8] sm:$0xff]  ;;  %v1980_v29 = vld [vmem:[%s2599_s2] sm:$0xff]  ;;  %v1974_v34 = vld [vmem:[%s2598_s1 + $0xc] sm:$0xf0] }
  0x1f   :  { %344 = vmatpush.bf16.msra.mxu0 %v1985_v9  ;;  %v1989_v26 = vld [vmem:[%s2599_s2 + $0x48] sm:$0xff]  ;;  %v1988_v30 = vld [vmem:[%s2599_s2 + $0x40] sm:$0xff]  ;;  %v1428_v36 = vld [vmem:[%s2598_s1 + $0x10] sm:$0xf0] }
  0x20   :  { %363 = vmatpush.bf16.msra.mxu1 %v1993_v10  ;;  %v1997_v27 = vld [vmem:[%s2599_s2 + $0x88] sm:$0xff]  ;;  %v1996_v31 = vld [vmem:[%s2599_s2 + $0x80] sm:$0xff]  ;;  %v1975_v38 = vld [vmem:[%s2598_s1 + $0x14] sm:$0xf0] }
  0x21   :  { %382 = vmatpush.bf16.msra.mxu2 %v2001_v11  ;;  %v2005_v28 = vld [vmem:[%s2599_s2 + $0xc8] sm:$0xff]  ;;  %v2004_v32 = vld [vmem:[%s2599_s2 + $0xc0] sm:$0xff]  ;;  %v1436_v40 = vld [vmem:[%s2598_s1 + $0x18] sm:$0xf0] }
  0x22   :  { %401 = vmatpush.bf16.msra.mxu3 %v2009_v12  ;;  %v1426_v33 = vld [vmem:[%s2598_s1] sm:$0xf]  ;;  %v1972_v35 = vld [vmem:[%s2598_s1 + $0x4] sm:$0xf]  ;;  %v1434_v37 = vld [vmem:[%s2598_s1 + $0x8] sm:$0xf] }
  0x23   :  { %345 = vmatpush.bf16.msra.mxu0 %v1984_v13  ;;  %v1973_v39 = vld [vmem:[%s2598_s1 + $0xc] sm:$0xf]  ;;  %v1427_v41 = vor.u32 %v1974_v34, %v1426_v33  ;;  %v1431_v42 = vor.u32 %v1972_v35, %v1428_v36  ;;  %v1435_v43 = vor.u32 %v1975_v38, %v1434_v37  ;;  %v1442_v45 = vld [vmem:[%s2598_s1 + $0x40] sm:$0xf]  ;;  %v1978_v46 = vld [vmem:[%s2598_s1 + $0x4c] sm:$0xf0] }
  0x24   :  { %364 = vmatpush.bf16.msra.mxu1 %v1992_v14  ;;  %v1439_v44 = vor.u32 %v1973_v39, %v1436_v40  ;;  %v1976_v47 = vld [vmem:[%s2598_s1 + $0x44] sm:$0xf]  ;;  %v1444_v48 = vld [vmem:[%s2598_s1 + $0x50] sm:$0xf0]  ;;  %v1450_v49 = vld [vmem:[%s2598_s1 + $0x48] sm:$0xf]  ;;  %v1443_v53 = vor.u32 %v1978_v46, %v1442_v45 }
  0x25   :  { %383 = vmatpush.bf16.msra.mxu2 %v2000_v15  ;;  %v1979_v50 = vld [vmem:[%s2598_s1 + $0x54] sm:$0xf0]  ;;  %v1977_v51 = vld [vmem:[%s2598_s1 + $0x4c] sm:$0xf]  ;;  %v1452_v52 = vld [vmem:[%s2598_s1 + $0x58] sm:$0xf0]  ;;  %v1447_v54 = vor.u32 %v1976_v47, %v1444_v48 }
  0x26   :  { %402 = vmatpush.bf16.msra.mxu3 %v2008_v16  ;;  %v1451_v55 = vor.u32 %v1979_v50, %v1450_v49  ;;  %v1455_v56 = vor.u32 %v1977_v51, %v1452_v52  ;;  %v42_v1 = vld [vmem:[#allocation2 + $0x10] sm:$0xff]  ;;  %v43_v8 = vld [vmem:[#allocation2] sm:$0xff] }
  0x27   :  { %346 = vmatpush.bf16.msra.mxu0 %v1983_v17  ;;  %v44_v17 = vld [vmem:[#allocation2 + $0x18] sm:$0xff] }
  0x28   :  { %365 = vmatpush.bf16.msra.mxu1 %v1991_v18 }
  0x29   :  { %384 = vmatpush.bf16.msra.mxu2 %v1999_v19 }
  0x2a   :  { %403 = vmatpush.bf16.msra.mxu3 %v2007_v20 }
  0x2b   :  { %347 = vmatpush.bf16.msra.mxu0 %v1982_v21 }
  0x2c   :  { %366 = vmatpush.bf16.msra.mxu1 %v1990_v22 }
  0x2d   :  { %385 = vmatpush.bf16.msra.mxu2 %v1998_v23 }
  0x2e   :  { %404 = vmatpush.bf16.msra.mxu3 %v2006_v24 }
  0x2f   :  { %348 = vmatpush.bf16.msra.mxu0 %v1981_v25  ;;  %v45_v25 = vld [vmem:[#allocation2 + $0x8] sm:$0xff] }
  0x30   :  { %367 = vmatpush.bf16.msra.mxu1 %v1989_v26 }
  0x31   :  { %386 = vmatpush.bf16.msra.mxu2 %v1997_v27 }
  0x32   :  { %405 = vmatpush.bf16.msra.mxu3 %v2005_v28 }
  0x33   :  { %349 = vmatpush.bf16.msra.mxu0 %v1980_v29 }
  0x34   :  { %368 = vmatpush.bf16.msra.mxu1 %v1988_v30 }
  0x35   :  { %387 = vmatpush.bf16.msra.mxu2 %v1996_v31 }
  0x36   :  { %406 = vmatpush.bf16.msra.mxu3 %v2004_v32  ;;  %350 = vmatmul.bf16.vlgmr.msra.gmra.mxu0 %v1427_v41 }
  0x37   :  { %369 = vmatmul.bf16.vlgmr.msra.gmra.mxu1 %v1431_v42 }
  0x38   :  { %388 = vmatmul.bf16.vlgmr.msra.gmra.mxu2 %v1435_v43 }
  0x39   :  { %407 = vmatmul.bf16.vlgmr.msra.gmra.mxu3 %v1439_v44 }
  0x46   :  { %355 = vmatmul.bf16.gmra.mxu0 %v1443_v53 }
  0x47   :  { %374 = vmatmul.bf16.gmra.mxu1 %v1447_v54 }
  0x48   :  { %393 = vmatmul.bf16.gmra.mxu2 %v1451_v55 }
  0x49   :  { %412 = vmatmul.bf16.gmra.mxu3 %v1455_v56 }
  0xb3   :  { %v351_v57 = vpop.f32.mrf.mxu0 }
  0xb4   :  { %v370_v58 = vpop.f32.mrf.mxu1 }
  0xb5   :  { %v371_v59 = vadd.f32 %v370_v58, %v351_v57 }
  0xbb   :  { %v389_v60 = vpop.f32.mrf.mxu2  ;;  %v353_v63 = vpop.f32.mrf.mxu0 }
  0xbc   :  { %v408_v61 = vpop.f32.mrf.mxu3  ;;  %v390_v62 = vadd.f32 %v389_v60, %v371_v59  ;;  %v372_v0 = vpop.f32.mrf.mxu1 }
  0xbd   :  { %v373_v4 = vadd.f32 %v372_v0, %v353_v63 }
  0xbe   :  { %v409_v2 = vadd.f32 %v408_v61, %v390_v62 }
  0xc0   :  { %v418_v3 = vadd.f32 %v409_v2, %v42_v1 }
  0xc2   :  { %422 = vst [vmem:[#allocation2 + $0x10] sm:$0xff] %v418_v3 }
  0xc3   :  { %v391_v5 = vpop.f32.mrf.mxu2  ;;  %v356_v9 = vpop.f32.mrf.mxu0 }
  0xc4   :  { %v410_v6 = vpop.f32.mrf.mxu3  ;;  %v392_v7 = vadd.f32 %v391_v5, %v373_v4  ;;  %v375_v10 = vpop.f32.mrf.mxu1 }
  0xc5   :  { %v376_v13 = vadd.f32 %v375_v10, %v356_v9 }
  0xc6   :  { %v411_v11 = vadd.f32 %v410_v6, %v392_v7 }
  0xc8   :  { %v419_v12 = vadd.f32 %v411_v11, %v43_v8 }
  0xca   :  { %423 = vst [vmem:[#allocation2] sm:$0xff] %v419_v12 }
  0xcb   :  { %v394_v14 = vpop.f32.mrf.mxu2  ;;  %v358_v19 = vpop.f32.mrf.mxu0 }
  0xcc   :  { %v413_v15 = vpop.f32.mrf.mxu3  ;;  %v395_v16 = vadd.f32 %v394_v14, %v376_v13  ;;  %v377_v20 = vpop.f32.mrf.mxu1 }
  0xcd   :  { %v378_v22 = vadd.f32 %v377_v20, %v358_v19 }
  0xce   :  { %v414_v18 = vadd.f32 %v413_v15, %v395_v16 }
  0xd0   :  { %v420_v21 = vadd.f32 %v414_v18, %v44_v17 }
  0xd2   :  { %424 = vst [vmem:[#allocation2 + $0x18] sm:$0xff] %v420_v21 }
  0xd3   :  { %v396_v23 = vpop.f32.mrf.mxu2 }
  0xd4   :  { %v397_v24 = vadd.f32 %v396_v23, %v378_v22  ;;  %v415_v26 = vpop.f32.mrf.mxu3 }
  0xd6   :  { %v416_v27 = vadd.f32 %v415_v26, %v397_v24 }
  0xd8   :  { %v421_v28 = vadd.f32 %v416_v27, %v45_v25 }
  0xda   :  { %425 = vst [vmem:[#allocation2 + $0x8] sm:$0xff] %v421_v28 }
  0xdb PF:  { %p426_p3 = scmp.le.s32.totalorder %s2130_s16, 1  ;;  %p427_p4 = scmp.gt.s32.totalorder %s2132_s17, 1 }
  0xdd   :  { %p428_p5 = pnand %p427_p4, %p426_p3 }
  0xdf   :  { %431 = sbr.rel (%p428_p5) target bundleno = 425 (0x1a9), region = 17 }
  0xe4   :  { %v2019_v29 = vld [vmem:[%s2599_s2 + $0x138] sm:$0xff]  ;;  %v2018_v33 = vld [vmem:[%s2599_s2 + $0x130] sm:$0xff]  ;;  %v2017_v37 = vld [vmem:[%s2599_s2 + $0x128] sm:$0xff]  ;;  %vm444_vm0 = vsmask.f32 3328 }
  0xe5   :  { %v2027_v30 = vld [vmem:[%s2599_s2 + $0x178] sm:$0xff]  ;;  %836 = vmatpush.bf16.msra.mxu0 %v2019_v29  ;;  %v2026_v34 = vld [vmem:[%s2599_s2 + $0x170] sm:$0xff]  ;;  %v2025_v38 = vld [vmem:[%s2599_s2 + $0x168] sm:$0xff]  ;;  %vm445_vm1 = vsmask.f32 7440 }
  0xe6   :  { %v2035_v31 = vld [vmem:[%s2599_s2 + $0x1b8] sm:$0xff]  ;;  %855 = vmatpush.bf16.msra.mxu1 %v2027_v30  ;;  %v2034_v35 = vld [vmem:[%s2599_s2 + $0x1b0] sm:$0xff]  ;;  %v2033_v39 = vld [vmem:[%s2599_s2 + $0x1a8] sm:$0xff] }
  0xe7   :  { %v2043_v32 = vld [vmem:[%s2599_s2 + $0x1f8] sm:$0xff]  ;;  %874 = vmatpush.bf16.msra.mxu2 %v2035_v31  ;;  %v2042_v36 = vld [vmem:[%s2599_s2 + $0x1f0] sm:$0xff]  ;;  %v2041_v40 = vld [vmem:[%s2599_s2 + $0x1e8] sm:$0xff] }
  0xe8   :  { %893 = vmatpush.bf16.msra.mxu3 %v2043_v32  ;;  %v2016_v41 = vld [vmem:[%s2599_s2 + $0x120] sm:$0xff]  ;;  %v434_v46 = vld [vmem:[%s2598_s1 + $0x10] sm:$0xff]  ;;  %v433_v53 = vld [vmem:[%s2598_s1 + $0x8] sm:$0xff] }
  0xe9   :  { %837 = vmatpush.bf16.msra.mxu0 %v2018_v33  ;;  %v2024_v42 = vld [vmem:[%s2599_s2 + $0x160] sm:$0xff]  ;;  %v457_v50 = vshll.u32 %v434_v46, 16  ;;  %v475_v51 = vshrl.u32 %v434_v46, 16  ;;  %v435_v54 = vld [vmem:[%s2598_s1 + $0x18] sm:$0xff]  ;;  %v437_v57 = vld [vmem:[%s2598_s1 + $0x28] sm:$0x11] }
  0xea   :  { %856 = vmatpush.bf16.msra.mxu1 %v2026_v34  ;;  %v2032_v43 = vld [vmem:[%s2599_s2 + $0x1a0] sm:$0xff]  ;;  %v462_v58 = vshrl.u32 %v433_v53, 16  ;;  %v465_v59 = vshll.u32 %v433_v53, 16  ;;  %v2015_v60 = vld [vmem:[%s2599_s2 + $0x118] sm:$0xff]  ;;  %v471_v0 = vshll.u32 %v435_v54, 16  ;;  %v485_v6 = vshrl.u32 %v435_v54, 16  ;;  %vm2365_vm2 = vmor %vm444_vm0, %vm445_vm1 }
  0xeb   :  { %875 = vmatpush.bf16.msra.mxu2 %v2034_v35  ;;  %v432_v44 = vld [vmem:[%s2598_s1] sm:$0xff]  ;;  %v2023_v61 = vld [vmem:[%s2599_s2 + $0x158] sm:$0xff]  ;;  %v459_v62 = vrot.slane %v457_v50, 5  ;;  %v477_v63 = vrot.slane %v475_v51, 4  ;;  %v491_v10 = vshll.u32 %v437_v57, 16  ;;  %v440_v16 = vld [vmem:[%s2598_s1 + $0x50] sm:$0xff] }
  0xec   :  { %894 = vmatpush.bf16.msra.mxu3 %v2042_v36  ;;  %v2040_v45 = vld [vmem:[%s2599_s2 + $0x1e0] sm:$0xff]  ;;  %v448_v48 = vshrl.u32 %v432_v44, 16  ;;  %v451_v49 = vshll.u32 %v432_v44, 16  ;;  %v2031_v1 = vld [vmem:[%s2599_s2 + $0x198] sm:$0xff]  ;;  %v464_v4 = vrot.slane %v462_v58, 4  ;;  %v467_v5 = vrot.slane %v465_v59, 5 }
  0xed   :  { %838 = vmatpush.bf16.msra.mxu0 %v2017_v37  ;;  %v436_v47 = vld [vmem:[%s2598_s1 + $0x20] sm:$0x11]  ;;  %v2039_v2 = vld [vmem:[%s2599_s2 + $0x1d8] sm:$0xff]  ;;  %v478_v8 = vor.u32 %v477_v63, %v459_v62  ;;  %v473_v9 = vrot.slane %v471_v0, 5  ;;  %v487_v15 = vrot.slane %v485_v6, 4  ;;  %v2014_v17 = vld [vmem:[%s2599_s2 + $0x110] sm:$0xff] }
  0xee   :  { %857 = vmatpush.bf16.msra.mxu1 %v2025_v38  ;;  %v481_v52 = vshll.u32 %v436_v47, 16  ;;  %v450_v55 = vrot.slane %v448_v48, 4  ;;  %v453_v56 = vrot.slane %v451_v49, 5  ;;  %v438_v7 = vld [vmem:[%s2598_s1 + $0x40] sm:$0xff]  ;;  %v468_v14 = vor.u32 %v467_v5, %v464_v4  ;;  %v2022_v18 = vld [vmem:[%s2599_s2 + $0x150] sm:$0xff]  ;;  %v2013_v29 = vld [vmem:[%s2599_s2 + $0x108] sm:$0xff] }
  0xef   :  { %876 = vmatpush.bf16.msra.mxu2 %v2033_v39  ;;  %v479_v19 = vrot.slane %v478_v8, 4  ;;  %v496_v20 = vshrl.u32 %v438_v7, 16  ;;  %v2030_v21 = vld [vmem:[%s2599_s2 + $0x190] sm:$0xff]  ;;  %v488_v24 = vor.u32 %v487_v15, %v473_v9  ;;  %v493_v25 = vrot.slane %v491_v10, 5  ;;  %v2021_v33 = vld [vmem:[%s2599_s2 + $0x148] sm:$0xff]  ;;  %v441_v37 = vld [vmem:[%s2598_s1 + $0x58] sm:$0xff] }
  0xf0   :  { %895 = vmatpush.bf16.msra.mxu3 %v2041_v40  ;;  %v454_v3 = vor.u32 %v453_v56, %v450_v55  ;;  %v483_v13 = vrot.slane %v481_v52, 5  ;;  %v2038_v22 = vld [vmem:[%s2599_s2 + $0x1d0] sm:$0xff]  ;;  %v469_v23 = vrot.slane %v468_v14, 4  ;;  %v499_v26 = vshll.u32 %v438_v7, 16  ;;  %v439_v36 = vld [vmem:[%s2598_s1 + $0x48] sm:$0xff]  ;;  %v2012_v52 = vld [vmem:[%s2599_s2 + $0x100] sm:$0xff] }
  0xf1   :  { %839 = vmatpush.bf16.msra.mxu0 %v2016_v41  ;;  %v505_v28 = vshll.u32 %v440_v16, 16  ;;  %v489_v32 = vrot.slane %v488_v24, 4  ;;  %v498_v34 = vrot.slane %v496_v20, 4  ;;  %v523_v35 = vshrl.u32 %v440_v16, 16  ;;  %v2029_v38 = vld [vmem:[%s2599_s2 + $0x188] sm:$0xff]  ;;  %v2020_v53 = vld [vmem:[%s2599_s2 + $0x140] sm:$0xff] }
  0xf2   :  { %858 = vmatpush.bf16.msra.mxu1 %v2024_v42  ;;  %v455_v12 = vrot.slane %v454_v3, 4  ;;  %v484_v30 = vsel %vm2365_vm2, %v479_v19, %v483_v13  ;;  %v474_v31 = vsel %vm2365_vm2, %v469_v23, %v473_v9  ;;  %v2037_v39 = vld [vmem:[%s2599_s2 + $0x1c8] sm:$0xff]  ;;  %v510_v49 = vshrl.u32 %v439_v36, 16  ;;  %v2028_v58 = vld [vmem:[%s2599_s2 + $0x180] sm:$0xff] }
  0xf3   :  { %877 = vmatpush.bf16.msra.mxu2 %v2032_v43  ;;  %v494_v42 = vsel %vm2365_vm2, %v489_v32, %v493_v25  ;;  %v501_v43 = vrot.slane %v499_v26, 5  ;;  %v616_v44 = vunpack.c.l.b16 %v484_v30  ;;  %v614_v46 = vunpack.c.l.b16 %v474_v31  ;;  %v2036_v59 = vld [vmem:[%s2599_s2 + $0x1c0] sm:$0xff] }
  0xf4   :  { %896 = vmatpush.bf16.msra.mxu3 %v2040_v45  ;;  %v460_v27 = vsel %vm2365_vm2, %v455_v12, %v459_v62  ;;  %v617_v45 = vunpack.c.h.b16 %v484_v30  ;;  %v507_v47 = vrot.slane %v505_v28, 5  ;;  %v615_v48 = vunpack.c.h.b16 %v474_v31  ;;  %v443_v62 = vld [vmem:[%s2598_s1 + $0x68] sm:$0x11] }
  0xf5   :  { %840 = vmatpush.bf16.msra.mxu0 %v2015_v60  ;;  %v612_v40 = vunpack.c.l.b16 %v460_v27  ;;  %v613_v41 = vunpack.c.h.b16 %v460_v27  ;;  %v513_v50 = vshll.u32 %v439_v36, 16  ;;  %v519_v51 = vshll.u32 %v441_v37, 16  ;;  %v442_v60 = vld [vmem:[%s2598_s1 + $0x60] sm:$0x11] }
  0xf6   :  { %859 = vmatpush.bf16.msra.mxu1 %v2023_v61  ;;  %v618_v54 = vunpack.c.l.b16 %v494_v42  ;;  %v619_v55 = vunpack.c.h.b16 %v494_v42  ;;  %v525_v56 = vrot.slane %v523_v35, 4  ;;  %v533_v57 = vshrl.u32 %v441_v37, 16  ;;  %v543_v42 = vld [vmem:[#allocation2 + $0x10] sm:$0xff] }
  0xf7   :  { %878 = vmatpush.bf16.msra.mxu2 %v2031_v1  ;;  %v512_v61 = vrot.slane %v510_v49, 4  ;;  %v515_v63 = vrot.slane %v513_v50, 5  ;;  %v521_v0 = vrot.slane %v519_v51, 5  ;;  %v629_v3 = vpack.c.b16 %v617_v45, %v613_v41  ;;  %v544_v49 = vld [vmem:[#allocation2] sm:$0xff] }
  0xf8   :  { %897 = vmatpush.bf16.msra.mxu3 %v2039_v2  ;;  %v535_v1 = vrot.slane %v533_v57, 4  ;;  %v628_v2 = vpack.c.b16 %v616_v44, %v612_v40  ;;  %v502_v4 = vor.u32 %v501_v43, %v498_v34  ;;  %v630_v5 = vpack.c.b16 %v618_v54, %v614_v46 }
  0xf9   :  { %841 = vmatpush.bf16.msra.mxu0 %v2014_v17  ;;  %v631_v6 = vpack.c.b16 %v619_v55, %v615_v48  ;;  %v526_v7 = vor.u32 %v525_v56, %v507_v47  ;;  %v529_v8 = vshll.u32 %v442_v60, 16  ;;  %v516_v9 = vor.u32 %v515_v63, %v512_v61 }
  0xfa   :  { %860 = vmatpush.bf16.msra.mxu1 %v2022_v18  ;;  %v536_v10 = vor.u32 %v535_v1, %v521_v0  ;;  %v539_v12 = vshll.u32 %v443_v62, 16  ;;  %v503_v13 = vrot.slane %v502_v4, 4 }
  0xfb   :  { %879 = vmatpush.bf16.msra.mxu2 %v2030_v21  ;;  %v527_v14 = vrot.slane %v526_v7, 4  ;;  %v531_v15 = vrot.slane %v529_v8, 5  ;;  %v517_v16 = vrot.slane %v516_v9, 4 }
  0xfc   :  { %898 = vmatpush.bf16.msra.mxu3 %v2038_v22  ;;  %v537_v17 = vrot.slane %v536_v10, 4  ;;  %v541_v18 = vrot.slane %v539_v12, 5  ;;  %v508_v19 = vsel %vm2365_vm2, %v503_v13, %v507_v47 }
  0xfd   :  { %842 = vmatpush.bf16.msra.mxu0 %v2013_v29  ;;  %v532_v20 = vsel %vm2365_vm2, %v527_v14, %v531_v15  ;;  %v522_v21 = vsel %vm2365_vm2, %v517_v16, %v521_v0  ;;  %v620_v23 = vunpack.c.l.b16 %v508_v19  ;;  %v621_v25 = vunpack.c.h.b16 %v508_v19 }
  0xfe   :  { %861 = vmatpush.bf16.msra.mxu1 %v2021_v33  ;;  %v542_v22 = vsel %vm2365_vm2, %v537_v17, %v541_v18  ;;  %v624_v24 = vunpack.c.l.b16 %v532_v20  ;;  %v625_v26 = vunpack.c.h.b16 %v532_v20  ;;  %v622_v27 = vunpack.c.l.b16 %v522_v21 }
  0xff   :  { %880 = vmatpush.bf16.msra.mxu2 %v2029_v38  ;;  %v626_v28 = vunpack.c.l.b16 %v542_v22  ;;  %v623_v29 = vunpack.c.h.b16 %v522_v21  ;;  %v627_v30 = vunpack.c.h.b16 %v542_v22 }
 0x100   :  { %899 = vmatpush.bf16.msra.mxu3 %v2037_v39  ;;  %v632_v31 = vpack.c.b16 %v624_v24, %v620_v23  ;;  %v633_v32 = vpack.c.b16 %v625_v26, %v621_v25 }
 0x101   :  { %843 = vmatpush.bf16.msra.mxu0 %v2012_v52  ;;  %v634_v33 = vpack.c.b16 %v626_v28, %v622_v27  ;;  %v635_v34 = vpack.c.b16 %v627_v30, %v623_v29 }
 0x102   :  { %862 = vmatpush.bf16.msra.mxu1 %v2020_v53 }
 0x103   :  { %881 = vmatpush.bf16.msra.mxu2 %v2028_v58  ;;  %v545_v58 = vld [vmem:[#allocation2 + $0x18] sm:$0xff] }
 0x104   :  { %900 = vmatpush.bf16.msra.mxu3 %v2036_v59  ;;  %844 = vmatmul.bf16.vlgmr.msra.gmra.mxu0 %v628_v2  ;;  %v546_v2 = vld [vmem:[#allocation2 + $0x8] sm:$0xff] }
 0x105   :  { %863 = vmatmul.bf16.vlgmr.msra.gmra.mxu1 %v629_v3 }
 0x106   :  { %882 = vmatmul.bf16.vlgmr.msra.gmra.mxu2 %v630_v5 }
 0x107   :  { %901 = vmatmul.bf16.vlgmr.msra.gmra.mxu3 %v631_v6 }
 0x114   :  { %849 = vmatmul.bf16.gmra.mxu0 %v632_v31 }
 0x115   :  { %868 = vmatmul.bf16.gmra.mxu1 %v633_v32 }
 0x116   :  { %887 = vmatmul.bf16.gmra.mxu2 %v634_v33 }
 0x117   :  { %906 = vmatmul.bf16.gmra.mxu3 %v635_v34 }
 0x181   :  { %v845_v35 = vpop.f32.mrf.mxu0 }
 0x182   :  { %v864_v36 = vpop.f32.mrf.mxu1 }
 0x183   :  { %v865_v11 = vadd.f32 %v864_v36, %v845_v35 }
 0x189   :  { %v883_v37 = vpop.f32.mrf.mxu2  ;;  %v847_v40 = vpop.f32.mrf.mxu0 }
 0x18a   :  { %v902_v38 = vpop.f32.mrf.mxu3  ;;  %v884_v39 = vadd.f32 %v883_v37, %v865_v11  ;;  %v866_v41 = vpop.f32.mrf.mxu1 }
 0x18b   :  { %v867_v45 = vadd.f32 %v866_v41, %v847_v40 }
 0x18c   :  { %v903_v43 = vadd.f32 %v902_v38, %v884_v39 }
 0x18e   :  { %v912_v44 = vadd.f32 %v903_v43, %v543_v42 }
 0x190   :  { %916 = vst [vmem:[#allocation2 + $0x10] sm:$0xff] %v912_v44 }
 0x191   :  { %v885_v46 = vpop.f32.mrf.mxu2  ;;  %v850_v50 = vpop.f32.mrf.mxu0 }
 0x192   :  { %v904_v47 = vpop.f32.mrf.mxu3  ;;  %v886_v48 = vadd.f32 %v885_v46, %v867_v45  ;;  %v869_v51 = vpop.f32.mrf.mxu1 }
 0x193   :  { %v870_v54 = vadd.f32 %v869_v51, %v850_v50 }
 0x194   :  { %v905_v52 = vadd.f32 %v904_v47, %v886_v48 }
 0x196   :  { %v913_v53 = vadd.f32 %v905_v52, %v544_v49 }
 0x198   :  { %917 = vst [vmem:[#allocation2] sm:$0xff] %v913_v53 }
 0x199   :  { %v888_v55 = vpop.f32.mrf.mxu2  ;;  %v852_v60 = vpop.f32.mrf.mxu0 }
 0x19a   :  { %v907_v56 = vpop.f32.mrf.mxu3  ;;  %v889_v57 = vadd.f32 %v888_v55, %v870_v54  ;;  %v871_v61 = vpop.f32.mrf.mxu1 }
 0x19b   :  { %v872_v63 = vadd.f32 %v871_v61, %v852_v60 }
 0x19c   :  { %v908_v59 = vadd.f32 %v907_v56, %v889_v57 }
 0x19e   :  { %v914_v62 = vadd.f32 %v908_v59, %v545_v58 }
 0x1a0   :  { %918 = vst [vmem:[#allocation2 + $0x18] sm:$0xff] %v914_v62 }
 0x1a1   :  { %v890_v0 = vpop.f32.mrf.mxu2 }
 0x1a2   :  { %v891_v1 = vadd.f32 %v890_v0, %v872_v63  ;;  %v909_v3 = vpop.f32.mrf.mxu3 }
 0x1a4   :  { %v910_v4 = vadd.f32 %v909_v3, %v891_v1 }
 0x1a6   :  { %v915_v5 = vadd.f32 %v910_v4, %v546_v2 }
 0x1a8   :  { %919 = vst [vmem:[#allocation2 + $0x8] sm:$0xff] %v915_v5 }
 0x1a9 PF:  { %p920_p6 = scmp.le.s32.totalorder %s2130_s16, 2  ;;  %p921_p7 = scmp.gt.s32.totalorder %s2132_s17, 2 }
 0x1ab   :  { %p922_p8 = pnand %p921_p7, %p920_p6 }
 0x1ad   :  { %925 = sbr.rel (%p922_p8) target bundleno = 631 (0x277), region = 21 }
 0x1b2   :  { %v2051_v6 = vld [vmem:[%s2599_s2 + $0x238] sm:$0xff]  ;;  %v2050_v10 = vld [vmem:[%s2599_s2 + $0x230] sm:$0xff]  ;;  %v2049_v15 = vld [vmem:[%s2599_s2 + $0x228] sm:$0xff]  ;;  %vm950_vm3 = vcmask 1042432   ;;  %vm951_vm4 = vcmask 1046532  }
 0x1b3   :  { %v2059_v7 = vld [vmem:[%s2599_s2 + $0x278] sm:$0xff]  ;;  %1274 = vmatpush.bf16.msra.mxu0 %v2051_v6  ;;  %v2058_v12 = vld [vmem:[%s2599_s2 + $0x270] sm:$0xff]  ;;  %v2057_v16 = vld [vmem:[%s2599_s2 + $0x268] sm:$0xff] }
 0x1b4   :  { %v2067_v8 = vld [vmem:[%s2599_s2 + $0x2b8] sm:$0xff]  ;;  %1293 = vmatpush.bf16.msra.mxu1 %v2059_v7  ;;  %v2066_v13 = vld [vmem:[%s2599_s2 + $0x2b0] sm:$0xff]  ;;  %v2065_v17 = vld [vmem:[%s2599_s2 + $0x2a8] sm:$0xff] }
 0x1b5   :  { %v2075_v9 = vld [vmem:[%s2599_s2 + $0x2f8] sm:$0xff]  ;;  %1312 = vmatpush.bf16.msra.mxu2 %v2067_v8  ;;  %v2074_v14 = vld [vmem:[%s2599_s2 + $0x2f0] sm:$0xff]  ;;  %v2073_v18 = vld [vmem:[%s2599_s2 + $0x2e8] sm:$0xff] }
 0x1b6   :  { %1331 = vmatpush.bf16.msra.mxu3 %v2075_v9  ;;  %v2048_v19 = vld [vmem:[%s2599_s2 + $0x220] sm:$0xff]  ;;  %v928_v23 = vld [vmem:[%s2598_s1 + $0x10] sm:$0xff]  ;;  %v929_v24 = vld [vmem:[%s2598_s1 + $0x18] sm:$0xff] }
 0x1b7   :  { %1275 = vmatpush.bf16.msra.mxu0 %v2050_v10  ;;  %v2056_v20 = vld [vmem:[%s2599_s2 + $0x260] sm:$0xff]  ;;  %v2047_v25 = vld [vmem:[%s2599_s2 + $0x218] sm:$0xff]  ;;  %v955_v28 = vrot.slane %v928_v23, 5  ;;  %v959_v32 = vrot.slane %v929_v24, 5  ;;  %v927_v33 = vld [vmem:[%s2598_s1 + $0x8] sm:$0xee] }
 0x1b8   :  { %1294 = vmatpush.bf16.msra.mxu1 %v2058_v12  ;;  %v2064_v21 = vld [vmem:[%s2599_s2 + $0x2a0] sm:$0xff]  ;;  %v2055_v26 = vld [vmem:[%s2599_s2 + $0x258] sm:$0xff]  ;;  %v931_v34 = vld [vmem:[%s2598_s1 + $0x28] sm:$0x11]  ;;  %v1777_v42 = vrot.slane %v927_v33, 9 }
 0x1b9   :  { %1313 = vmatpush.bf16.msra.mxu2 %v2066_v13  ;;  %v2072_v22 = vld [vmem:[%s2599_s2 + $0x2e0] sm:$0xff]  ;;  %v2063_v27 = vld [vmem:[%s2599_s2 + $0x298] sm:$0xff]  ;;  %v2046_v35 = vld [vmem:[%s2599_s2 + $0x210] sm:$0xff]  ;;  %v961_v37 = vrot.slane %v955_v28, 4  ;;  %v964_v43 = vrot.slane %v959_v32, 4  ;;  %v965_v44 = vrot.slane %v931_v34, 5 }
 0x1ba   :  { %1332 = vmatpush.bf16.msra.mxu3 %v2074_v14  ;;  %v2071_v29 = vld [vmem:[%s2599_s2 + $0x2d8] sm:$0xff]  ;;  %v926_v30 = vld [vmem:[%s2598_s1] sm:$0xee]  ;;  %v930_v31 = vld [vmem:[%s2598_s1 + $0x20] sm:$0x11] }
 0x1bb   :  { %1276 = vmatpush.bf16.msra.mxu0 %v2049_v15  ;;  %v2054_v36 = vld [vmem:[%s2599_s2 + $0x250] sm:$0xff]  ;;  %v1776_v11 = vrot.slane %v926_v30, 9  ;;  %v962_v38 = vrot.slane %v930_v31, 5  ;;  %vm2529_vm5 = vmor %vm950_vm3, %vm951_vm4  ;;  %v2045_v45 = vld [vmem:[%s2599_s2 + $0x208] sm:$0xff] }
 0x1bc   :  { %1295 = vmatpush.bf16.msra.mxu1 %v2057_v16  ;;  %v2062_v39 = vld [vmem:[%s2599_s2 + $0x290] sm:$0xff]  ;;  %v2053_v46 = vld [vmem:[%s2599_s2 + $0x248] sm:$0xff]  ;;  %v960_v51 = vsel %vm2529_vm5, %v1777_v42, %v959_v32  ;;  %v966_v52 = vsel %vm2529_vm5, %v964_v43, %v965_v44  ;;  %v2044_v57 = vld [vmem:[%s2599_s2 + $0x200] sm:$0xff] }
 0x1bd   :  { %1314 = vmatpush.bf16.msra.mxu2 %v2065_v17  ;;  %v2070_v40 = vld [vmem:[%s2599_s2 + $0x2d0] sm:$0xff]  ;;  %v956_v47 = vsel %vm2529_vm5, %v1776_v11, %v955_v28  ;;  %v963_v48 = vsel %vm2529_vm5, %v961_v37, %v962_v38  ;;  %v2061_v49 = vld [vmem:[%s2599_s2 + $0x288] sm:$0xff]  ;;  %v2052_v58 = vld [vmem:[%s2599_s2 + $0x240] sm:$0xff]  ;;  %v1052_v59 = vunpack.c.l.b16 %v960_v51  ;;  %v1056_v60 = vunpack.c.l.b16 %v966_v52 }
 0x1be   :  { %1333 = vmatpush.bf16.msra.mxu3 %v2073_v18  ;;  %v2069_v50 = vld [vmem:[%s2599_s2 + $0x2c8] sm:$0xff]  ;;  %v1050_v53 = vunpack.c.l.b16 %v956_v47  ;;  %v1054_v54 = vunpack.c.l.b16 %v963_v48  ;;  %v1051_v55 = vunpack.c.h.b16 %v956_v47  ;;  %v1055_v56 = vunpack.c.h.b16 %v963_v48  ;;  %v2060_v63 = vld [vmem:[%s2599_s2 + $0x280] sm:$0xff]  ;;  %v934_v1 = vld [vmem:[%s2598_s1 + $0x50] sm:$0xff] }
 0x1bf   :  { %1277 = vmatpush.bf16.msra.mxu0 %v2048_v19  ;;  %v1053_v61 = vunpack.c.h.b16 %v960_v51  ;;  %v1057_v62 = vunpack.c.h.b16 %v966_v52  ;;  %v2068_v0 = vld [vmem:[%s2599_s2 + $0x2c0] sm:$0xff]  ;;  %v935_v2 = vld [vmem:[%s2598_s1 + $0x58] sm:$0xff]  ;;  %v1068_v5 = vpack.c.b16 %v1056_v60, %v1052_v59  ;;  %v969_v7 = vrot.slane %v934_v1, 5  ;;  %v933_v12 = vld [vmem:[%s2598_s1 + $0x48] sm:$0xee] }
 0x1c0   :  { %1296 = vmatpush.bf16.msra.mxu1 %v2056_v20  ;;  %v1066_v3 = vpack.c.b16 %v1054_v54, %v1050_v53  ;;  %v1067_v4 = vpack.c.b16 %v1055_v56, %v1051_v55  ;;  %v932_v8 = vld [vmem:[%s2598_s1 + $0x40] sm:$0xee]  ;;  %v936_v9 = vld [vmem:[%s2598_s1 + $0x60] sm:$0x11]  ;;  %v973_v10 = vrot.slane %v935_v2, 5  ;;  %v1779_v17 = vrot.slane %v933_v12, 9 }
 0x1c1   :  { %1315 = vmatpush.bf16.msra.mxu2 %v2064_v21  ;;  %v1069_v6 = vpack.c.b16 %v1057_v62, %v1053_v61  ;;  %v937_v13 = vld [vmem:[%s2598_s1 + $0x68] sm:$0x11]  ;;  %v1778_v14 = vrot.slane %v932_v8, 9  ;;  %v975_v15 = vrot.slane %v969_v7, 4  ;;  %v976_v16 = vrot.slane %v936_v9, 5  ;;  %v983_v59 = vld [vmem:[#allocation2 + $0x18] sm:$0xff] }
 0x1c2   :  { %1334 = vmatpush.bf16.msra.mxu3 %v2072_v22  ;;  %v978_v18 = vrot.slane %v973_v10, 4  ;;  %v979_v19 = vrot.slane %v937_v13, 5  ;;  %v974_v22 = vsel %vm2529_vm5, %v1779_v17, %v973_v10  ;;  %v981_v43 = vld [vmem:[#allocation2 + $0x10] sm:$0xff] }
 0x1c3   :  { %1278 = vmatpush.bf16.msra.mxu0 %v2047_v25  ;;  %v970_v20 = vsel %vm2529_vm5, %v1778_v14, %v969_v7  ;;  %v977_v21 = vsel %vm2529_vm5, %v975_v15, %v976_v16  ;;  %v1060_v28 = vunpack.c.l.b16 %v974_v22  ;;  %v1061_v30 = vunpack.c.h.b16 %v974_v22 }
 0x1c4   :  { %1297 = vmatpush.bf16.msra.mxu1 %v2055_v26  ;;  %v980_v23 = vsel %vm2529_vm5, %v978_v18, %v979_v19  ;;  %v1058_v24 = vunpack.c.l.b16 %v970_v20  ;;  %v1062_v25 = vunpack.c.l.b16 %v977_v21  ;;  %v1059_v26 = vunpack.c.h.b16 %v970_v20 }
 0x1c5   :  { %1316 = vmatpush.bf16.msra.mxu2 %v2063_v27  ;;  %v1063_v27 = vunpack.c.h.b16 %v977_v21  ;;  %v1065_v31 = vunpack.c.h.b16 %v980_v23 }
 0x1c6   :  { %1335 = vmatpush.bf16.msra.mxu3 %v2071_v29  ;;  %v1064_v29 = vunpack.c.l.b16 %v980_v23  ;;  %v1070_v32 = vpack.c.b16 %v1062_v25, %v1058_v24 }
 0x1c7   :  { %1279 = vmatpush.bf16.msra.mxu0 %v2046_v35  ;;  %v1071_v33 = vpack.c.b16 %v1063_v27, %v1059_v26  ;;  %v1073_v35 = vpack.c.b16 %v1065_v31, %v1061_v30 }
 0x1c8   :  { %1298 = vmatpush.bf16.msra.mxu1 %v2054_v36  ;;  %v1072_v34 = vpack.c.b16 %v1064_v29, %v1060_v28 }
 0x1c9   :  { %1317 = vmatpush.bf16.msra.mxu2 %v2062_v39 }
 0x1ca   :  { %1336 = vmatpush.bf16.msra.mxu3 %v2070_v40 }
 0x1cb   :  { %1280 = vmatpush.bf16.msra.mxu0 %v2045_v45 }
 0x1cc   :  { %1299 = vmatpush.bf16.msra.mxu1 %v2053_v46 }
 0x1cd   :  { %1318 = vmatpush.bf16.msra.mxu2 %v2061_v49 }
 0x1ce   :  { %1337 = vmatpush.bf16.msra.mxu3 %v2069_v50  ;;  %v982_v50 = vld [vmem:[#allocation2] sm:$0xff] }
 0x1cf   :  { %1281 = vmatpush.bf16.msra.mxu0 %v2044_v57 }
 0x1d0   :  { %1300 = vmatpush.bf16.msra.mxu1 %v2052_v58 }
 0x1d1   :  { %1319 = vmatpush.bf16.msra.mxu2 %v2060_v63 }
 0x1d2   :  { %1338 = vmatpush.bf16.msra.mxu3 %v2068_v0  ;;  %1282 = vmatmul.bf16.vlgmr.msra.gmra.mxu0 %v1066_v3  ;;  %v984_v3 = vld [vmem:[#allocation2 + $0x8] sm:$0xff] }
 0x1d3   :  { %1301 = vmatmul.bf16.vlgmr.msra.gmra.mxu1 %v1067_v4 }
 0x1d4   :  { %1320 = vmatmul.bf16.vlgmr.msra.gmra.mxu2 %v1068_v5 }
 0x1d5   :  { %1339 = vmatmul.bf16.vlgmr.msra.gmra.mxu3 %v1069_v6 }
 0x1e2   :  { %1287 = vmatmul.bf16.gmra.mxu0 %v1070_v32 }
 0x1e3   :  { %1306 = vmatmul.bf16.gmra.mxu1 %v1071_v33 }
 0x1e4   :  { %1325 = vmatmul.bf16.gmra.mxu2 %v1072_v34 }
 0x1e5   :  { %1344 = vmatmul.bf16.gmra.mxu3 %v1073_v35 }
 0x24f   :  { %v1283_v36 = vpop.f32.mrf.mxu0 }
 0x250   :  { %v1302_v11 = vpop.f32.mrf.mxu1 }
 0x251   :  { %v1303_v37 = vadd.f32 %v1302_v11, %v1283_v36 }
 0x257   :  { %v1321_v38 = vpop.f32.mrf.mxu2  ;;  %v1285_v41 = vpop.f32.mrf.mxu0 }
 0x258   :  { %v1340_v39 = vpop.f32.mrf.mxu3  ;;  %v1322_v40 = vadd.f32 %v1321_v38, %v1303_v37  ;;  %v1304_v42 = vpop.f32.mrf.mxu1 }
 0x259   :  { %v1305_v46 = vadd.f32 %v1304_v42, %v1285_v41 }
 0x25a   :  { %v1341_v44 = vadd.f32 %v1340_v39, %v1322_v40 }
 0x25c   :  { %v1350_v45 = vadd.f32 %v1341_v44, %v981_v43 }
 0x25e   :  { %1354 = vst [vmem:[#allocation2 + $0x10] sm:$0xff] %v1350_v45 }
 0x25f   :  { %v1323_v47 = vpop.f32.mrf.mxu2  ;;  %v1288_v51 = vpop.f32.mrf.mxu0 }
 0x260   :  { %v1342_v48 = vpop.f32.mrf.mxu3  ;;  %v1324_v49 = vadd.f32 %v1323_v47, %v1305_v46  ;;  %v1307_v52 = vpop.f32.mrf.mxu1 }
 0x261   :  { %v1308_v55 = vadd.f32 %v1307_v52, %v1288_v51 }
 0x262   :  { %v1343_v53 = vadd.f32 %v1342_v48, %v1324_v49 }
 0x264   :  { %v1351_v54 = vadd.f32 %v1343_v53, %v982_v50 }
 0x266   :  { %1355 = vst [vmem:[#allocation2] sm:$0xff] %v1351_v54 }
 0x267   :  { %v1326_v56 = vpop.f32.mrf.mxu2  ;;  %v1290_v61 = vpop.f32.mrf.mxu0 }
 0x268   :  { %v1345_v57 = vpop.f32.mrf.mxu3  ;;  %v1327_v58 = vadd.f32 %v1326_v56, %v1308_v55  ;;  %v1309_v62 = vpop.f32.mrf.mxu1 }
 0x269   :  { %v1310_v0 = vadd.f32 %v1309_v62, %v1290_v61 }
 0x26a   :  { %v1346_v60 = vadd.f32 %v1345_v57, %v1327_v58 }
 0x26c   :  { %v1352_v63 = vadd.f32 %v1346_v60, %v983_v59 }
 0x26e   :  { %1356 = vst [vmem:[#allocation2 + $0x18] sm:$0xff] %v1352_v63 }
 0x26f   :  { %v1328_v1 = vpop.f32.mrf.mxu2 }
 0x270   :  { %v1329_v2 = vadd.f32 %v1328_v1, %v1310_v0  ;;  %v1347_v4 = vpop.f32.mrf.mxu3 }
 0x272   :  { %v1348_v5 = vadd.f32 %v1347_v4, %v1329_v2 }
 0x274   :  { %v1353_v6 = vadd.f32 %v1348_v5, %v984_v3 }
 0x276   :  { %1357 = vst [vmem:[#allocation2 + $0x8] sm:$0xff] %v1353_v6 }
 0x277 PF:  { %v1358_v7 = vld [vmem:[#allocation2 + $0x10] sm:$0xff]  ;;  %v1359_v8 = vld [vmem:[#allocation2] sm:$0xff]  ;;  %v1360_v9 = vld [vmem:[#allocation2 + $0x18] sm:$0xff] }
 0x278   :  { %v1362_v12 = vadd.f32 %v1359_v8, %v1358_v7  ;;  %v1372_v13 = vmul.f32 %v1358_v7, %v1358_v7  ;;  %v1373_v14 = vmul.f32 %v1359_v8, %v1359_v8  ;;  %v1374_v15 = vmul.f32 %v1360_v9, %v1360_v9 }
 0x27a   :  { %v1363_v16 = vadd.f32 %v1362_v12, %v1360_v9  ;;  %v1376_v18 = vadd.f32 %v1373_v14, %v1372_v13 }
 0x27c   :  { %v1377_v20 = vadd.f32 %v1376_v18, %v1374_v15 }
 0x27d   :  { %v1361_v10 = vld [vmem:[#allocation2 + $0x8] sm:$0xff] }
 0x27e   :  { %v1375_v17 = vmul.f32 %v1361_v10, %v1361_v10  ;;  %v1364_v19 = vadd.f32 %v1363_v16, %v1361_v10 }
 0x280   :  { %v1365_v21 = vrot.slane %v1364_v19, 4  ;;  %v1378_v22 = vadd.f32 %v1377_v20, %v1375_v17 }
 0x282   :  { %v1366_v23 = vadd.f32 %v1365_v21, %v1364_v19  ;;  %v1379_v24 = vrot.slane %v1378_v22, 4 }
 0x284   :  { %v1367_v25 = vrot.slane %v1366_v23, 2  ;;  %v1380_v26 = vadd.f32 %v1379_v24, %v1378_v22 }
 0x286   :  { %v1368_v27 = vadd.f32 %v1367_v25, %v1366_v23  ;;  %v1381_v28 = vrot.slane %v1380_v26, 2 }
 0x288   :  { %v1369_v29 = vrot.slane %v1368_v27, 1  ;;  %v1382_v30 = vadd.f32 %v1381_v28, %v1380_v26 }
 0x28a   :  { %v1370_v31 = vadd.f32 %v1369_v29, %v1368_v27  ;;  %v1383_v32 = vrot.slane %v1382_v30, 1 }
 0x28c   :  { %v1371_v33 = vmul.f32 0.03125, %v1370_v31  ;;  %v1384_v34 = vadd.f32 %v1383_v32, %v1382_v30 }
 0x28e   :  { %v1385_v35 = vmul.f32 0.03125, %v1384_v34  ;;  %v1386_v36 = vmul.f32 %v1371_v33, %v1371_v33  ;;  %v1388_v43 = vsub.f32 %v1358_v7, %v1371_v33  ;;  %v1389_v44 = vsub.f32 %v1359_v8, %v1371_v33 }
 0x28f   :  { %v1390_v45 = vsub.f32 %v1360_v9, %v1371_v33  ;;  %v1391_v46 = vsub.f32 %v1361_v10, %v1371_v33 }
 0x290   :  { %v1387_v11 = vsub.f32 %v1385_v35, %v1386_v36 }
 0x292   :  { %v1392_v37 = vadd.f32 1e-05, %v1387_v11 }
 0x294   :  { %2089 = vrsqrt.f32 %v1392_v37  ;;  %vm1399_vm6 = vweird.f32 %v1392_v37 }
 0x29a   :  { %v2090_v38 = vpop.eup %2089 }
 0x29b   :  { %v1394_v39 = vmul.f32 %v2090_v38, %v1392_v37  ;;  %vm1400_vm7 = vweird.f32 %v2090_v38 }
 0x29c   :  { %vm1401_vm8 = vmor %vm1399_vm6, %vm1400_vm7 }
 0x29d   :  { %v1395_v40 = vmul.f32 %v2090_v38, %v1394_v39 }
 0x29f   :  { %v1396_v41 = vmul.f32 0.5, %v1395_v40 }
 0x2a1   :  { %v1397_v42 = vsub.f32 1.5, %v1396_v41 }
 0x2a3   :  { %v1398_v47 = vmul.f32 %v2090_v38, %v1397_v42 }
 0x2a5   :  { %v1402_v48 = vsel %vm1401_vm8, %v2090_v38, %v1398_v47 }
 0x2a6   :  { %v1403_v49 = vmul.f32 %v1402_v48, %v1388_v43  ;;  %v1404_v50 = vmul.f32 %v1402_v48, %v1389_v44  ;;  %v1405_v51 = vmul.f32 %v1402_v48, %v1390_v45  ;;  %v1406_v52 = vmul.f32 %v1402_v48, %v1391_v46 }
 0x2a8   :  { %v1407_v53 = vmax.f32 %v1403_v49, 0.0  ;;  %v1408_v54 = vmax.f32 %v1404_v50, 0.0  ;;  %v1409_v55 = vmax.f32 %v1405_v51, 0.0  ;;  %v1410_v56 = vmax.f32 %v1406_v52, 0.0 }
 0x2aa   :  { %v2079_v57 = vpack.c.bf16 %v1408_v54, %v1407_v53  ;;  %v2084_v58 = vpack.c.bf16 %v1410_v56, %v1409_v55 }
 0x2ac   :  { %2080 = vst [vmem:[%s2600_s3] sm:$0xff] %v2079_v57  }
 0x2ad   :  { %2086 = vst [vmem:[%s2600_s3 + $0x8] sm:$0xff] %v2084_v58  }

</bundles_post_ra>
